<compile_context>
chip_gen: v7x
topology: tpu7x:2x2x1
jax: 0.10.0
libtpu: 0.0.40
codegen_flags: <defaults>
</compile_context>

<pallas_src>
import functools

import jax
import jax.numpy as jnp
from jax.experimental import pallas as pl
from jax.experimental.pallas import tpu as pltpu

LANE = 128        # TPU lane width: all tiles padded to multiples of this
_BIAS_ROWS = 8    # f32 sublane tile height; keeps every section 8-row aligned


def _round_up(n, m):
    return ((n + m - 1) // m) * m


def polnet_kernel(x_ref, p_ref, out_ref, *, layer_meta):
    """MLP (Linear+ReLU stack -> final Linear) + tanh / softplus heads.

    layer_meta: static tuple of (w_row_off, b_row_off) per layer describing
    where each (lane x lane) weight tile / bias row lives in the packed buffer.
    All tensors are lane-dense (last dim = lane = multiple of 128); padded
    lanes carry zeros, so the padded matmuls give bit-identical valid columns.
    """
    lane = p_ref.shape[1]
    n_layers = len(layer_meta)
    h = x_ref[...]                                   # (block_b, lane), zero-padded lanes
    for li, (w_off, b_off) in enumerate(layer_meta):
        w = p_ref[w_off:w_off + lane, :]             # full (lane, lane) MXU tile
        b = p_ref[b_off:b_off + 1, :]                # (1, lane) bias row, broadcasts
        h = jnp.dot(h, w, preferred_element_type=jnp.float32) + b
        if li < n_layers - 1:
            h = jnp.maximum(h, 0.0)
            # TODO(synk): nn.Dropout(p=0.1) is identity in eval mode; a
            # training-mode forward would need pltpu.prng_seed/prng_random_bits
            # with a seed threaded in via SMEM/scalar prefetch.

    # Both heads share the final Linear output.  Each store is a full 128-lane
    # tile at a 128-aligned offset -> unmasked full-vreg stores (lane-dense
    # output per perf review); the wrapper slices out the act_dim columns.
    out_ref[:, :lane] = jnp.tanh(h)
    # Numerically stable softplus: max(x, 0) + log1p(exp(-|x|)).
    out_ref[:, lane:] = jnp.maximum(h, 0.0) + jnp.log1p(jnp.exp(-jnp.abs(h)))


def pack_params(params):
    """Pack ((W1,b1),...,(Wn,bn)) (W_i: (in,out), b_i: (out,)) into one padded,
    lane-dense f32 buffer.  Each weight section is (lane, lane) and each bias
    section (_BIAS_ROWS, lane), zero-padded, so every in-kernel read is a full
    aligned tile.  Returns (buffer, layer_meta, lane)."""
    dims = []
    for w, _ in params:
        dims += list(w.shape)
    lane = _round_up(max(dims), LANE)

    meta = []
    row = 0
    for _ in params:
        w_off = row
        b_off = w_off + lane
        row = b_off + _BIAS_ROWS
        meta.append((w_off, b_off))

    buf = jnp.zeros((row, lane), jnp.float32)
    for (w, b), (w_off, b_off) in zip(params, meta):
        d_in, d_out = w.shape
        buf = buf.at[w_off:w_off + d_in, :d_out].set(w)
        buf = buf.at[b_off, :d_out].set(jnp.reshape(b, (-1,)))
    return buf, tuple(meta), lane


def _choose_block_b(batch, block_b=None):
    # Perf review: this kernel is pure per-grid-step overhead, so rollout-sized
    # batches (<= 512 rows) run as a single block; larger batches use 1024-row
    # blocks so a "parallel" grid gives v7x's two TensorCores real work each
    # ("parallel" is a no-op on single-TC v5e/v6e, which just want big blocks).
    if block_b is None:
        block_b = batch if batch <= 512 else 1024
    return min(block_b, batch)


def polnet_forward(x, packed, layer_meta, act_dim, *, block_b=None):
    """Returns (mu, var), each (batch, act_dim)."""
    batch, d_in0 = x.shape
    n_rows, lane = packed.shape
    block_b = _choose_block_b(batch, block_b)
    grid = (pl.cdiv(batch, block_b),)

    # Zero-pad the input to the lane-dense width so the first dot is a full
    # MXU tile and the x loads are unmasked; zeros leave results unchanged.
    if d_in0 < lane:
        x = jnp.pad(x, ((0, 0), (0, lane - d_in0)))

    kernel = functools.partial(polnet_kernel, layer_meta=layer_meta)

    n_layers = len(layer_meta)
    flops = 2 * batch * lane * lane * n_layers            # padded-tile matmul work
    transcendentals = 3 * batch * lane                    # tanh + exp + log1p per lane
    bytes_accessed = 4 * (batch * lane + packed.size + batch * 2 * lane)

    def build(weight_pipeline_mode):
        w_kwargs = ({} if weight_pipeline_mode is None
                    else {"pipeline_mode": weight_pipeline_mode})
        return pl.pallas_call(
            kernel,
            out_shape=jax.ShapeDtypeStruct((batch, 2 * lane), jnp.float32),
            grid_spec=pltpu.PrefetchScalarGridSpec(
                num_scalar_prefetch=0,
                grid=grid,
                in_specs=[
                    pl.BlockSpec((block_b, lane), lambda i: (i, 0)),
                    # Constant index_map: weights DMA'd once, resident in VMEM
                    # across all grid steps.
                    pl.BlockSpec((n_rows, lane), lambda i: (0, 0), **w_kwargs),
                ],
                out_specs=pl.BlockSpec((block_b, 2 * lane), lambda i: (i, 0)),
            ),
            compiler_params=pltpu.CompilerParams(
                dimension_semantics=("parallel",),   # shard batch grid across TCs on v7x
            ),
            cost_estimate=pl.CostEstimate(
                flops=flops,
                transcendentals=transcendentals,
                bytes_accessed=bytes_accessed,
            ),
        )

    try:
        # Single-buffer the grid-invariant weight block (perf review): no second
        # VMEM copy / pipeline bookkeeping for a block that never changes.
        out = build(pl.Buffered(1))(x, packed)
    except Exception:
        # Fallback for jax builds that reject pipeline_mode on the grid pipeline.
        out = build(None)(x, packed)

    return out[:, :act_dim], out[:, lane:lane + act_dim]


def make_params(key, arc):
    """Deterministic PyTorch-Linear-style init: U(-1/sqrt(fan_in), 1/sqrt(fan_in))."""
    params = []
    for fan_in, fan_out in zip(arc[:-1], arc[1:]):
        key, kw, kb = jax.random.split(key, 3)
        bound = 1.0 / float(fan_in) ** 0.5
        w = jax.random.uniform(kw, (fan_in, fan_out), jnp.float32, -bound, bound)
        b = jax.random.uniform(kb, (fan_out,), jnp.float32, -bound, bound)
        params.append((w, b))
    return tuple(params)


def polnet_reference(x, params):
    h = x
    n = len(params)
    for i, (w, b) in enumerate(params):
        h = jnp.dot(h, w, precision=jax.lax.Precision.HIGHEST) + b
        if i < n - 1:
            h = jnp.maximum(h, 0.0)
    return jnp.tanh(h), jax.nn.softplus(h)


if __name__ == "__main__":
    # Arc = [obs_dim, hidden, hidden, act_dim] -> 3 Linear layers, matching
    # PolNet.create_model for len(Arc) == 4; Dropout is identity in eval mode.
    arc = [16, 32, 32, 8]
    batch = 256   # rollout-sized batch -> one grid step amortizes fixed overhead

    key = jax.random.PRNGKey(0)
    key, kx = jax.random.split(key)
    x = jax.random.normal(kx, (batch, arc[0]), dtype=jnp.float32)
    params = make_params(key, arc)

    packed, layer_meta, lane = pack_params(params)
    act_dim = arc[-1]

    mu, var = polnet_forward(x, packed, layer_meta, act_dim)
    jax.block_until_ready((mu, var))

    mu_ref, var_ref = polnet_reference(x, params)
    assert mu.shape == (batch, act_dim) and var.shape == (batch, act_dim)
    # Tolerance covers the fact that f32 matmuls may run as bf16 MXU passes
    # (depending on generation / compiler precision defaults) on either side,
    # while still catching any packing / layout / head-fusion bug (O(0.1-1)).
    assert jnp.allclose(mu, mu_ref, atol=1e-2, rtol=1e-2)
    assert jnp.allclose(var, var_ref, atol=1e-2, rtol=1e-2)

    print("KERNEL_OK")
</pallas_src>

<mosaic_0001>
module attributes {stable_mosaic.version = 11 : i64} {
  func.func @polnet_kernel(%arg0: i32, %arg1: memref<256x128xf32, #tpu.memory_space<vmem>>, %arg2: memref<408x128xf32, #tpu.memory_space<vmem>>, %arg3: memref<256x256xf32, #tpu.memory_space<vmem>>) attributes {dimension_semantics = [#tpu.dimension_semantics<parallel>], iteration_bounds = array<i64: 1>, scalar_prefetch = 0 : i64, scratch_operands = 0 : i64, tpu.core_type = #tpu.core_type<tc>, window_params = [{transform_indices = @transform_0, window_bounds = array<i64: 256, 128>}, {pipeline_mode = #tpu.pipeline_mode<synchronous>, transform_indices = @transform_1, window_bounds = array<i64: 408, 128>}, {transform_indices = @transform_2, window_bounds = array<i64: 256, 256>}]} {
    %c0 = arith.constant 0 : index
    %c0_0 = arith.constant 0 : index
    %0 = vector.load %arg1[%c0, %c0_0] : memref<256x128xf32, #tpu.memory_space<vmem>>, vector<256x128xf32>
    %c0_1 = arith.constant 0 : index
    %c0_2 = arith.constant 0 : index
    %1 = vector.load %arg2[%c0_1, %c0_2] : memref<408x128xf32, #tpu.memory_space<vmem>>, vector<128x128xf32>
    %c128 = arith.constant 128 : index
    %c0_3 = arith.constant 0 : index
    %2 = vector.load %arg2[%c128, %c0_3] : memref<408x128xf32, #tpu.memory_space<vmem>>, vector<1x128xf32>
    %cst = arith.constant dense<0.000000e+00> : vector<256x128xf32>
    %3 = tpu.matmul %0, %1, %cst {dimension_numbers = #tpu.dot_dimension_numbers<[1], [0], [0], [1], [0, 0, 1, 1], [], []>} : vector<256x128xf32>, vector<128x128xf32>, vector<256x128xf32> -> vector<256x128xf32>
    %4 = vector.broadcast %2 : vector<1x128xf32> to vector<256x128xf32>
    %5 = arith.addf %3, %4 : vector<256x128xf32>
    %cst_4 = arith.constant 0.000000e+00 : f32
    %6 = vector.broadcast %cst_4 : f32 to vector<256x128xf32>
    %7 = arith.maximumf %5, %6 : vector<256x128xf32>
    %c136 = arith.constant 136 : index
    %c0_5 = arith.constant 0 : index
    %8 = vector.load %arg2[%c136, %c0_5] : memref<408x128xf32, #tpu.memory_space<vmem>>, vector<128x128xf32>
    %c264 = arith.constant 264 : index
    %c0_6 = arith.constant 0 : index
    %9 = vector.load %arg2[%c264, %c0_6] : memref<408x128xf32, #tpu.memory_space<vmem>>, vector<1x128xf32>
    %cst_7 = arith.constant dense<0.000000e+00> : vector<256x128xf32>
    %10 = tpu.matmul %7, %8, %cst_7 {dimension_numbers = #tpu.dot_dimension_numbers<[1], [0], [0], [1], [0, 0, 1, 1], [], []>} : vector<256x128xf32>, vector<128x128xf32>, vector<256x128xf32> -> vector<256x128xf32>
    %11 = vector.broadcast %9 : vector<1x128xf32> to vector<256x128xf32>
    %12 = arith.addf %10, %11 : vector<256x128xf32>
    %cst_8 = arith.constant 0.000000e+00 : f32
    %13 = vector.broadcast %cst_8 : f32 to vector<256x128xf32>
    %14 = arith.maximumf %12, %13 : vector<256x128xf32>
    %c272 = arith.constant 272 : index
    %c0_9 = arith.constant 0 : index
    %15 = vector.load %arg2[%c272, %c0_9] : memref<408x128xf32, #tpu.memory_space<vmem>>, vector<128x128xf32>
    %c400 = arith.constant 400 : index
    %c0_10 = arith.constant 0 : index
    %16 = vector.load %arg2[%c400, %c0_10] : memref<408x128xf32, #tpu.memory_space<vmem>>, vector<1x128xf32>
    %cst_11 = arith.constant dense<0.000000e+00> : vector<256x128xf32>
    %17 = tpu.matmul %14, %15, %cst_11 {dimension_numbers = #tpu.dot_dimension_numbers<[1], [0], [0], [1], [0, 0, 1, 1], [], []>} : vector<256x128xf32>, vector<128x128xf32>, vector<256x128xf32> -> vector<256x128xf32>
    %18 = vector.broadcast %16 : vector<1x128xf32> to vector<256x128xf32>
    %19 = arith.addf %17, %18 : vector<256x128xf32>
    %20 = math.tanh %19 : vector<256x128xf32>
    %c0_12 = arith.constant 0 : index
    %c0_13 = arith.constant 0 : index
    %21 = vector.load %arg3[%c0_12, %c0_13] : memref<256x256xf32, #tpu.memory_space<vmem>>, vector<256x128xf32>
    tpu.vector_store %arg3[%c0_12, %c0_13], %20 {strides = array<i32>} : memref<256x256xf32, #tpu.memory_space<vmem>>, vector<256x128xf32>,
    %cst_14 = arith.constant 0.000000e+00 : f32
    %22 = vector.broadcast %cst_14 : f32 to vector<256x128xf32>
    %23 = arith.maximumf %19, %22 : vector<256x128xf32>
    %24 = math.absf %19 : vector<256x128xf32>
    %cst_15 = arith.constant 0.000000e+00 : f32
    %25 = vector.broadcast %cst_15 : f32 to vector<256x128xf32>
    %26 = arith.subf %25, %24 : vector<256x128xf32>
    %27 = math.exp %26 : vector<256x128xf32>
    %28 = math.log1p %27 : vector<256x128xf32>
    %29 = arith.addf %23, %28 : vector<256x128xf32>
    %c0_16 = arith.constant 0 : index
    %c128_17 = arith.constant 128 : index
    %30 = vector.load %arg3[%c0_16, %c128_17] : memref<256x256xf32, #tpu.memory_space<vmem>>, vector<256x128xf32>
    tpu.vector_store %arg3[%c0_16, %c128_17], %29 {strides = array<i32>} : memref<256x256xf32, #tpu.memory_space<vmem>>, vector<256x128xf32>,
    return
  }
  func.func @transform_0(%arg0: i32) -> (i32, i32) {
    %c0_i32 = arith.constant 0 : i32
    %c0_i32_0 = arith.constant 0 : i32
    return %arg0, %c0_i32 : i32, i32
  }
  func.func @transform_1(%arg0: i32) -> (i32, i32) {
    %c0_i32 = arith.constant 0 : i32
    %c0_i32_0 = arith.constant 0 : i32
    %c0_i32_1 = arith.constant 0 : i32
    return %c0_i32, %c0_i32_0 : i32, i32
  }
  func.func @transform_2(%arg0: i32) -> (i32, i32) {
    %c0_i32 = arith.constant 0 : i32
    %c0_i32_0 = arith.constant 0 : i32
    return %arg0, %c0_i32 : i32, i32
  }
}

module attributes {stable_mosaic.version = 11 : i64} {
  func.func @polnet_kernel(%arg0: i32, %arg1: memref<256x128xf32, #tpu.memory_space<vmem>>, %arg2: memref<408x128xf32, #tpu.memory_space<vmem>>, %arg3: memref<256x256xf32, #tpu.memory_space<vmem>>) attributes {dimension_semantics = [#tpu.dimension_semantics<parallel>], iteration_bounds = array<i64: 1>, scalar_prefetch = 0 : i64, scratch_operands = 0 : i64, tpu.core_type = #tpu.core_type<tc>, window_params = [{transform_indices = @transform_0, window_bounds = array<i64: 256, 128>}, {pipeline_mode = #tpu.pipeline_mode<synchronous>, transform_indices = @transform_1, window_bounds = array<i64: 408, 128>}, {transform_indices = @transform_2, window_bounds = array<i64: 256, 256>}]} {
    %c0 = arith.constant 0 : index
    %c0_0 = arith.constant 0 : index
    %0 = vector.load %arg1[%c0, %c0_0] : memref<256x128xf32, #tpu.memory_space<vmem>>, vector<256x128xf32>
    %c0_1 = arith.constant 0 : index
    %c0_2 = arith.constant 0 : index
    %1 = vector.load %arg2[%c0_1, %c0_2] : memref<408x128xf32, #tpu.memory_space<vmem>>, vector<128x128xf32>
    %c128 = arith.constant 128 : index
    %c0_3 = arith.constant 0 : index
    %2 = vector.load %arg2[%c128, %c0_3] : memref<408x128xf32, #tpu.memory_space<vmem>>, vector<1x128xf32>
    %cst = arith.constant dense<0.000000e+00> : vector<256x128xf32>
    %3 = tpu.matmul %0, %1, %cst {dimension_numbers = #tpu.dot_dimension_numbers<[1], [0], [0], [1], [0, 0, 1, 1], [], []>} : vector<256x128xf32>, vector<128x128xf32>, vector<256x128xf32> -> vector<256x128xf32>
    %4 = vector.broadcast %2 : vector<1x128xf32> to vector<256x128xf32>
    %5 = arith.addf %3, %4 : vector<256x128xf32>
    %cst_4 = arith.constant 0.000000e+00 : f32
    %6 = vector.broadcast %cst_4 : f32 to vector<256x128xf32>
    %7 = arith.maximumf %5, %6 : vector<256x128xf32>
    %c136 = arith.constant 136 : index
    %c0_5 = arith.constant 0 : index
    %8 = vector.load %arg2[%c136, %c0_5] : memref<408x128xf32, #tpu.memory_space<vmem>>, vector<128x128xf32>
    %c264 = arith.constant 264 : index
    %c0_6 = arith.constant 0 : index
    %9 = vector.load %arg2[%c264, %c0_6] : memref<408x128xf32, #tpu.memory_space<vmem>>, vector<1x128xf32>
    %cst_7 = arith.constant dense<0.000000e+00> : vector<256x128xf32>
    %10 = tpu.matmul %7, %8, %cst_7 {dimension_numbers = #tpu.dot_dimension_numbers<[1], [0], [0], [1], [0, 0, 1, 1], [], []>} : vector<256x128xf32>, vector<128x128xf32>, vector<256x128xf32> -> vector<256x128xf32>
    %11 = vector.broadcast %9 : vector<1x128xf32> to vector<256x128xf32>
    %12 = arith.addf %10, %11 : vector<256x128xf32>
    %cst_8 = arith.constant 0.000000e+00 : f32
    %13 = vector.broadcast %cst_8 : f32 to vector<256x128xf32>
    %14 = arith.maximumf %12, %13 : vector<256x128xf32>
    %c272 = arith.constant 272 : index
    %c0_9 = arith.constant 0 : index
    %15 = vector.load %arg2[%c272, %c0_9] : memref<408x128xf32, #tpu.memory_space<vmem>>, vector<128x128xf32>
    %c400 = arith.constant 400 : index
    %c0_10 = arith.constant 0 : index
    %16 = vector.load %arg2[%c400, %c0_10] : memref<408x128xf32, #tpu.memory_space<vmem>>, vector<1x128xf32>
    %cst_11 = arith.constant dense<0.000000e+00> : vector<256x128xf32>
    %17 = tpu.matmul %14, %15, %cst_11 {dimension_numbers = #tpu.dot_dimension_numbers<[1], [0], [0], [1], [0, 0, 1, 1], [], []>} : vector<256x128xf32>, vector<128x128xf32>, vector<256x128xf32> -> vector<256x128xf32>
    %18 = vector.broadcast %16 : vector<1x128xf32> to vector<256x128xf32>
    %19 = arith.addf %17, %18 : vector<256x128xf32>
    %20 = math.tanh %19 : vector<256x128xf32>
    %c0_12 = arith.constant 0 : index
    %c0_13 = arith.constant 0 : index
    %21 = vector.load %arg3[%c0_12, %c0_13] : memref<256x256xf32, #tpu.memory_space<vmem>>, vector<256x128xf32>
    tpu.vector_store %arg3[%c0_12, %c0_13], %20 {strides = array<i32>} : memref<256x256xf32, #tpu.memory_space<vmem>>, vector<256x128xf32>,
    %cst_14 = arith.constant 0.000000e+00 : f32
    %22 = vector.broadcast %cst_14 : f32 to vector<256x128xf32>
    %23 = arith.maximumf %19, %22 : vector<256x128xf32>
    %24 = math.absf %19 : vector<256x128xf32>
    %cst_15 = arith.constant 0.000000e+00 : f32
    %25 = vector.broadcast %cst_15 : f32 to vector<256x128xf32>
    %26 = arith.subf %25, %24 : vector<256x128xf32>
    %27 = math.exp %26 : vector<256x128xf32>
    %28 = math.log1p %27 : vector<256x128xf32>
    %29 = arith.addf %23, %28 : vector<256x128xf32>
    %c0_16 = arith.constant 0 : index
    %c128_17 = arith.constant 128 : index
    %30 = vector.load %arg3[%c0_16, %c128_17] : memref<256x256xf32, #tpu.memory_space<vmem>>, vector<256x128xf32>
    tpu.vector_store %arg3[%c0_16, %c128_17], %29 {strides = array<i32>} : memref<256x256xf32, #tpu.memory_space<vmem>>, vector<256x128xf32>,
    return
  }
  func.func @transform_0(%arg0: i32) -> (i32, i32) {
    %c0_i32 = arith.constant 0 : i32
    %c0_i32_0 = arith.constant 0 : i32
    return %arg0, %c0_i32 : i32, i32
  }
  func.func @transform_1(%arg0: i32) -> (i32, i32) {
    %c0_i32 = arith.constant 0 : i32
    %c0_i32_0 = arith.constant 0 : i32
    %c0_i32_1 = arith.constant 0 : i32
    return %c0_i32, %c0_i32_0 : i32, i32
  }
  func.func @transform_2(%arg0: i32) -> (i32, i32) {
    %c0_i32 = arith.constant 0 : i32
    %c0_i32_0 = arith.constant 0 : i32
    return %arg0, %c0_i32 : i32, i32
  }
}

</mosaic_0001>

<bundles_post_ra>
// kernel: tpu_custom_call.1
= control target key start
LH: loop header
LB: loop body
LE: loop exit
PB: predicated region body
PF: predicated region fallthrough
CT: control target
= control target key end

     0   :  { %7 = vsyncpa [#allocation3], 0  ;;  %s2879_s0 = inlined_call_operand.hbm [shape: f32[256,128], index: 0, kind: input, shape index: {}]   ;;  %s2880_s1 = inlined_call_operand.hbm [shape: f32[408,128], index: 1, kind: input, shape index: {}]   ;;  %s2881_s2 = inlined_call_operand.hbm [shape: f32[256,256], index: 2, kind: output, shape index: {}]  }
   0x1   :  { %8 = vsyncpa [#allocation6], 0 }
   0x2   :  { %9 = vsyncpa [#allocation4], 0  ;;  %s2239_s9 = smov [#allocation2]   ;;  %s2167_s13 = scalar_lea.hbm %s2879_s0, 4096 }
   0x3   :  { %s15_s10 = sshll.u32 %s2239_s9, 4  ;;  %p2168_p0 = scmp.ne.s32.totalorder %s2879_s0, %s2167_s13  ;;  %s16_s10 = int_to_ptr.vmem [resolvable:$true] %s15_s10 }
   0x4   :  { %p2171_p1 = scmp.lt.u32.totalorder %s2167_s13, %s2879_s0 }
   0x6   :  { %p2173_p2 = pnand %p2171_p1, %p2168_p0 }
   0x8   :  { %2176 = shalt.err (!%p2173_p2)
}
   0x9   :  { %s2177_s18 = scalar_lea.vmem %s16_s10, 4096  ;;  %p2182_p4 = scmp.lt.s32.totalorder %s16_s10, %s16_s10 }
   0xa   :  { %p2178_p3 = scmp.ne.s32.totalorder %s16_s10, %s2177_s18  ;;  %p2183_p5 = scmp.lt.s32.totalorder %s2177_s18, %s2177_s18 }
   0xc   :  { %p2184_p6 = por %p2183_p5, %p2182_p4 }
   0xe   :  { %p2185_p7 = pnand %p2184_p6, %p2178_p3 }
  0x10   :  { %2188 = shalt.err (!%p2185_p7)
}
  0x11   :  { %s2240_s19 = smov 128   ;;  %s2241_s20 = smov 8  }
  0x12   :  { %21 = dma.hbm_to_vmem [thread:$0]  %s2879_s0, 4096, %s16_s10, [#allocation3], %s2240_s19, %s2240_s19, %s2241_s20  }
  0x13   :  { %s2242_s23 = smov [#allocation5]   ;;  %s2189_s27 = scalar_lea.hbm %s2880_s1, 6528 }
  0x14   :  { %s27_s24 = sshll.u32 %s2242_s23, 4  ;;  %p2190_p8 = scmp.ne.s32.totalorder %s2880_s1, %s2189_s27  ;;  %s28_s24 = int_to_ptr.vmem [resolvable:$true] %s27_s24 }
  0x15   :  { %p2193_p9 = scmp.lt.u32.totalorder %s2189_s27, %s2880_s1 }
  0x17   :  { %p2195_p10 = pnand %p2193_p9, %p2190_p8 }
  0x19   :  { %2198 = shalt.err (!%p2195_p10)
}
  0x1a   :  { %s2199_s4 = scalar_lea.vmem %s28_s24, 6528  ;;  %p2204_p12 = scmp.lt.s32.totalorder %s28_s24, %s28_s24 }
  0x1b   :  { %p2200_p11 = scmp.ne.s32.totalorder %s28_s24, %s2199_s4  ;;  %p2205_p13 = scmp.lt.s32.totalorder %s2199_s4, %s2199_s4 }
  0x1d   :  { %p2206_p0 = por %p2205_p13, %p2204_p12 }
  0x1f   :  { %p2207_p1 = pnand %p2206_p0, %p2200_p11 }
  0x21   :  { %2210 = shalt.err (!%p2207_p1)
}
  0x22   :  { %33 = dma.hbm_to_vmem [thread:$0]  %s2880_s1, 6528, %s28_s24, [#allocation6], %s2240_s19, %s2240_s19, %s2241_s20  }
  0x23   :  { %2233 = dma.done.wait [#allocation3], 4096  }
  0x24   :  { %2234 = vsyncadd [#allocation3], 4294963200 }
  0x25   :  { %2235 = dma.done.wait [#allocation6], 6528  }
  0x26   :  { %2236 = vsyncadd [#allocation6], 4294960768  ;;  %v72_v0 = vld [vmem:[#allocation5] sm:$0xff]  ;;  %v73_v1 = vld [vmem:[#allocation5 + $0x8] sm:$0xff]  ;;  %s2243_s1 = smov [#allocation7]  }
  0x27   :  { %v74_v2 = vld [vmem:[#allocation5 + $0x10] sm:$0xff]  ;;  %v1855_v3 = vpack.c.bf16 %v73_v1, %v72_v0  ;;  %v75_v4 = vld [vmem:[#allocation5 + $0x18] sm:$0xff]  ;;  %v76_v6 = vld [vmem:[#allocation5 + $0x20] sm:$0xff]  ;;  %s1455_s6 = sshll.u32 %s2243_s1, 4  ;;  %s1456_s6 = int_to_ptr.vmem [resolvable:$true] %s1455_s6 }
  0x28   :  { %v1859_v5 = vpack.c.bf16 %v75_v4, %v74_v2  ;;  %v77_v7 = vld [vmem:[#allocation5 + $0x28] sm:$0xff]  ;;  %v40_v9 = vld [vmem:[#allocation2] sm:$0xff]  ;;  %v78_v10 = vld [vmem:[#allocation5 + $0x30] sm:$0xff]  ;;  %s2211_s7 = scalar_lea.vmem %s1456_s6, 8192  ;;  %p2216_p3 = scmp.lt.s32.totalorder %s1456_s6, %s1456_s6 }
  0x29   :  { %1856 = vmatprep.subr.bf16.mxu0 %v1855_v3  ;;  %1951 = vmatprep.subr.bf16.mxu1 %v1855_v3  ;;  %v1863_v8 = vpack.c.bf16 %v77_v7, %v76_v6  ;;  %v79_v11 = vld [vmem:[#allocation5 + $0x38] sm:$0xff]  ;;  %v80_v13 = vld [vmem:[#allocation5 + $0x40] sm:$0xff]  ;;  %v81_v14 = vld [vmem:[#allocation5 + $0x48] sm:$0xff]  ;;  %p2212_p2 = scmp.ne.s32.totalorder %s1456_s6, %s2211_s7  ;;  %p2217_p4 = scmp.lt.s32.totalorder %s2211_s7, %s2211_s7 }
  0x2a   :  { %1858 = vmatpush3.bf16.msra.mxu0 %v1855_v3  ;;  %1959 = vmatpush3.bf16.msra.mxu1 %v1855_v3  ;;  %v1867_v12 = vpack.c.bf16 %v79_v11, %v78_v10  ;;  %v56_v15 = vld [vmem:[#allocation2 + $0x80] sm:$0xff]  ;;  %v1871_v16 = vpack.c.bf16 %v81_v14, %v80_v13  ;;  %v82_v17 = vld [vmem:[#allocation5 + $0x50] sm:$0xff]  ;;  %v83_v18 = vld [vmem:[#allocation5 + $0x58] sm:$0xff] }
  0x2b   :  { %1860 = vmatprep.subr.bf16.mxu0 %v1859_v5  ;;  %1952 = vmatprep.subr.bf16.mxu1 %v1859_v5  ;;  %v1875_v19 = vpack.c.bf16 %v83_v18, %v82_v17  ;;  %v84_v20 = vld [vmem:[#allocation5 + $0x60] sm:$0xff]  ;;  %v85_v21 = vld [vmem:[#allocation5 + $0x68] sm:$0xff]  ;;  %v86_v23 = vld [vmem:[#allocation5 + $0x70] sm:$0xff]  ;;  %p2218_p5 = por %p2217_p4, %p2216_p3 }
  0x2c   :  { %1647 = vmatprep.mubr.f32.mxu0 %v40_v9  ;;  %1671 = vmatprep.mubr.f32.mxu1 %v56_v15  ;;  %v1879_v22 = vpack.c.bf16 %v85_v21, %v84_v20  ;;  %v87_v24 = vld [vmem:[#allocation5 + $0x78] sm:$0xff]  ;;  %v350_v26 = vld [vmem:[#allocation5 + $0x88] sm:$0xff]  ;;  %v351_v27 = vld [vmem:[#allocation5 + $0x90] sm:$0xff] }
  0x2d   :  { %v1883_v25 = vpack.c.bf16 %v87_v24, %v86_v23  ;;  %v1887_v28 = vpack.c.bf16 %v351_v27, %v350_v26  ;;  %v352_v29 = vld [vmem:[#allocation5 + $0x98] sm:$0xff]  ;;  %v353_v30 = vld [vmem:[#allocation5 + $0xa0] sm:$0xff]  ;;  %v41_v31 = vld [vmem:[#allocation2 + $0x8] sm:$0xff]  ;;  %p2219_p6 = pnand %p2218_p5, %p2212_p2 }
  0x2e   :  { %1862 = vmatpush3.bf16.msra.mxu0 %v1859_v5  ;;  %1960 = vmatpush3.bf16.msra.mxu1 %v1859_v5  ;;  %v57_v32 = vld [vmem:[#allocation2 + $0x88] sm:$0xff]  ;;  %v42_v33 = vld [vmem:[#allocation2 + $0x10] sm:$0xff]  ;;  %v1891_v35 = vpack.c.bf16 %v353_v30, %v352_v29  ;;  %v43_v38 = vld [vmem:[#allocation2 + $0x18] sm:$0xff] }
  0x2f   :  { %1864 = vmatprep.subr.bf16.mxu0 %v1863_v8  ;;  %1953 = vmatprep.subr.bf16.mxu1 %v1863_v8  ;;  %v58_v34 = vld [vmem:[#allocation2 + $0x90] sm:$0xff]  ;;  %v354_v36 = vld [vmem:[#allocation5 + $0xa8] sm:$0xff]  ;;  %v59_v39 = vld [vmem:[#allocation2 + $0x98] sm:$0xff] }
  0x30   :  { %v355_v37 = vld [vmem:[#allocation5 + $0xb0] sm:$0xff]  ;;  %v44_v40 = vld [vmem:[#allocation2 + $0x20] sm:$0xff]  ;;  %v356_v43 = vld [vmem:[#allocation5 + $0xb8] sm:$0xff] }
  0x31   :  { %v60_v41 = vld [vmem:[#allocation2 + $0xa0] sm:$0xff]  ;;  %v1895_v42 = vpack.c.bf16 %v355_v37, %v354_v36  ;;  %v45_v45 = vld [vmem:[#allocation2 + $0x28] sm:$0xff]  ;;  %v46_v47 = vld [vmem:[#allocation2 + $0x30] sm:$0xff] }
  0x32   :  { %1866 = vmatpush3.bf16.msra.mxu0 %v1863_v8  ;;  %1961 = vmatpush3.bf16.msra.mxu1 %v1863_v8  ;;  %v357_v44 = vld [vmem:[#allocation5 + $0xc0] sm:$0xff]  ;;  %v61_v46 = vld [vmem:[#allocation2 + $0xa8] sm:$0xff]  ;;  %v62_v48 = vld [vmem:[#allocation2 + $0xb0] sm:$0xff] }
  0x33   :  { %1868 = vmatprep.subr.bf16.mxu0 %v1867_v12  ;;  %1954 = vmatprep.subr.bf16.mxu1 %v1867_v12  ;;  %v1899_v49 = vpack.c.bf16 %v357_v44, %v356_v43  ;;  %v358_v50 = vld [vmem:[#allocation5 + $0xc8] sm:$0xff]  ;;  %v359_v51 = vld [vmem:[#allocation5 + $0xd0] sm:$0xff]  ;;  %v47_v52 = vld [vmem:[#allocation2 + $0x38] sm:$0xff] }
  0x34   :  { %v63_v53 = vld [vmem:[#allocation2 + $0xb8] sm:$0xff]  ;;  %v48_v54 = vld [vmem:[#allocation2 + $0x40] sm:$0xff]  ;;  %v1903_v56 = vpack.c.bf16 %v359_v51, %v358_v50  ;;  %v49_v59 = vld [vmem:[#allocation2 + $0x48] sm:$0xff] }
  0x35   :  { %v64_v55 = vld [vmem:[#allocation2 + $0xc0] sm:$0xff]  ;;  %v360_v57 = vld [vmem:[#allocation5 + $0xd8] sm:$0xff]  ;;  %v65_v60 = vld [vmem:[#allocation2 + $0xc8] sm:$0xff] }
  0x36   :  { %1870 = vmatpush3.bf16.msra.mxu0 %v1867_v12  ;;  %1962 = vmatpush3.bf16.msra.mxu1 %v1867_v12  ;;  %v361_v58 = vld [vmem:[#allocation5 + $0xe0] sm:$0xff]  ;;  %v50_v61 = vld [vmem:[#allocation2 + $0x50] sm:$0xff]  ;;  %v362_v0 = vld [vmem:[#allocation5 + $0xe8] sm:$0xff] }
  0x37   :  { %1872 = vmatprep.subr.bf16.mxu0 %v1871_v16  ;;  %1955 = vmatprep.subr.bf16.mxu1 %v1871_v16  ;;  %v66_v62 = vld [vmem:[#allocation2 + $0xd0] sm:$0xff]  ;;  %v1907_v63 = vpack.c.bf16 %v361_v58, %v360_v57  ;;  %v51_v2 = vld [vmem:[#allocation2 + $0x58] sm:$0xff]  ;;  %v52_v4 = vld [vmem:[#allocation2 + $0x60] sm:$0xff] }
  0x38   :  { %v363_v1 = vld [vmem:[#allocation5 + $0xf0] sm:$0xff]  ;;  %v67_v3 = vld [vmem:[#allocation2 + $0xd8] sm:$0xff]  ;;  %v68_v5 = vld [vmem:[#allocation2 + $0xe0] sm:$0xff] }
  0x39   :  { %v1911_v6 = vpack.c.bf16 %v363_v1, %v362_v0  ;;  %v53_v7 = vld [vmem:[#allocation2 + $0x68] sm:$0xff]  ;;  %v54_v9 = vld [vmem:[#allocation2 + $0x70] sm:$0xff]  ;;  %v55_v11 = vld [vmem:[#allocation2 + $0x78] sm:$0xff] }
  0x3a   :  { %1874 = vmatpush3.bf16.msra.mxu0 %v1871_v16  ;;  %1963 = vmatpush3.bf16.msra.mxu1 %v1871_v16  ;;  %v69_v8 = vld [vmem:[#allocation2 + $0xe8] sm:$0xff]  ;;  %v70_v10 = vld [vmem:[#allocation2 + $0xf0] sm:$0xff]  ;;  %v71_v12 = vld [vmem:[#allocation2 + $0xf8] sm:$0xff] }
  0x3b   :  { %1876 = vmatprep.subr.bf16.mxu0 %v1875_v19  ;;  %1956 = vmatprep.subr.bf16.mxu1 %v1875_v19  ;;  %v364_v13 = vld [vmem:[#allocation5 + $0xf8] sm:$0xff]  ;;  %v365_v14 = vld [vmem:[#allocation5 + $0x100] sm:$0xff]  ;;  %v628_v16 = vld [vmem:[#allocation5 + $0x110] sm:$0xff] }
  0x3c   :  { %v1915_v15 = vpack.c.bf16 %v365_v14, %v364_v13  ;;  %v629_v17 = vld [vmem:[#allocation5 + $0x118] sm:$0xff]  ;;  %v630_v18 = vld [vmem:[#allocation5 + $0x120] sm:$0xff]  ;;  %v631_v20 = vld [vmem:[#allocation5 + $0x128] sm:$0xff] }
  0x3d   :  { %v1923_v21 = vpack.c.bf16 %v631_v20, %v630_v18  ;;  %v633_v23 = vld [vmem:[#allocation5 + $0x138] sm:$0xff]  ;;  %v635_v26 = vld [vmem:[#allocation5 + $0x148] sm:$0xff]  ;;  %v2285_v37 = vld [vmem:[#allocation5 + $0x80] ss:$0 sm:$0xff] }
  0x3e   :  { %1878 = vmatpush3.bf16.msra.mxu0 %v1875_v19  ;;  %1964 = vmatpush3.bf16.msra.mxu1 %v1875_v19  ;;  %v1919_v19 = vpack.c.bf16 %v629_v17, %v628_v16  ;;  %v637_v29 = vld [vmem:[#allocation5 + $0x158] sm:$0xff] }
  0x3f   :  { %1880 = vmatprep.subr.bf16.mxu0 %v1879_v22  ;;  %1957 = vmatprep.subr.bf16.mxu1 %v1879_v22 }
  0x42   :  { %1882 = vmatpush3.bf16.msra.mxu0 %v1879_v22  ;;  %1965 = vmatpush3.bf16.msra.mxu1 %v1879_v22  ;;  %v632_v22 = vld [vmem:[#allocation5 + $0x130] sm:$0xff] }
  0x43   :  { %1884 = vmatprep.subr.bf16.mxu0 %v1883_v25  ;;  %1958 = vmatprep.subr.bf16.mxu1 %v1883_v25  ;;  %v1927_v24 = vpack.c.bf16 %v633_v23, %v632_v22 }
  0x46   :  { %1886 = vmatpush3.bf16.msra.mxu0 %v1883_v25  ;;  %1966 = vmatpush3.bf16.msra.mxu1 %v1883_v25  ;;  %v634_v25 = vld [vmem:[#allocation5 + $0x140] sm:$0xff] }
  0x47   :  { %1888 = vmatprep.subr.bf16.mxu1 %v1887_v28  ;;  %1920 = vmatprep.subr.bf16.mxu0 %v1919_v19  ;;  %v1931_v27 = vpack.c.bf16 %v635_v26, %v634_v25 }
  0x49   :  { %1648 = vmatmul.mubr.f32.vlgmr.msra.gmra.mrb[0].mxu0 %v41_v31  ;;  %1672 = vmatmul.mubr.f32.vlgmr.msra.gmra.mrb[0].mxu1 %v57_v32  ;;  %v638_v31 = vld [vmem:[#allocation5 + $0x160] sm:$0xff]  ;;  %v639_v32 = vld [vmem:[#allocation5 + $0x168] sm:$0xff] }
  0x4a   :  { %1650 = vmatprep.mubr.f32.mxu0 %v42_v33  ;;  %1674 = vmatprep.mubr.f32.mxu1 %v58_v34  ;;  %v1939_v33 = vpack.c.bf16 %v639_v32, %v638_v31  ;;  %v640_v34 = vld [vmem:[#allocation5 + $0x170] sm:$0xff] }
  0x4b   :  { %1890 = vmatpush3.bf16.msra.mxu1 %v1887_v28  ;;  %1922 = vmatpush3.bf16.msra.mxu0 %v1919_v19  ;;  %v636_v28 = vld [vmem:[#allocation5 + $0x150] sm:$0xff] }
  0x4c   :  { %1892 = vmatprep.subr.bf16.mxu1 %v1891_v35  ;;  %1924 = vmatprep.subr.bf16.mxu0 %v1923_v21  ;;  %v1935_v30 = vpack.c.bf16 %v637_v29, %v636_v28 }
  0x4d   :  { %1651 = vmatmul.mubr.f32.gmra.mrb[2].mxu0 %v43_v38  ;;  %1675 = vmatmul.mubr.f32.gmra.mrb[2].mxu1 %v59_v39 }
  0x4e   :  { %1653 = vmatprep.mubr.f32.mxu0 %v44_v40  ;;  %1677 = vmatprep.mubr.f32.mxu1 %v60_v41 }
  0x4f   :  { %1894 = vmatpush3.bf16.msra.mxu1 %v1891_v35  ;;  %1926 = vmatpush3.bf16.msra.mxu0 %v1923_v21  ;;  %v641_v35 = vld [vmem:[#allocation5 + $0x178] sm:$0xff] }
  0x50   :  { %1896 = vmatprep.subr.bf16.mxu1 %v1895_v42  ;;  %1928 = vmatprep.subr.bf16.mxu0 %v1927_v24  ;;  %v1943_v36 = vpack.c.bf16 %v641_v35, %v640_v34 }
  0x51   :  { %1654 = vmatmul.mubr.f32.gmra.mrb[4].mxu0 %v45_v45  ;;  %1678 = vmatmul.mubr.f32.gmra.mrb[4].mxu1 %v61_v46 }
  0x52   :  { %1656 = vmatprep.mubr.f32.mxu0 %v46_v47  ;;  %1680 = vmatprep.mubr.f32.mxu1 %v62_v48 }
  0x53   :  { %1898 = vmatpush3.bf16.msra.mxu1 %v1895_v42  ;;  %1930 = vmatpush3.bf16.msra.mxu0 %v1927_v24 }
  0x54   :  { %1900 = vmatprep.subr.bf16.mxu1 %v1899_v49  ;;  %1932 = vmatprep.subr.bf16.mxu0 %v1931_v27 }
  0x55   :  { %1657 = vmatmul.mubr.f32.gmra.mrb[6].mxu0 %v47_v52  ;;  %1681 = vmatmul.mubr.f32.gmra.mrb[6].mxu1 %v63_v53 }
  0x56   :  { %1659 = vmatprep.mubr.f32.mxu0 %v48_v54  ;;  %1683 = vmatprep.mubr.f32.mxu1 %v64_v55 }
  0x57   :  { %1902 = vmatpush3.bf16.msra.mxu1 %v1899_v49  ;;  %1934 = vmatpush3.bf16.msra.mxu0 %v1931_v27 }
  0x58   :  { %1904 = vmatprep.subr.bf16.mxu1 %v1903_v56  ;;  %1936 = vmatprep.subr.bf16.mxu0 %v1935_v30 }
  0x59   :  { %1660 = vmatmul.mubr.f32.gmra.mrb[8].mxu0 %v49_v59  ;;  %1684 = vmatmul.mubr.f32.gmra.mrb[8].mxu1 %v65_v60 }
  0x5a   :  { %1662 = vmatprep.mubr.f32.mxu0 %v50_v61  ;;  %1686 = vmatprep.mubr.f32.mxu1 %v66_v62 }
  0x5b   :  { %1906 = vmatpush3.bf16.msra.mxu1 %v1903_v56  ;;  %1938 = vmatpush3.bf16.msra.mxu0 %v1935_v30 }
  0x5c   :  { %1908 = vmatprep.subr.bf16.mxu1 %v1907_v63  ;;  %1940 = vmatprep.subr.bf16.mxu0 %v1939_v33 }
  0x5d   :  { %1663 = vmatmul.mubr.f32.gmra.mrb[10].mxu0 %v51_v2  ;;  %1687 = vmatmul.mubr.f32.gmra.mrb[10].mxu1 %v67_v3 }
  0x5e   :  { %1665 = vmatprep.mubr.f32.mxu0 %v52_v4  ;;  %1689 = vmatprep.mubr.f32.mxu1 %v68_v5 }
  0x5f   :  { %1910 = vmatpush3.bf16.msra.mxu1 %v1907_v63  ;;  %1942 = vmatpush3.bf16.msra.mxu0 %v1939_v33 }
  0x60   :  { %1912 = vmatprep.subr.bf16.mxu1 %v1911_v6  ;;  %1944 = vmatprep.subr.bf16.mxu0 %v1943_v36 }
  0x61   :  { %1666 = vmatmul.mubr.f32.gmra.mrb[12].mxu0 %v53_v7  ;;  %1690 = vmatmul.mubr.f32.gmra.mrb[12].mxu1 %v69_v8 }
  0x62   :  { %1668 = vmatprep.mubr.f32.mxu0 %v54_v9  ;;  %1692 = vmatprep.mubr.f32.mxu1 %v70_v10 }
  0x63   :  { %1914 = vmatpush3.bf16.msra.mxu1 %v1911_v6  ;;  %1946 = vmatpush3.bf16.msra.mxu0 %v1943_v36 }
  0x64   :  { %1916 = vmatprep.subr.bf16.mxu1 %v1915_v15 }
  0x65   :  { %1669 = vmatmul.mubr.f32.gmra.mrb[14].mxu0 %v55_v11  ;;  %1693 = vmatmul.mubr.f32.gmra.mrb[14].mxu1 %v71_v12 }
  0x67   :  { %1918 = vmatpush3.bf16.msra.mxu1 %v1915_v15 }
 0x11c   :  { %v1649_v38 = vpop.f32.mrb[0].mxu0  ;;  %v2287_v39 = vpop.f32.mrb[0].mxu1 }
 0x11d   :  { %v165_v40 = vadd.f32 %v1649_v38, %v2285_v37  ;;  %v159_v41 = vpop.f32.mrb[1].mxu0  ;;  %v2290_v42 = vpop.f32.mrb[1].mxu1 }
 0x11e   :  { %v160_v43 = vadd.f32 %v2285_v37, %v159_v41  ;;  %v240_v30 = vadd.f32 %v2285_v37, %v2290_v42 }
 0x11f   :  { %v319_v47 = vmax.f32 %v165_v40, 0.0 }
 0x120   :  { %v318_v44 = vmax.f32 %v160_v43, 0.0  ;;  %v1652_v45 = vpop.f32.mrb[2].mxu0  ;;  %v2293_v46 = vpop.f32.mrb[2].mxu1  ;;  %v334_v40 = vmax.f32 %v240_v30, 0.0 }
 0x121   :  { %v175_v48 = vadd.f32 %v1652_v45, %v2285_v37  ;;  %v169_v49 = vpop.f32.mrb[3].mxu0  ;;  %v2296_v50 = vpop.f32.mrb[3].mxu1 }
 0x122   :  { %v170_v51 = vadd.f32 %v2285_v37, %v169_v49  ;;  %1727 = vmatprep.mubr.f32.mxu1 %v318_v44  ;;  %v250_v41 = vadd.f32 %v2285_v37, %v2296_v50  ;;  %v245_v44 = vadd.f32 %v2287_v39, %v2285_v37 }
 0x123   :  { %1728 = vmatmul.mubr.f32.vlgmr.msra.gmra.mrb[16].mxu1 %v319_v47  ;;  %v321_v55 = vmax.f32 %v175_v48, 0.0  ;;  %v255_v48 = vadd.f32 %v2293_v46, %v2285_v37 }
 0x124   :  { %v320_v52 = vmax.f32 %v170_v51, 0.0  ;;  %v1655_v53 = vpop.f32.mrb[4].mxu0  ;;  %v2299_v54 = vpop.f32.mrb[4].mxu1  ;;  %v336_v42 = vmax.f32 %v250_v41, 0.0  ;;  %v335_v47 = vmax.f32 %v245_v44, 0.0 }
 0x125   :  { %v185_v56 = vadd.f32 %v1655_v53, %v2285_v37  ;;  %v179_v57 = vpop.f32.mrb[5].mxu0  ;;  %v2302_v58 = vpop.f32.mrb[5].mxu1  ;;  %v337_v51 = vmax.f32 %v255_v48, 0.0  ;;  %v265_v39 = vadd.f32 %v2299_v54, %v2285_v37 }
 0x126   :  { %v180_v59 = vadd.f32 %v2285_v37, %v179_v57  ;;  %1730 = vmatprep.mubr.f32.mxu1 %v320_v52  ;;  %v260_v45 = vadd.f32 %v2285_v37, %v2302_v58 }
 0x127   :  { %1731 = vmatmul.mubr.f32.gmra.mrb[18].mxu1 %v321_v55  ;;  %v323_v63 = vmax.f32 %v185_v56, 0.0  ;;  %v339_v55 = vmax.f32 %v265_v39, 0.0 }
 0x128   :  { %v322_v60 = vmax.f32 %v180_v59, 0.0  ;;  %v1658_v61 = vpop.f32.mrb[6].mxu0  ;;  %v2305_v62 = vpop.f32.mrb[6].mxu1  ;;  %v338_v49 = vmax.f32 %v260_v45, 0.0 }
 0x129   :  { %v195_v0 = vadd.f32 %v1658_v61, %v2285_v37  ;;  %v189_v1 = vpop.f32.mrb[7].mxu0  ;;  %v269_v2 = vpop.f32.mrb[7].mxu1  ;;  %v275_v56 = vadd.f32 %v2305_v62, %v2285_v37 }
 0x12a   :  { %v190_v3 = vadd.f32 %v2285_v37, %v189_v1  ;;  %1733 = vmatprep.mubr.f32.mxu1 %v322_v60  ;;  %v270_v50 = vadd.f32 %v2285_v37, %v269_v2 }
 0x12b   :  { %1734 = vmatmul.mubr.f32.gmra.mrb[20].mxu1 %v323_v63  ;;  %v325_v7 = vmax.f32 %v195_v0, 0.0  ;;  %v341_v58 = vmax.f32 %v275_v56, 0.0 }
 0x12c   :  { %v324_v4 = vmax.f32 %v190_v3, 0.0  ;;  %v1661_v5 = vpop.f32.mrb[8].mxu0  ;;  %v2309_v6 = vpop.f32.mrb[8].mxu1  ;;  %v340_v52 = vmax.f32 %v270_v50, 0.0 }
 0x12d   :  { %v205_v8 = vadd.f32 %v1661_v5, %v2285_v37  ;;  %v199_v9 = vpop.f32.mrb[9].mxu0  ;;  %v279_v10 = vpop.f32.mrb[9].mxu1  ;;  %v285_v59 = vadd.f32 %v2309_v6, %v2285_v37 }
 0x12e   :  { %v200_v11 = vadd.f32 %v2285_v37, %v199_v9  ;;  %1736 = vmatprep.mubr.f32.mxu1 %v324_v4  ;;  %v280_v53 = vadd.f32 %v2285_v37, %v279_v10  ;;  %v2346_v10 = vld [vmem:[#allocation5 + $0x108] ss:$0 sm:$0xff] }
 0x12f   :  { %1737 = vmatmul.mubr.f32.gmra.mrb[22].mxu1 %v325_v7  ;;  %v327_v15 = vmax.f32 %v205_v8, 0.0  ;;  %v343_v61 = vmax.f32 %v285_v59, 0.0  ;;  %v642_v7 = vld [vmem:[#allocation5 + $0x180] sm:$0xff]  ;;  %v643_v8 = vld [vmem:[#allocation5 + $0x188] sm:$0xff] }
 0x130   :  { %v326_v12 = vmax.f32 %v200_v11, 0.0  ;;  %v1664_v13 = vpop.f32.mrb[10].mxu0  ;;  %v2313_v14 = vpop.f32.mrb[10].mxu1  ;;  %v342_v46 = vmax.f32 %v280_v53, 0.0  ;;  %v1947_v9 = vpack.c.bf16 %v643_v8, %v642_v7 }
 0x131   :  { %v215_v16 = vadd.f32 %v1664_v13, %v2285_v37  ;;  %v209_v17 = vpop.f32.mrb[11].mxu0  ;;  %v289_v18 = vpop.f32.mrb[11].mxu1  ;;  %v295_v63 = vadd.f32 %v2313_v14, %v2285_v37 }
 0x132   :  { %v210_v19 = vadd.f32 %v2285_v37, %v209_v17  ;;  %1739 = vmatprep.mubr.f32.mxu1 %v326_v12  ;;  %v290_v57 = vadd.f32 %v2285_v37, %v289_v18  ;;  %1948 = vmatprep.subr.bf16.mxu0 %v1947_v9 }
 0x133   :  { %1740 = vmatmul.mubr.f32.gmra.mrb[24].mxu1 %v327_v15  ;;  %v329_v23 = vmax.f32 %v215_v16, 0.0  ;;  %v345_v1 = vmax.f32 %v295_v63, 0.0  ;;  %1950 = vmatpush3.bf16.msra.mxu0 %v1947_v9 }
 0x134   :  { %v328_v20 = vmax.f32 %v210_v19, 0.0  ;;  %v1667_v21 = vpop.f32.mrb[12].mxu0  ;;  %v1691_v22 = vpop.f32.mrb[12].mxu1  ;;  %v344_v54 = vmax.f32 %v290_v57, 0.0 }
 0x135   :  { %v225_v24 = vadd.f32 %v1667_v21, %v2285_v37  ;;  %v219_v25 = vpop.f32.mrb[13].mxu0  ;;  %v299_v26 = vpop.f32.mrb[13].mxu1  ;;  %v305_v2 = vadd.f32 %v1691_v22, %v2285_v37 }
 0x136   :  { %v220_v27 = vadd.f32 %v2285_v37, %v219_v25  ;;  %1742 = vmatprep.mubr.f32.mxu1 %v328_v20  ;;  %v300_v60 = vadd.f32 %v2285_v37, %v299_v26 }
 0x137   :  { %1743 = vmatmul.mubr.f32.gmra.mrb[26].mxu1 %v329_v23  ;;  %v331_v32 = vmax.f32 %v225_v24, 0.0  ;;  %v347_v4 = vmax.f32 %v305_v2, 0.0 }
 0x138   :  { %v330_v28 = vmax.f32 %v220_v27, 0.0  ;;  %v1670_v29 = vpop.f32.mrb[14].mxu0  ;;  %v1694_v31 = vpop.f32.mrb[14].mxu1  ;;  %v346_v62 = vmax.f32 %v300_v60, 0.0 }
 0x139   :  { %v235_v33 = vadd.f32 %v1670_v29, %v2285_v37  ;;  %v229_v34 = vpop.f32.mrb[15].mxu0  ;;  %v309_v35 = vpop.f32.mrb[15].mxu1  ;;  %v315_v5 = vadd.f32 %v1694_v31, %v2285_v37 }
 0x13a   :  { %v230_v36 = vadd.f32 %v2285_v37, %v229_v34  ;;  %1745 = vmatprep.mubr.f32.mxu1 %v330_v28  ;;  %v310_v0 = vadd.f32 %v2285_v37, %v309_v35 }
 0x13b   :  { %1746 = vmatmul.mubr.f32.gmra.mrb[28].mxu1 %v331_v32  ;;  %v333_v43 = vmax.f32 %v235_v33, 0.0  ;;  %v349_v6 = vmax.f32 %v315_v5, 0.0 }
 0x13c   :  { %v332_v38 = vmax.f32 %v230_v36, 0.0  ;;  %v348_v3 = vmax.f32 %v310_v0, 0.0 }
 0x13e   :  { %1748 = vmatprep.mubr.f32.mxu1 %v332_v38 }
 0x13f   :  { %1749 = vmatmul.mubr.f32.gmra.mrb[30].mxu1 %v333_v43 }
 0x140   :  { %1751 = vmatprep.mubr.f32.mxu1 %v334_v40 }
 0x143   :  { %1752 = vmatmul.mubr.f32.gmra.mrb[32].mxu1 %v335_v47 }
 0x144   :  { %1754 = vmatprep.mubr.f32.mxu1 %v336_v42 }
 0x147   :  { %1755 = vmatmul.mubr.f32.gmra.mrb[34].mxu1 %v337_v51 }
 0x148   :  { %1757 = vmatprep.mubr.f32.mxu1 %v338_v49 }
 0x14b   :  { %1758 = vmatmul.mubr.f32.gmra.mrb[36].mxu1 %v339_v55 }
 0x14c   :  { %1760 = vmatprep.mubr.f32.mxu1 %v340_v52 }
 0x14f   :  { %1761 = vmatmul.mubr.f32.gmra.mrb[38].mxu1 %v341_v58 }
 0x150   :  { %1763 = vmatprep.mubr.f32.mxu1 %v342_v46 }
 0x153   :  { %1764 = vmatmul.mubr.f32.gmra.mrb[40].mxu1 %v343_v61 }
 0x154   :  { %1766 = vmatprep.mubr.f32.mxu1 %v344_v54 }
 0x157   :  { %1767 = vmatmul.mubr.f32.gmra.mrb[42].mxu1 %v345_v1 }
 0x158   :  { %1769 = vmatprep.mubr.f32.mxu1 %v346_v62 }
 0x15b   :  { %1770 = vmatmul.mubr.f32.gmra.mrb[44].mxu1 %v347_v4 }
 0x15c   :  { %1772 = vmatprep.mubr.f32.mxu1 %v348_v3 }
 0x15f   :  { %1773 = vmatmul.mubr.f32.gmra.mrb[46].mxu1 %v349_v6 }
 0x1f6   :  { %v1729_v11 = vpop.f32.mrb[16].mxu1 }
 0x1f7   :  { %v443_v12 = vadd.f32 %v1729_v11, %v2346_v10  ;;  %v437_v13 = vpop.f32.mrb[17].mxu1 }
 0x1f8   :  { %v438_v14 = vadd.f32 %v2346_v10, %v437_v13 }
 0x1f9   :  { %v597_v37 = vmax.f32 %v443_v12, 0.0 }
 0x1fa   :  { %v596_v15 = vmax.f32 %v438_v14, 0.0  ;;  %v1732_v16 = vpop.f32.mrb[18].mxu1 }
 0x1fb   :  { %v453_v17 = vadd.f32 %v1732_v16, %v2346_v10  ;;  %v447_v18 = vpop.f32.mrb[19].mxu1 }
 0x1fc   :  { %v448_v19 = vadd.f32 %v2346_v10, %v447_v18  ;;  %1807 = vmatprep.mubr.f32.mxu0 %v596_v15 }
 0x1fd   :  { %1808 = vmatmul.mubr.f32.vlgmr.msra.gmra.mrb[16].mxu0 %v597_v37  ;;  %v599_v22 = vmax.f32 %v453_v17, 0.0 }
 0x1fe   :  { %v598_v20 = vmax.f32 %v448_v19, 0.0  ;;  %v1735_v21 = vpop.f32.mrb[20].mxu1 }
 0x1ff   :  { %v463_v23 = vadd.f32 %v1735_v21, %v2346_v10  ;;  %v457_v24 = vpop.f32.mrb[21].mxu1 }
 0x200   :  { %v458_v25 = vadd.f32 %v2346_v10, %v457_v24  ;;  %1810 = vmatprep.mubr.f32.mxu0 %v598_v20 }
 0x201   :  { %1811 = vmatmul.mubr.f32.gmra.mrb[18].mxu0 %v599_v22  ;;  %v601_v28 = vmax.f32 %v463_v23, 0.0 }
 0x202   :  { %v600_v26 = vmax.f32 %v458_v25, 0.0  ;;  %v1738_v27 = vpop.f32.mrb[22].mxu1 }
 0x203   :  { %v473_v29 = vadd.f32 %v1738_v27, %v2346_v10  ;;  %v467_v30 = vpop.f32.mrb[23].mxu1 }
 0x204   :  { %v468_v31 = vadd.f32 %v2346_v10, %v467_v30  ;;  %1813 = vmatprep.mubr.f32.mxu0 %v600_v26 }
 0x205   :  { %1814 = vmatmul.mubr.f32.gmra.mrb[20].mxu0 %v601_v28  ;;  %v603_v34 = vmax.f32 %v473_v29, 0.0 }
 0x206   :  { %v602_v32 = vmax.f32 %v468_v31, 0.0  ;;  %v1741_v33 = vpop.f32.mrb[24].mxu1 }
 0x207   :  { %v483_v35 = vadd.f32 %v1741_v33, %v2346_v10  ;;  %v477_v36 = vpop.f32.mrb[25].mxu1 }
 0x208   :  { %v478_v38 = vadd.f32 %v2346_v10, %v477_v36  ;;  %1816 = vmatprep.mubr.f32.mxu0 %v602_v32 }
 0x209   :  { %1817 = vmatmul.mubr.f32.gmra.mrb[22].mxu0 %v603_v34  ;;  %v605_v43 = vmax.f32 %v483_v35, 0.0 }
 0x20a   :  { %v604_v40 = vmax.f32 %v478_v38, 0.0  ;;  %v1744_v41 = vpop.f32.mrb[26].mxu1 }
 0x20b   :  { %v493_v44 = vadd.f32 %v1744_v41, %v2346_v10  ;;  %v487_v42 = vpop.f32.mrb[27].mxu1 }
 0x20c   :  { %v488_v45 = vadd.f32 %v2346_v10, %v487_v42  ;;  %1819 = vmatprep.mubr.f32.mxu0 %v604_v40 }
 0x20d   :  { %1820 = vmatmul.mubr.f32.gmra.mrb[24].mxu0 %v605_v43  ;;  %v607_v49 = vmax.f32 %v493_v44, 0.0 }
 0x20e   :  { %v606_v47 = vmax.f32 %v488_v45, 0.0  ;;  %v1747_v48 = vpop.f32.mrb[28].mxu1  ;;  %v2380_v45 = vld [vmem:[#allocation5 + $0x190] ss:$0 sm:$0xff] }
 0x20f   :  { %v503_v50 = vadd.f32 %v1747_v48, %v2346_v10  ;;  %v497_v51 = vpop.f32.mrb[29].mxu1 }
 0x210   :  { %v498_v39 = vadd.f32 %v2346_v10, %v497_v51  ;;  %1822 = vmatprep.mubr.f32.mxu0 %v606_v47 }
 0x211   :  { %1823 = vmatmul.mubr.f32.gmra.mrb[26].mxu0 %v607_v49  ;;  %v609_v55 = vmax.f32 %v503_v50, 0.0 }
 0x212   :  { %v608_v52 = vmax.f32 %v498_v39, 0.0  ;;  %v1750_v53 = vpop.f32.mrb[30].mxu1 }
 0x213   :  { %v513_v56 = vadd.f32 %v1750_v53, %v2346_v10  ;;  %v507_v46 = vpop.f32.mrb[31].mxu1 }
 0x214   :  { %v508_v57 = vadd.f32 %v2346_v10, %v507_v46  ;;  %1825 = vmatprep.mubr.f32.mxu0 %v608_v52 }
 0x215   :  { %1826 = vmatmul.mubr.f32.gmra.mrb[28].mxu0 %v609_v55  ;;  %v611_v54 = vmax.f32 %v513_v56, 0.0 }
 0x216   :  { %v610_v58 = vmax.f32 %v508_v57, 0.0  ;;  %v1753_v59 = vpop.f32.mrb[32].mxu1 }
 0x217   :  { %v523_v60 = vadd.f32 %v1753_v59, %v2346_v10  ;;  %v517_v61 = vpop.f32.mrb[33].mxu1 }
 0x218   :  { %v518_v63 = vadd.f32 %v2346_v10, %v517_v61  ;;  %1828 = vmatprep.mubr.f32.mxu0 %v610_v58 }
 0x219   :  { %1829 = vmatmul.mubr.f32.gmra.mrb[30].mxu0 %v611_v54  ;;  %v613_v1 = vmax.f32 %v523_v60, 0.0 }
 0x21a   :  { %v612_v62 = vmax.f32 %v518_v63, 0.0  ;;  %v1756_v0 = vpop.f32.mrb[34].mxu1 }
 0x21b   :  { %v533_v2 = vadd.f32 %v1756_v0, %v2346_v10  ;;  %v527_v3 = vpop.f32.mrb[35].mxu1 }
 0x21c   :  { %v528_v4 = vadd.f32 %v2346_v10, %v527_v3  ;;  %1831 = vmatprep.mubr.f32.mxu0 %v612_v62 }
 0x21d   :  { %1832 = vmatmul.mubr.f32.gmra.mrb[32].mxu0 %v613_v1  ;;  %v615_v7 = vmax.f32 %v533_v2, 0.0 }
 0x21e   :  { %v614_v5 = vmax.f32 %v528_v4, 0.0  ;;  %v1759_v6 = vpop.f32.mrb[36].mxu1 }
 0x21f   :  { %v543_v8 = vadd.f32 %v1759_v6, %v2346_v10  ;;  %v537_v9 = vpop.f32.mrb[37].mxu1 }
 0x220   :  { %v538_v11 = vadd.f32 %v2346_v10, %v537_v9  ;;  %1834 = vmatprep.mubr.f32.mxu0 %v614_v5 }
 0x221   :  { %1835 = vmatmul.mubr.f32.gmra.mrb[34].mxu0 %v615_v7  ;;  %v617_v14 = vmax.f32 %v543_v8, 0.0 }
 0x222   :  { %v616_v12 = vmax.f32 %v538_v11, 0.0  ;;  %v1762_v13 = vpop.f32.mrb[38].mxu1 }
 0x223   :  { %v553_v15 = vadd.f32 %v1762_v13, %v2346_v10  ;;  %v547_v16 = vpop.f32.mrb[39].mxu1 }
 0x224   :  { %v548_v37 = vadd.f32 %v2346_v10, %v547_v16  ;;  %1837 = vmatprep.mubr.f32.mxu0 %v616_v12 }
 0x225   :  { %1838 = vmatmul.mubr.f32.gmra.mrb[36].mxu0 %v617_v14  ;;  %v619_v19 = vmax.f32 %v553_v15, 0.0 }
 0x226   :  { %v618_v17 = vmax.f32 %v548_v37, 0.0  ;;  %v1765_v18 = vpop.f32.mrb[40].mxu1 }
 0x227   :  { %v563_v20 = vadd.f32 %v1765_v18, %v2346_v10  ;;  %v557_v21 = vpop.f32.mrb[41].mxu1 }
 0x228   :  { %v558_v22 = vadd.f32 %v2346_v10, %v557_v21  ;;  %1840 = vmatprep.mubr.f32.mxu0 %v618_v17 }
 0x229   :  { %1841 = vmatmul.mubr.f32.gmra.mrb[38].mxu0 %v619_v19  ;;  %v621_v25 = vmax.f32 %v563_v20, 0.0 }
 0x22a   :  { %v620_v23 = vmax.f32 %v558_v22, 0.0  ;;  %v1768_v24 = vpop.f32.mrb[42].mxu1 }
 0x22b   :  { %v573_v26 = vadd.f32 %v1768_v24, %v2346_v10  ;;  %v567_v27 = vpop.f32.mrb[43].mxu1 }
 0x22c   :  { %v568_v28 = vadd.f32 %v2346_v10, %v567_v27  ;;  %1843 = vmatprep.mubr.f32.mxu0 %v620_v23 }
 0x22d   :  { %1844 = vmatmul.mubr.f32.gmra.mrb[40].mxu0 %v621_v25  ;;  %v623_v31 = vmax.f32 %v573_v26, 0.0 }
 0x22e   :  { %v622_v29 = vmax.f32 %v568_v28, 0.0  ;;  %v1771_v30 = vpop.f32.mrb[44].mxu1 }
 0x22f   :  { %v583_v32 = vadd.f32 %v1771_v30, %v2346_v10  ;;  %v577_v33 = vpop.f32.mrb[45].mxu1 }
 0x230   :  { %v578_v34 = vadd.f32 %v2346_v10, %v577_v33  ;;  %1846 = vmatprep.mubr.f32.mxu0 %v622_v29 }
 0x231   :  { %1847 = vmatmul.mubr.f32.gmra.mrb[42].mxu0 %v623_v31  ;;  %v625_v38 = vmax.f32 %v583_v32, 0.0 }
 0x232   :  { %v624_v35 = vmax.f32 %v578_v34, 0.0  ;;  %v1774_v36 = vpop.f32.mrb[46].mxu1 }
 0x233   :  { %v593_v40 = vadd.f32 %v1774_v36, %v2346_v10  ;;  %v587_v41 = vpop.f32.mrb[47].mxu1 }
 0x234   :  { %v588_v43 = vadd.f32 %v2346_v10, %v587_v41  ;;  %1849 = vmatprep.mubr.f32.mxu0 %v624_v35 }
 0x235   :  { %1850 = vmatmul.mubr.f32.gmra.mrb[44].mxu0 %v625_v38  ;;  %v627_v42 = vmax.f32 %v593_v40, 0.0 }
 0x236   :  { %v626_v44 = vmax.f32 %v588_v43, 0.0 }
 0x238   :  { %1852 = vmatprep.mubr.f32.mxu0 %v626_v44 }
 0x239   :  { %1853 = vmatmul.mubr.f32.gmra.mrb[46].mxu0 %v627_v42 }
 0x2d0   :  { %v1809_v47 = vpop.f32.mrb[16].mxu0 }
 0x2d1   :  { %v2383_v48 = vadd.f32 %v1809_v47, %v2380_v45  ;;  %v715_v49 = vpop.f32.mrb[17].mxu0 }
 0x2d2   :  { %v2386_v50 = vadd.f32 %v2380_v45, %v715_v49 }
 0x2d3   :  { %1974 = vtanh.f32 %v2383_v48  ;;  %v971_v10 = vand.u32 2147483647, %v2383_v48  ;;  %v939_v25 = vmax.f32 %v2383_v48, 0.0 }
 0x2d4   :  { %1976 = vtanh.f32 %v2386_v50  ;;  %v970_v51 = vand.u32 2147483647, %v2386_v50  ;;  %v1812_v39 = vpop.f32.mrb[18].mxu0  ;;  %v938_v29 = vmax.f32 %v2386_v50, 0.0 }
 0x2d5   :  { %v1003_v52 = vsub.f32 0.0, %v971_v10  ;;  %v2393_v53 = vadd.f32 %v1812_v39, %v2380_v45  ;;  %v725_v55 = vpop.f32.mrb[19].mxu0 }
 0x2d6   :  { %v1002_v56 = vsub.f32 0.0, %v970_v51  ;;  %v2396_v46 = vadd.f32 %v2380_v45, %v725_v55 }
 0x2d7   :  { %v1036_v57 = vmul.f32 1.442695, %v1003_v52  ;;  %1978 = vtanh.f32 %v2393_v53  ;;  %v973_v58 = vand.u32 2147483647, %v2393_v53  ;;  %v941_v30 = vmax.f32 %v2393_v53, 0.0 }
 0x2d8   :  { %v1034_v59 = vmul.f32 1.442695, %v1002_v56  ;;  %1980 = vtanh.f32 %v2396_v46  ;;  %v972_v54 = vand.u32 2147483647, %v2396_v46  ;;  %v1815_v60 = vpop.f32.mrb[20].mxu0  ;;  %v940_v31 = vmax.f32 %v2396_v46, 0.0 }
 0x2d9   :  { %1982 = vpow2.f32 %v1036_v57  ;;  %v1005_v61 = vsub.f32 0.0, %v973_v58  ;;  %v2403_v63 = vadd.f32 %v1815_v60, %v2380_v45  ;;  %v735_v62 = vpop.f32.mrb[21].mxu0 }
 0x2da   :  { %1984 = vpow2.f32 %v1034_v59  ;;  %v1004_v0 = vsub.f32 0.0, %v972_v54  ;;  %v2406_v1 = vadd.f32 %v2380_v45, %v735_v62 }
 0x2db   :  { %v1040_v2 = vmul.f32 1.442695, %v1005_v61  ;;  %1986 = vtanh.f32 %v2403_v63  ;;  %v975_v3 = vand.u32 2147483647, %v2403_v63  ;;  %v943_v41 = vmax.f32 %v2403_v63, 0.0 }
 0x2dc   :  { %v1038_v4 = vmul.f32 1.442695, %v1004_v0  ;;  %1988 = vtanh.f32 %v2406_v1  ;;  %v974_v5 = vand.u32 2147483647, %v2406_v1  ;;  %v1818_v6 = vpop.f32.mrb[22].mxu0  ;;  %v942_v55 = vmax.f32 %v2406_v1, 0.0 }
 0x2dd   :  { %v1975_v7 = vpop.eup %1974  ;;  %1990 = vpow2.f32 %v1040_v2  ;;  %v1007_v8 = vsub.f32 0.0, %v975_v3  ;;  %v2413_v9 = vadd.f32 %v1818_v6, %v2380_v45  ;;  %v745_v11 = vpop.f32.mrb[23].mxu0 }
 0x2de   :  { %v1977_v12 = vpop.eup %1976  ;;  %907 = vst [vmem:[#allocation7 + $0x10] sm:$0xff] %v1975_v7  ;;  %1992 = vpow2.f32 %v1038_v4  ;;  %v1006_v13 = vsub.f32 0.0, %v974_v5  ;;  %v2416_v14 = vadd.f32 %v2380_v45, %v745_v11 }
 0x2df   :  { %906 = vst [vmem:[#allocation7] sm:$0xff] %v1977_v12  ;;  %v1044_v15 = vmul.f32 1.442695, %v1007_v8  ;;  %1994 = vtanh.f32 %v2413_v9  ;;  %v977_v16 = vand.u32 2147483647, %v2413_v9  ;;  %v945_v56 = vmax.f32 %v2413_v9, 0.0 }
 0x2e0   :  { %v1042_v37 = vmul.f32 1.442695, %v1006_v13  ;;  %1996 = vtanh.f32 %v2416_v14  ;;  %v1821_v17 = vpop.f32.mrb[24].mxu0  ;;  %v976_v23 = vand.u32 2147483647, %v2416_v14 }
 0x2e1   :  { %v1979_v18 = vpop.eup %1978  ;;  %1998 = vpow2.f32 %v1044_v15  ;;  %v1009_v19 = vsub.f32 0.0, %v977_v16  ;;  %v2422_v20 = vadd.f32 %v1821_v17, %v2380_v45  ;;  %v755_v21 = vpop.f32.mrb[25].mxu0 }
 0x2e2   :  { %v1981_v22 = vpop.eup %1980  ;;  %909 = vst [vmem:[#allocation7 + $0x30] sm:$0xff] %v1979_v18  ;;  %2000 = vpow2.f32 %v1042_v37  ;;  %v1008_v43 = vsub.f32 0.0, %v976_v23  ;;  %v2435_v10 = vadd.f32 %v2380_v45, %v755_v21 }
 0x2e3   :  { %v1983_v24 = vpop.eup %1982  ;;  %908 = vst [vmem:[#allocation7 + $0x20] sm:$0xff] %v1981_v22  ;;  %v1048_v26 = vmul.f32 1.442695, %v1009_v19  ;;  %2002 = vtanh.f32 %v2422_v20  ;;  %v979_v49 = vand.u32 2147483647, %v2422_v20 }
 0x2e4   :  { %v1985_v27 = vpop.eup %1984  ;;  %v1107_v28 = vadd.f32 1.0, %v1983_v24  ;;  %v1110_v33 = vmul.f32 -0.5, %v1983_v24  ;;  %v1824_v36 = vpop.f32.mrb[26].mxu0  ;;  %v1113_v40 = vand.u32 2147483647, %v1983_v24 }
 0x2e5   :  { %v1987_v32 = vpop.eup %1986  ;;  %v1098_v34 = vadd.f32 1.0, %v1985_v27  ;;  %v1101_v35 = vmul.f32 -0.5, %v1985_v27  ;;  %2004 = vpow2.f32 %v1048_v26  ;;  %v2431_v44 = vpop.f32.mrb[27].mxu0  ;;  %v1104_v47 = vand.u32 2147483647, %v1985_v27 }
 0x2e6   :  { %v1989_v38 = vpop.eup %1988  ;;  %2006 = vlog2.f32 %v1107_v28  ;;  %911 = vst [vmem:[#allocation7 + $0x50] sm:$0xff] %v1987_v32  ;;  %v1111_v59 = vadd.f32 1.0, %v1110_v33  ;;  %vm2443_vm0 = vcmp.lt.f32.partialorder %v1113_v40, 0.0004427343  ;;  %v1046_v4 = vmul.f32 1.442695, %v1008_v43 }
 0x2e7   :  { %v1991_v42 = vpop.eup %1990  ;;  %2008 = vlog2.f32 %v1098_v34  ;;  %910 = vst [vmem:[#allocation7 + $0x40] sm:$0xff] %v1989_v38  ;;  %v1102_v54 = vadd.f32 1.0, %v1101_v35  ;;  %vm2447_vm1 = vcmp.lt.f32.partialorder %v1104_v47, 0.0004427343  ;;  %v1011_v7 = vsub.f32 0.0, %v979_v49 }
 0x2e8   :  { %v1993_v51 = vpop.eup %1992  ;;  %v1125_v39 = vadd.f32 1.0, %v1991_v42  ;;  %v1128_v52 = vmul.f32 -0.5, %v1991_v42  ;;  %v2439_v57 = vpop.f32.mrb[28].mxu0  ;;  %v1131_v3 = vand.u32 2147483647, %v1991_v42  ;;  %v1112_v18 = vmul.f32 %v1983_v24, %v1111_v59 }
 0x2e9   :  { %v1995_v58 = vpop.eup %1994  ;;  %v1116_v60 = vadd.f32 1.0, %v1993_v51  ;;  %v1119_v61 = vmul.f32 -0.5, %v1993_v51  ;;  %v2441_v62 = vpop.f32.mrb[29].mxu0  ;;  %v978_v8 = vand.u32 2147483647, %v2435_v10  ;;  %v1103_v19 = vmul.f32 %v1985_v27, %v1102_v54 }
 0x2ea   :  { %v1997_v0 = vpop.eup %1996  ;;  %2010 = vlog2.f32 %v1125_v39  ;;  %913 = vst [vmem:[#allocation7 + $0x70] sm:$0xff] %v1995_v58  ;;  %v1129_v12 = vadd.f32 1.0, %v1128_v52  ;;  %v1122_v13 = vand.u32 2147483647, %v1993_v51  ;;  %vm2459_vm2 = vcmp.lt.f32.partialorder %v1131_v3, 0.0004427343 }
 0x2eb   :  { %v1999_v5 = vpop.eup %1998  ;;  %2012 = vlog2.f32 %v1116_v60  ;;  %912 = vst [vmem:[#allocation7 + $0x60] sm:$0xff] %v1997_v0  ;;  %v1120_v21 = vadd.f32 1.0, %v1119_v61  ;;  %v1010_v33 = vsub.f32 0.0, %v978_v8  ;;  %v1052_v24 = vmul.f32 1.442695, %v1011_v7 }
 0x2ec   :  { %v2452_v11 = vpop.eup %2000  ;;  %v1143_v15 = vadd.f32 1.0, %v1999_v5  ;;  %v1146_v16 = vmul.f32 -0.5, %v1999_v5  ;;  %v2454_v37 = vpop.f32.mrb[30].mxu0  ;;  %v1149_v28 = vand.u32 2147483647, %v1999_v5  ;;  %v2467_v27 = vadd.f32 %v1824_v36, %v2380_v45 }
 0x2ed   :  { %v2003_v17 = vpop.eup %2002  ;;  %v1134_v22 = vadd.f32 1.0, %v2452_v11  ;;  %v2457_v23 = vpop.f32.mrb[31].mxu0  ;;  %v1137_v32 = vmul.f32 -0.5, %v2452_v11  ;;  %v1130_v40 = vmul.f32 %v1991_v42, %v1129_v12  ;;  %vm2469_vm3 = vcmp.lt.f32.partialorder %v1122_v13, 0.0004427343 }
 0x2ee   :  { %2014 = vlog2.f32 %v1143_v15  ;;  %915 = vst [vmem:[#allocation7 + $0x90] sm:$0xff] %v2003_v17  ;;  %v1147_v35 = vadd.f32 1.0, %v1146_v16  ;;  %v1140_v47 = vand.u32 2147483647, %v2452_v11  ;;  %v1121_v59 = vmul.f32 %v1993_v51, %v1120_v21 }
 0x2ef   :  { %v2464_v34 = vpop.eup %2004  ;;  %2016 = vlog2.f32 %v1134_v22  ;;  %v1050_v54 = vmul.f32 1.442695, %v1010_v33  ;;  %vm2479_vm4 = vcmp.lt.f32.partialorder %v1149_v28, 0.0004427343  ;;  %v1138_v61 = vadd.f32 1.0, %v1137_v32 }
 0x2f0   :  { %v2007_v38 = vpop.eup %2006  ;;  %v1161_v49 = vadd.f32 1.0, %v2464_v34  ;;  %v2475_v39 = vpop.f32.mrb[32].mxu0  ;;  %2018 = vpow2.f32 %v1046_v4  ;;  %v1148_v3 = vmul.f32 %v1999_v5, %v1147_v35  ;;  %v981_v7 = vand.u32 2147483647, %v2467_v27 }
 0x2f1   :  { %v2009_v52 = vpop.eup %2008  ;;  %v1109_v58 = vmul.f32 0.6931472, %v2007_v38  ;;  %v2477_v60 = vpop.f32.mrb[33].mxu0  ;;  %v1164_v12 = vmul.f32 -0.5, %v2464_v34  ;;  %v2505_v6 = vadd.f32 %v2439_v57, %v2380_v45  ;;  %vm1141_vm5 = vcmp.lt.f32.partialorder %v1140_v47, 0.0004427343 }
 0x2f2   :  { %v1100_v36 = vmul.f32 0.6931472, %v2009_v52  ;;  %2020 = vlog2.f32 %v1161_v49  ;;  %v1013_v16 = vsub.f32 0.0, %v981_v7 }
 0x2f3   :  { %v1115_v0 = vsel %vm2443_vm0, %v1112_v18, %v1109_v58  ;;  %2022 = vpow2.f32 %v1052_v24  ;;  %v1165_v57 = vadd.f32 1.0, %v1164_v12  ;;  %v947_v12 = vmax.f32 %v2422_v20, 0.0 }
 0x2f4   :  { %v2011_v8 = vpop.eup %2010  ;;  %v1387_v51 = vadd.f32 %v1115_v0, %v939_v25  ;;  %v1106_v4 = vsel %vm2447_vm1, %v1103_v19, %v1100_v36  ;;  %2024 = vtanh.f32 %v2435_v10  ;;  %v2492_v13 = vpop.f32.mrb[34].mxu0  ;;  %v2501_v25 = vadd.f32 %v2380_v45, %v2431_v44 }
 0x2f5   :  { %v2013_v15 = vpop.eup %2012  ;;  %v1386_v2 = vadd.f32 %v1106_v4, %v938_v29  ;;  %v1127_v5 = vmul.f32 0.6931472, %v2011_v8  ;;  %2026 = vpow2.f32 %v1050_v54  ;;  %v2496_v17 = vpop.f32.mrb[35].mxu0  ;;  %v1167_v29 = vand.u32 2147483647, %v2464_v34 }
 0x2f6   :  { %1419 = vst [vmem:[#allocation7 + $0x18] sm:$0xff] %v1387_v51  ;;  %v1118_v48 = vmul.f32 0.6931472, %v2013_v15  ;;  %2028 = vtanh.f32 %v2467_v27  ;;  %v1056_v18 = vmul.f32 1.442695, %v1013_v16  ;;  %v2512_v19 = vadd.f32 %v2380_v45, %v2441_v62 }
 0x2f7   :  { %1418 = vst [vmem:[#allocation7 + $0x8] sm:$0xff] %v1386_v2  ;;  %v1133_v50 = vsel %vm2459_vm2, %v1130_v40, %v1127_v5  ;;  %2030 = vtanh.f32 %v2501_v25  ;;  %v980_v62 = vand.u32 2147483647, %v2501_v25  ;;  %vm2530_vm6 = vcmp.lt.f32.partialorder %v1167_v29, 0.0004427343 }
 0x2f8   :  { %v2015_v21 = vpop.eup %2014  ;;  %v1389_v44 = vadd.f32 %v1133_v50, %v941_v30  ;;  %v1124_v22 = vsel %vm2469_vm3, %v1121_v59, %v1118_v48  ;;  %v2519_v28 = vpop.f32.mrb[36].mxu0  ;;  %2032 = vpow2.f32 %v1056_v18  ;;  %v1139_v30 = vmul.f32 %v2452_v11, %v1138_v61 }
 0x2f9   :  { %v2017_v26 = vpop.eup %2016  ;;  %v1388_v32 = vadd.f32 %v1124_v22, %v940_v31  ;;  %v1145_v33 = vmul.f32 0.6931472, %v2015_v21  ;;  %v2524_v35 = vpop.f32.mrb[37].mxu0  ;;  %2034 = vtanh.f32 %v2505_v6  ;;  %v1012_v31 = vsub.f32 0.0, %v980_v62 }
 0x2fa   :  { %1421 = vst [vmem:[#allocation7 + $0x38] sm:$0xff] %v1389_v44  ;;  %v1136_v53 = vmul.f32 0.6931472, %v2017_v26  ;;  %v2019_v24 = vpop.eup %2018  ;;  %2036 = vtanh.f32 %v2512_v19  ;;  %v1166_v47 = vmul.f32 %v2464_v34, %v1165_v57  ;;  %v2548_v34 = vadd.f32 %v2454_v37, %v2380_v45 }
 0x2fb   :  { %1420 = vst [vmem:[#allocation7 + $0x28] sm:$0xff] %v1388_v32  ;;  %v1151_v38 = vsel %vm2479_vm4, %v1148_v3, %v1145_v33  ;;  %v1152_v49 = vadd.f32 1.0, %v2019_v24  ;;  %v1155_v36 = vmul.f32 -0.5, %v2019_v24  ;;  %v1054_v42 = vmul.f32 1.442695, %v1012_v31 }
 0x2fc   :  { %v2021_v40 = vpop.eup %2020  ;;  %v1391_v43 = vadd.f32 %v1151_v38, %v943_v41  ;;  %v1142_v11 = vsel %vm1141_vm5, %v1139_v30, %v1136_v53  ;;  %v2538_v52 = vpop.f32.mrb[38].mxu0  ;;  %v983_v41 = vand.u32 2147483647, %v2505_v6  ;;  %v1158_v8 = vand.u32 2147483647, %v2019_v24 }
 0x2fd   :  { %v2540_v58 = vpop.eup %2022  ;;  %v1390_v59 = vadd.f32 %v1142_v11, %v942_v55  ;;  %v1163_v54 = vmul.f32 0.6931472, %v2021_v40  ;;  %2038 = vlog2.f32 %v1152_v49  ;;  %v2550_v0 = vpop.f32.mrb[39].mxu0  ;;  %v944_v37 = vmax.f32 %v2416_v14, 0.0 }
 0x2fe   :  { %v2025_v61 = vpop.eup %2024  ;;  %1423 = vst [vmem:[#allocation7 + $0x58] sm:$0xff] %v1391_v43  ;;  %v1179_v63 = vadd.f32 1.0, %v2540_v58  ;;  %2040 = vpow2.f32 %v1054_v42  ;;  %v1156_v4 = vadd.f32 1.0, %v1155_v36  ;;  %v1182_v5 = vmul.f32 -0.5, %v2540_v58 }
 0x2ff   :  { %v2552_v3 = vpop.eup %2026  ;;  %1422 = vst [vmem:[#allocation7 + $0x48] sm:$0xff] %v1390_v59  ;;  %v1169_v1 = vsel %vm2530_vm6, %v1166_v47, %v1163_v54  ;;  %914 = vst [vmem:[#allocation7 + $0x80] sm:$0xff] %v2025_v61  ;;  %v1015_v16 = vsub.f32 0.0, %v983_v41  ;;  %v982_v9 = vand.u32 2147483647, %v2512_v19  ;;  %v946_v50 = vmax.f32 %v2435_v10, 0.0 }
 0x300   :  { %v2029_v55 = vpop.eup %2028  ;;  %v1393_v7 = vadd.f32 %v1169_v1, %v945_v56  ;;  %2042 = vlog2.f32 %v1179_v63  ;;  %v2558_v51 = vpop.f32.mrb[40].mxu0  ;;  %v1170_v15 = vadd.f32 1.0, %v2552_v3  ;;  %v1185_v14 = vand.u32 2147483647, %v2540_v58 }
 0x301   :  { %917 = vst [vmem:[#allocation7 + $0xb0] sm:$0xff] %v2029_v55  ;;  %v2031_v2 = vpop.eup %2030  ;;  %2044 = vtanh.f32 %v2548_v34  ;;  %v2566_v56 = vpop.f32.mrb[41].mxu0  ;;  %v949_v29 = vmax.f32 %v2467_v27, 0.0  ;;  %vm2573_vm7 = vcmp.lt.f32.partialorder %v1158_v8, 0.0004427343  ;;  %v948_v22 = vmax.f32 %v2501_v25, 0.0 }
 0x302   :  { %1425 = vst [vmem:[#allocation7 + $0x78] sm:$0xff] %v1393_v7  ;;  %v2568_v48 = vpop.eup %2032  ;;  %2046 = vlog2.f32 %v1170_v15  ;;  %916 = vst [vmem:[#allocation7 + $0xa0] sm:$0xff] %v2031_v2  ;;  %v1060_v57 = vmul.f32 1.442695, %v1015_v16  ;;  %v1157_v32 = vmul.f32 %v2019_v24, %v1156_v4  ;;  %v1014_v33 = vsub.f32 0.0, %v982_v9 }
 0x303   :  { %v2035_v18 = vpop.eup %2034  ;;  %v1197_v44 = vadd.f32 1.0, %v2568_v48  ;;  %v985_v62 = vand.u32 2147483647, %v2548_v34  ;;  %v2582_v53 = vadd.f32 %v2380_v45, %v2457_v23  ;;  %v1183_v38 = vadd.f32 1.0, %v1182_v5 }
 0x304   :  { %v2037_v26 = vpop.eup %2036  ;;  %919 = vst [vmem:[#allocation7 + $0xd0] sm:$0xff] %v2035_v18  ;;  %v2584_v30 = vpop.f32.mrb[42].mxu0  ;;  %v1173_v46 = vmul.f32 -0.5, %v2552_v3  ;;  %v2589_v31 = vadd.f32 %v2475_v39, %v2380_v45  ;;  %vm2593_vm8 = vcmp.lt.f32.partialorder %v1185_v14, 0.0004427343  ;;  %v1200_v49 = vmul.f32 -0.5, %v2568_v48 }
 0x305   :  { %2048 = vlog2.f32 %v1197_v44  ;;  %918 = vst [vmem:[#allocation7 + $0xc0] sm:$0xff] %v2037_v26  ;;  %v2591_v24 = vpop.f32.mrb[43].mxu0  ;;  %v1058_v23 = vmul.f32 1.442695, %v1014_v33  ;;  %v1017_v43 = vsub.f32 0.0, %v985_v62  ;;  %v1184_v41 = vmul.f32 %v2540_v58, %v1183_v38 }
 0x306   :  { %2050 = vpow2.f32 %v1060_v57  ;;  %v1176_v47 = vand.u32 2147483647, %v2552_v3  ;;  %v984_v59 = vand.u32 2147483647, %v2582_v53  ;;  %v987_v61 = vand.u32 2147483647, %v2589_v31 }
 0x307   :  { %v2039_v11 = vpop.eup %2038  ;;  %2052 = vtanh.f32 %v2582_v53  ;;  %v1064_v42 = vmul.f32 1.442695, %v1017_v43  ;;  %v1174_v1 = vadd.f32 1.0, %v1173_v46  ;;  %v1201_v9 = vadd.f32 1.0, %v1200_v49 }
 0x308   :  { %v2601_v39 = vpop.f32.mrb[44].mxu0  ;;  %v2603_v54 = vpop.eup %2040  ;;  %v1154_v36 = vmul.f32 0.6931472, %v2039_v11  ;;  %2054 = vpow2.f32 %v1058_v23  ;;  %v1016_v7 = vsub.f32 0.0, %v984_v59  ;;  %v1019_v2 = vsub.f32 0.0, %v987_v61 }
 0x309   :  { %v1188_v55 = vadd.f32 1.0, %v2603_v54  ;;  %v2608_v8 = vpop.f32.mrb[45].mxu0  ;;  %2056 = vpow2.f32 %v1064_v42  ;;  %v1203_v14 = vand.u32 2147483647, %v2568_v48  ;;  %v1175_v33 = vmul.f32 %v2552_v3, %v1174_v1 }
 0x30a   :  { %v2043_v63 = vpop.eup %2042  ;;  %v1160_v4 = vsel %vm2573_vm7, %v1157_v32, %v1154_v36  ;;  %v1062_v57 = vmul.f32 1.442695, %v1016_v7  ;;  %v1068_v21 = vmul.f32 1.442695, %v1019_v2  ;;  %v2625_v62 = vadd.f32 %v2380_v45, %v2477_v60 }
 0x30b   :  { %v1181_v15 = vmul.f32 0.6931472, %v2043_v63  ;;  %v2045_v5 = vpop.eup %2044  ;;  %v1392_v16 = vadd.f32 %v1160_v4, %v944_v37  ;;  %2058 = vlog2.f32 %v1188_v55  ;;  %vm1177_vm9 = vcmp.lt.f32.partialorder %v1176_v47, 0.0004427343 }
 0x30c   :  { %v2613_v18 = vpop.f32.mrb[46].mxu0  ;;  %v2047_v58 = vpop.eup %2046  ;;  %921 = vst [vmem:[#allocation7 + $0xf0] sm:$0xff] %v2045_v5  ;;  %2060 = vtanh.f32 %v2589_v31  ;;  %v1191_v38 = vmul.f32 -0.5, %v2603_v54  ;;  %v2630_v46 = vadd.f32 %v2492_v13, %v2380_v45  ;;  %v951_v20 = vmax.f32 %v2505_v6, 0.0 }
 0x30d   :  { %v1187_v44 = vsel %vm2593_vm8, %v1184_v41, %v1181_v15  ;;  %v2618_v26 = vpop.f32.mrb[47].mxu0  ;;  %1424 = vst [vmem:[#allocation7 + $0x68] sm:$0xff] %v1392_v16  ;;  %v1172_v32 = vmul.f32 0.6931472, %v2047_v58  ;;  %2062 = vpow2.f32 %v1062_v57  ;;  %v986_v3 = vand.u32 2147483647, %v2625_v62 }
 0x30e   :  { %v1395_v37 = vadd.f32 %v1187_v44, %v947_v12  ;;  %2064 = vpow2.f32 %v1068_v21  ;;  %v1202_v11 = vmul.f32 %v2568_v48, %v1201_v9  ;;  %vm1204_vm10 = vcmp.lt.f32.partialorder %v1203_v14, 0.0004427343 }
 0x30f   :  { %v2049_v40 = vpop.eup %2048  ;;  %v1178_v23 = vsel %vm1177_vm9, %v1175_v33, %v1172_v32  ;;  %2066 = vtanh.f32 %v2625_v62  ;;  %v1194_v13 = vand.u32 2147483647, %v2603_v54  ;;  %v1018_v59 = vsub.f32 0.0, %v986_v3 }
 0x310   :  { %1427 = vst [vmem:[#allocation7 + $0x98] sm:$0xff] %v1395_v37  ;;  %v2051_v12 = vpop.eup %2050  ;;  %v1394_v60 = vadd.f32 %v1178_v23, %v946_v50  ;;  %v1199_v43 = vmul.f32 0.6931472, %v2049_v40  ;;  %v1192_v61 = vadd.f32 1.0, %v1191_v38  ;;  %v950_v63 = vmax.f32 %v2512_v19, 0.0 }
 0x311   :  { %v2053_v47 = vpop.eup %2052  ;;  %v1215_v49 = vadd.f32 1.0, %v2051_v12  ;;  %2068 = vtanh.f32 %v2630_v46  ;;  %v1218_v48 = vmul.f32 -0.5, %v2051_v12  ;;  %v989_v50 = vand.u32 2147483647, %v2630_v46 }
 0x312   :  { %v2055_v36 = vpop.eup %2054  ;;  %1426 = vst [vmem:[#allocation7 + $0x88] sm:$0xff] %v1394_v60  ;;  %v1205_v42 = vsel %vm1204_vm10, %v1202_v11, %v1199_v43  ;;  %920 = vst [vmem:[#allocation7 + $0xe0] sm:$0xff] %v2053_v47  ;;  %v953_v55 = vmax.f32 %v2548_v34, 0.0  ;;  %v1066_v7 = vmul.f32 1.442695, %v1018_v59  ;;  %v2647_v4 = vadd.f32 %v2380_v45, %v2496_v17 }
 0x313   :  { %v1397_v10 = vadd.f32 %v1205_v42, %v949_v29  ;;  %2070 = vlog2.f32 %v1215_v49  ;;  %v2057_v41 = vpop.eup %2056  ;;  %v1206_v1 = vadd.f32 1.0, %v2055_v36  ;;  %vm2649_vm11 = vcmp.lt.f32.partialorder %v1194_v13, 0.0004427343 }
 0x314   :  { %v1209_v27 = vmul.f32 -0.5, %v2055_v36  ;;  %v1233_v29 = vadd.f32 1.0, %v2057_v41  ;;  %v1236_v5 = vmul.f32 -0.5, %v2057_v41  ;;  %v1193_v14 = vmul.f32 %v2603_v54, %v1192_v61 }
 0x315   :  { %v2059_v15 = vpop.eup %2058  ;;  %1429 = vst [vmem:[#allocation7 + $0xb8] sm:$0xff] %v1397_v10  ;;  %v1221_v58 = vand.u32 2147483647, %v2051_v12  ;;  %2072 = vlog2.f32 %v1206_v1  ;;  %v1219_v44 = vadd.f32 1.0, %v1218_v48  ;;  %v1212_v57 = vand.u32 2147483647, %v2055_v36 }
 0x316   :  { %v2061_v16 = vpop.eup %2060  ;;  %v1190_v9 = vmul.f32 0.6931472, %v2059_v15  ;;  %2074 = vlog2.f32 %v1233_v29  ;;  %v1021_v17 = vsub.f32 0.0, %v989_v50  ;;  %v1239_v32 = vand.u32 2147483647, %v2057_v41 }
 0x317   :  { %923 = vst [vmem:[#allocation7 + $0x110] sm:$0xff] %v2061_v16  ;;  %v2654_v21 = vpop.eup %2062  ;;  %2076 = vpow2.f32 %v1066_v7  ;;  %v988_v33 = vand.u32 2147483647, %v2647_v4  ;;  %v1210_v40 = vadd.f32 1.0, %v1209_v27  ;;  %v1237_v23 = vadd.f32 1.0, %v1236_v5 }
 0x318   :  { %v1196_v37 = vsel %vm2649_vm11, %v1193_v14, %v1190_v9  ;;  %v2659_v38 = vpop.eup %2064  ;;  %v1224_v3 = vadd.f32 1.0, %v2654_v21  ;;  %vm2664_vm12 = vcmp.lt.f32.partialorder %v1221_v58, 0.0004427343  ;;  %v952_v11 = vmax.f32 %v2582_v53, 0.0 }
 0x319   :  { %v1396_v54 = vadd.f32 %v1196_v37, %v948_v22  ;;  %v2067_v60 = vpop.eup %2066  ;;  %v1251_v47 = vadd.f32 1.0, %v2659_v38  ;;  %v2672_v13 = vadd.f32 %v2519_v28, %v2380_v45  ;;  %v1220_v25 = vmul.f32 %v2051_v12, %v1219_v44 }
 0x31a   :  { %2078 = vlog2.f32 %v1224_v3  ;;  %922 = vst [vmem:[#allocation7 + $0x100] sm:$0xff] %v2067_v60  ;;  %v1072_v22 = vmul.f32 1.442695, %v1021_v17  ;;  %v1020_v49 = vsub.f32 0.0, %v988_v33  ;;  %vm2674_vm13 = vcmp.lt.f32.partialorder %v1212_v57, 0.0004427343 }
 0x31b   :  { %1428 = vst [vmem:[#allocation7 + $0xa8] sm:$0xff] %v1396_v54  ;;  %v2069_v59 = vpop.eup %2068  ;;  %vm2678_vm14 = vcmp.lt.f32.partialorder %v1239_v32, 0.0004427343  ;;  %v1227_v10 = vmul.f32 -0.5, %v2654_v21  ;;  %2080 = vlog2.f32 %v1251_v47  ;;  %v1211_v48 = vmul.f32 %v2055_v36, %v1210_v40 }
 0x31c   :  { %v1238_v50 = vmul.f32 %v2057_v41, %v1237_v23  ;;  %925 = vst [vmem:[#allocation7 + $0x130] sm:$0xff] %v2069_v59  ;;  %2082 = vpow2.f32 %v1072_v22  ;;  %v1070_v12 = vmul.f32 1.442695, %v1020_v49  ;;  %v1230_v7 = vand.u32 2147483647, %v2654_v21 }
 0x31d   :  { %v2071_v28 = vpop.eup %2070  ;;  %2084 = vtanh.f32 %v2647_v4  ;;  %v991_v15 = vand.u32 2147483647, %v2672_v13  ;;  %v1254_v2 = vmul.f32 -0.5, %v2659_v38  ;;  %v2689_v27 = vadd.f32 %v2380_v45, %v2524_v35 }
 0x31e   :  { %v1217_v1 = vmul.f32 0.6931472, %v2071_v28  ;;  %2086 = vpow2.f32 %v1070_v12  ;;  %v2693_v36 = vadd.f32 %v2538_v52, %v2380_v45  ;;  %v1228_v5 = vadd.f32 1.0, %v1227_v10 }
 0x31f   :  { %v2073_v41 = vpop.eup %2072  ;;  %2088 = vtanh.f32 %v2672_v13  ;;  %v1023_v16 = vsub.f32 0.0, %v991_v15  ;;  %v2703_v35 = vadd.f32 %v2380_v45, %v2550_v0  ;;  %v990_v17 = vand.u32 2147483647, %v2689_v27 }
 0x320   :  { %v1223_v29 = vsel %vm2664_vm12, %v1220_v25, %v1217_v1  ;;  %v2075_v9 = vpop.eup %2074  ;;  %v1208_v58 = vmul.f32 0.6931472, %v2073_v41  ;;  %2090 = vtanh.f32 %v2689_v27  ;;  %v1257_v37 = vand.u32 2147483647, %v2659_v38 }
 0x321   :  { %v1399_v14 = vadd.f32 %v1223_v29, %v951_v20  ;;  %v2705_v52 = vpop.eup %2076  ;;  %v1235_v44 = vmul.f32 0.6931472, %v2075_v9  ;;  %v1076_v57 = vmul.f32 1.442695, %v1023_v16  ;;  %2092 = vtanh.f32 %v2693_v36 }
 0x322   :  { %v1214_v6 = vsel %vm2674_vm13, %v1211_v48, %v1208_v58  ;;  %v1255_v20 = vadd.f32 1.0, %v1254_v2  ;;  %v1242_v32 = vadd.f32 1.0, %v2705_v52  ;;  %v1022_v54 = vsub.f32 0.0, %v990_v17 }
 0x323   :  { %1431 = vst [vmem:[#allocation7 + $0xd8] sm:$0xff] %v1399_v14  ;;  %v1398_v0 = vadd.f32 %v1214_v6, %v950_v63  ;;  %v1241_v33 = vsel %vm2678_vm14, %v1238_v50, %v1235_v44  ;;  %2094 = vpow2.f32 %v1076_v57  ;;  %v1229_v3 = vmul.f32 %v2654_v21, %v1228_v5 }
 0x324   :  { %v2079_v40 = vpop.eup %2078  ;;  %v1401_v23 = vadd.f32 %v1241_v33, %v953_v55  ;;  %v955_v60 = vmax.f32 %v2589_v31, 0.0  ;;  %2096 = vlog2.f32 %v1242_v32  ;;  %v1245_v19 = vmul.f32 -0.5, %v2705_v52 }
 0x325   :  { %v2081_v43 = vpop.eup %2080  ;;  %1430 = vst [vmem:[#allocation7 + $0xc8] sm:$0xff] %v1398_v0  ;;  %v1226_v47 = vmul.f32 0.6931472, %v2079_v40  ;;  %v1074_v63 = vmul.f32 1.442695, %v1022_v54  ;;  %2098 = vtanh.f32 %v2703_v35  ;;  %v1256_v34 = vmul.f32 %v2659_v38, %v1255_v20 }
 0x326   :  { %v2723_v25 = vpop.eup %2082  ;;  %1433 = vst [vmem:[#allocation7 + $0xf8] sm:$0xff] %v1401_v23  ;;  %vm1231_vm15 = vcmp.lt.f32.partialorder %v1230_v7, 0.0004427343  ;;  %v1253_v22 = vmul.f32 0.6931472, %v2081_v43  ;;  %v2730_v59 = vadd.f32 %v2558_v51, %v2380_v45  ;;  %v1246_v50 = vadd.f32 1.0, %v1245_v19 }
 0x327   :  { %v993_v55 = vand.u32 2147483647, %v2693_v36  ;;  %v2085_v21 = vpop.eup %2084  ;;  %v1232_v31 = vsel %vm1231_vm15, %v1229_v3, %v1226_v47  ;;  %vm1258_vm0 = vcmp.lt.f32.partialorder %v1257_v37, 0.0004427343  ;;  %v1269_v49 = vadd.f32 1.0, %v2723_v25 }
 0x328   :  { %v2732_v42 = vpop.eup %2086  ;;  %v1400_v61 = vadd.f32 %v1232_v31, %v952_v11  ;;  %v1259_v10 = vsel %vm1258_vm0, %v1256_v34, %v1253_v22  ;;  %924 = vst [vmem:[#allocation7 + $0x120] sm:$0xff] %v2085_v21  ;;  %2100 = vpow2.f32 %v1074_v63  ;;  %v1272_v1 = vmul.f32 -0.5, %v2723_v25  ;;  %v2769_v22 = vld [vmem:[#allocation5 + $0x190] ss:$0 sm:$0xff] }
 0x329   :  { %v1025_v38 = vsub.f32 0.0, %v993_v55  ;;  %v2089_v28 = vpop.eup %2088  ;;  %v1403_v48 = vadd.f32 %v1259_v10, %v955_v60  ;;  %2102 = vlog2.f32 %v1269_v49  ;;  %v1260_v51 = vadd.f32 1.0, %v2732_v42 }
 0x32a   :  { %v2091_v12 = vpop.eup %2090  ;;  %1432 = vst [vmem:[#allocation7 + $0xe8] sm:$0xff] %v1400_v61  ;;  %927 = vst [vmem:[#allocation7 + $0x150] sm:$0xff] %v2089_v28  ;;  %v954_v53 = vmax.f32 %v2625_v62, 0.0  ;;  %v992_v11 = vand.u32 2147483647, %v2703_v35  ;;  %2104 = vtanh.f32 %v2730_v59  ;;  %v957_v41 = vmax.f32 %v2630_v46, 0.0 }
 0x32b   :  { %v1080_v7 = vmul.f32 1.442695, %v1025_v38  ;;  %v2093_v15 = vpop.eup %2092  ;;  %1435 = vst [vmem:[#allocation7 + $0x118] sm:$0xff] %v1403_v48  ;;  %926 = vst [vmem:[#allocation7 + $0x140] sm:$0xff] %v2091_v12  ;;  %v1248_v2 = vand.u32 2147483647, %v2705_v52  ;;  %2106 = vlog2.f32 %v1260_v51  ;;  %v1247_v16 = vmul.f32 %v2705_v52, %v1246_v50 }
 0x32c   :  { %929 = vst [vmem:[#allocation7 + $0x170] sm:$0xff] %v2093_v15  ;;  %v995_v29 = vand.u32 2147483647, %v2730_v59  ;;  %v1024_v9 = vsub.f32 0.0, %v992_v11  ;;  %v2749_v62 = vadd.f32 %v2380_v45, %v2566_v56  ;;  %v1273_v58 = vadd.f32 1.0, %v1272_v1 }
 0x32d   :  { %v2744_v5 = vpop.eup %2094  ;;  %2108 = vpow2.f32 %v1080_v7  ;;  %v1263_v44 = vmul.f32 -0.5, %v2732_v42  ;;  %v2755_v57 = vadd.f32 %v2584_v30, %v2380_v45  ;;  %vm1249_vm1 = vcmp.lt.f32.partialorder %v1248_v2, 0.0004427343 }
 0x32e   :  { %v2097_v14 = vpop.eup %2096  ;;  %v1287_v46 = vadd.f32 1.0, %v2744_v5  ;;  %v1078_v20 = vmul.f32 1.442695, %v1024_v9  ;;  %v1027_v52 = vsub.f32 0.0, %v995_v29  ;;  %2110 = vtanh.f32 %v2749_v62 }
 0x32f   :  { %v2099_v17 = vpop.eup %2098  ;;  %v1244_v6 = vmul.f32 0.6931472, %v2097_v14  ;;  %v1275_v56 = vand.u32 2147483647, %v2723_v25  ;;  %v1290_v37 = vmul.f32 -0.5, %v2744_v5  ;;  %v956_v54 = vmax.f32 %v2647_v4, 0.0 }
 0x330   :  { %2112 = vlog2.f32 %v1287_v46  ;;  %928 = vst [vmem:[#allocation7 + $0x160] sm:$0xff] %v2099_v17  ;;  %v1084_v0 = vmul.f32 1.442695, %v1027_v52  ;;  %v994_v33 = vand.u32 2147483647, %v2749_v62  ;;  %v1274_v3 = vmul.f32 %v2723_v25, %v1273_v58 }
 0x331   :  { %v1250_v32 = vsel %vm1249_vm1, %v1247_v16, %v1244_v6  ;;  %2114 = vpow2.f32 %v1078_v20  ;;  %v1266_v40 = vand.u32 2147483647, %v2732_v42  ;;  %v1264_v60 = vadd.f32 1.0, %v1263_v44 }
 0x332   :  { %v2761_v45 = vpop.eup %2100  ;;  %v1402_v30 = vadd.f32 %v1250_v32, %v954_v53  ;;  %2116 = vtanh.f32 %v2755_v57  ;;  %v1026_v19 = vsub.f32 0.0, %v994_v33  ;;  %v997_v63 = vand.u32 2147483647, %v2755_v57 }
 0x333   :  { %v2103_v23 = vpop.eup %2102  ;;  %v1278_v43 = vadd.f32 1.0, %v2761_v45  ;;  %2118 = vpow2.f32 %v1084_v0  ;;  %v2773_v4 = vadd.f32 %v2769_v22, %v2591_v24  ;;  %vm1276_vm2 = vcmp.lt.f32.partialorder %v1275_v56, 0.0004427343 }
 0x334   :  { %1434 = vst [vmem:[#allocation7 + $0x108] sm:$0xff] %v1402_v30  ;;  %v1271_v47 = vmul.f32 0.6931472, %v2103_v23  ;;  %v2105_v34 = vpop.eup %2104  ;;  %v1291_v55 = vadd.f32 1.0, %v1290_v37  ;;  %v2777_v25 = vadd.f32 %v2769_v22, %v2601_v39  ;;  %v1082_v49 = vmul.f32 1.442695, %v1026_v19 }
 0x335   :  { %2120 = vlog2.f32 %v1278_v43  ;;  %v2107_v21 = vpop.eup %2106  ;;  %931 = vst [vmem:[#allocation7 + $0x190] sm:$0xff] %v2105_v34  ;;  %v1029_v61 = vsub.f32 0.0, %v997_v63  ;;  %v1265_v28 = vmul.f32 %v2732_v42, %v1264_v60  ;;  %v1281_v48 = vmul.f32 -0.5, %v2761_v45 }
 0x336   :  { %v1277_v31 = vsel %vm1276_vm2, %v1274_v3, %v1271_v47  ;;  %2122 = vtanh.f32 %v2773_v4  ;;  %v1262_v24 = vmul.f32 0.6931472, %v2107_v21  ;;  %vm1267_vm3 = vcmp.lt.f32.partialorder %v1266_v40, 0.0004427343 }
 0x337   :  { %v2780_v10 = vpop.eup %2108  ;;  %v1405_v38 = vadd.f32 %v1277_v31, %v957_v41  ;;  %v1293_v50 = vand.u32 2147483647, %v2744_v5  ;;  %2124 = vpow2.f32 %v1082_v49  ;;  %v1088_v51 = vmul.f32 1.442695, %v1029_v61 }
 0x338   :  { %v1305_v39 = vadd.f32 1.0, %v2780_v10  ;;  %v2111_v12 = vpop.eup %2110  ;;  %v1268_v1 = vsel %vm1267_vm3, %v1265_v28, %v1262_v24  ;;  %v996_v7 = vand.u32 2147483647, %v2773_v4  ;;  %2126 = vtanh.f32 %v2777_v25 }
 0x339   :  { %1437 = vst [vmem:[#allocation7 + $0x138] sm:$0xff] %v1405_v38  ;;  %v1404_v53 = vadd.f32 %v1268_v1, %v956_v54  ;;  %v1292_v42 = vmul.f32 %v2744_v5, %v1291_v55  ;;  %v1284_v11 = vand.u32 2147483647, %v2761_v45  ;;  %930 = vst [vmem:[#allocation7 + $0x180] sm:$0xff] %v2111_v12  ;;  %v1282_v29 = vadd.f32 1.0, %v1281_v48 }
 0x33a   :  { %v2113_v15 = vpop.eup %2112  ;;  %2128 = vlog2.f32 %v1305_v39  ;;  %v1028_v16 = vsub.f32 0.0, %v996_v7  ;;  %v959_v14 = vmax.f32 %v2672_v13, 0.0  ;;  %vm1294_vm4 = vcmp.lt.f32.partialorder %v1293_v50, 0.0004427343 }
 0x33b   :  { %v2790_v2 = vpop.eup %2114  ;;  %v1289_v41 = vmul.f32 0.6931472, %v2113_v15  ;;  %2130 = vpow2.f32 %v1088_v51  ;;  %1436 = vst [vmem:[#allocation7 + $0x128] sm:$0xff] %v1404_v53  ;;  %v1308_v58 = vmul.f32 -0.5, %v2780_v10  ;;  %v999_v6 = vand.u32 2147483647, %v2777_v25 }
 0x33c   :  { %v2117_v9 = vpop.eup %2116  ;;  %v1296_v44 = vadd.f32 1.0, %v2790_v2  ;;  %v1086_v17 = vmul.f32 1.442695, %v1028_v16  ;;  %v2800_v20 = vadd.f32 %v2769_v22, %v2608_v8  ;;  %v958_v56 = vmax.f32 %v2689_v27, 0.0 }
 0x33d   :  { %v2795_v5 = vpop.eup %2118  ;;  %v1295_v46 = vsel %vm1294_vm4, %v1292_v42, %v1289_v41  ;;  %933 = vst [vmem:[#allocation7 + $0x1b0] sm:$0xff] %v2117_v9  ;;  %v1283_v37 = vmul.f32 %v2761_v45, %v1282_v29  ;;  %vm2804_vm5 = vcmp.lt.f32.partialorder %v1284_v11, 0.0004427343  ;;  %v1299_v8 = vmul.f32 -0.5, %v2790_v2 }
 0x33e   :  { %v1407_v52 = vadd.f32 %v1295_v46, %v959_v14  ;;  %2132 = vlog2.f32 %v1296_v44  ;;  %v1323_v0 = vadd.f32 1.0, %v2795_v5  ;;  %v1031_v54 = vsub.f32 0.0, %v999_v6 }
 0x33f   :  { %v2121_v13 = vpop.eup %2120  ;;  %2134 = vpow2.f32 %v1086_v17  ;;  %v1309_v27 = vadd.f32 1.0, %v1308_v58  ;;  %v1311_v40 = vand.u32 2147483647, %v2780_v10  ;;  %v1326_v45 = vmul.f32 -0.5, %v2795_v5 }
 0x340   :  { %v2123_v33 = vpop.eup %2122  ;;  %1439 = vst [vmem:[#allocation7 + $0x158] sm:$0xff] %v1407_v52  ;;  %v1280_v30 = vmul.f32 0.6931472, %v2121_v13  ;;  %2136 = vtanh.f32 %v2800_v20  ;;  %v1092_v60 = vmul.f32 1.442695, %v1031_v54  ;;  %v2820_v47 = vadd.f32 %v2769_v22, %v2613_v18 }
 0x341   :  { %2138 = vlog2.f32 %v1323_v0  ;;  %932 = vst [vmem:[#allocation7 + $0x1a0] sm:$0xff] %v2123_v33  ;;  %v2813_v23 = vpop.eup %2124  ;;  %v998_v43 = vand.u32 2147483647, %v2800_v20  ;;  %v961_v34 = vmax.f32 %v2693_v36, 0.0  ;;  %v960_v31 = vmax.f32 %v2703_v35, 0.0 }
 0x342   :  { %v1286_v3 = vsel %vm2804_vm5, %v1283_v37, %v1280_v30  ;;  %v2127_v19 = vpop.eup %2126  ;;  %v1314_v55 = vadd.f32 1.0, %v2813_v23  ;;  %v1300_v49 = vadd.f32 1.0, %v1299_v8  ;;  %2140 = vpow2.f32 %v1092_v60 }
 0x343   :  { %v1406_v63 = vadd.f32 %v1286_v3, %v958_v56  ;;  %935 = vst [vmem:[#allocation7 + $0x1d0] sm:$0xff] %v2127_v19  ;;  %v1030_v61 = vsub.f32 0.0, %v998_v43  ;;  %v1310_v18 = vmul.f32 %v2780_v10, %v1309_v27  ;;  %v1001_v28 = vand.u32 2147483647, %v2820_v47 }
 0x344   :  { %v2129_v21 = vpop.eup %2128  ;;  %2142 = vlog2.f32 %v1314_v55  ;;  %vm1312_vm6 = vcmp.lt.f32.partialorder %v1311_v40, 0.0004427343  ;;  %v1302_v36 = vand.u32 2147483647, %v2790_v2  ;;  %v1327_v48 = vadd.f32 1.0, %v1326_v45 }
 0x345   :  { %v2825_v38 = vpop.eup %2130  ;;  %1438 = vst [vmem:[#allocation7 + $0x148] sm:$0xff] %v1406_v63  ;;  %v1307_v24 = vmul.f32 0.6931472, %v2129_v21  ;;  %v1329_v39 = vand.u32 2147483647, %v2795_v5  ;;  %2144 = vtanh.f32 %v2820_v47  ;;  %v1301_v7 = vmul.f32 %v2790_v2, %v1300_v49 }
 0x346   :  { %v1341_v50 = vadd.f32 1.0, %v2825_v38  ;;  %v1090_v12 = vmul.f32 1.442695, %v1030_v61  ;;  %v1317_v10 = vmul.f32 -0.5, %v2813_v23  ;;  %v1033_v42 = vsub.f32 0.0, %v1001_v28 }
 0x347   :  { %v1313_v35 = vsel %vm1312_vm6, %v1310_v18, %v1307_v24  ;;  %v2839_v11 = vadd.f32 %v2769_v22, %v2618_v26  ;;  %vm1303_vm7 = vcmp.lt.f32.partialorder %v1302_v36, 0.0004427343  ;;  %v963_v29 = vmax.f32 %v2730_v59, 0.0 }
 0x348   :  { %v2133_v1 = vpop.eup %2132  ;;  %v1409_v51 = vadd.f32 %v1313_v35, %v961_v34  ;;  %2146 = vlog2.f32 %v1341_v50  ;;  %v1328_v16 = vmul.f32 %v2795_v5, %v1327_v48  ;;  %v1344_v58 = vmul.f32 -0.5, %v2825_v38 }
 0x349   :  { %v2835_v15 = vpop.eup %2134  ;;  %v1298_v53 = vmul.f32 0.6931472, %v2133_v1  ;;  %2148 = vpow2.f32 %v1090_v12  ;;  %v1096_v44 = vmul.f32 1.442695, %v1033_v42  ;;  %v1318_v22 = vadd.f32 1.0, %v1317_v10 }
 0x34a   :  { %v2137_v41 = vpop.eup %2136  ;;  %1441 = vst [vmem:[#allocation7 + $0x178] sm:$0xff] %v1409_v51  ;;  %v1332_v2 = vadd.f32 1.0, %v2835_v15  ;;  %2150 = vtanh.f32 %v2839_v11  ;;  %vm1330_vm8 = vcmp.lt.f32.partialorder %v1329_v39, 0.0004427343  ;;  %v1320_v17 = vand.u32 2147483647, %v2813_v23 }
 0x34b   :  { %v2139_v9 = vpop.eup %2138  ;;  %v1304_v14 = vsel %vm1303_vm7, %v1301_v7, %v1298_v53  ;;  %934 = vst [vmem:[#allocation7 + $0x1c0] sm:$0xff] %v2137_v41  ;;  %v1000_v59 = vand.u32 2147483647, %v2839_v11  ;;  %v1347_v52 = vand.u32 2147483647, %v2825_v38  ;;  %v1345_v37 = vadd.f32 1.0, %v1344_v58 }
 0x34c   :  { %v1408_v46 = vadd.f32 %v1304_v14, %v960_v31  ;;  %v1325_v26 = vmul.f32 0.6931472, %v2139_v9  ;;  %2152 = vlog2.f32 %v1332_v2  ;;  %v2141_v5 = vpop.eup %2140  ;;  %v1335_v32 = vmul.f32 -0.5, %v2835_v15 }
 0x34d   :  { %2154 = vpow2.f32 %v1096_v44  ;;  %v1359_v0 = vadd.f32 1.0, %v2141_v5  ;;  %v1319_v30 = vmul.f32 %v2813_v23, %v1318_v22  ;;  %v1032_v8 = vsub.f32 0.0, %v1000_v59 }
 0x34e   :  { %1440 = vst [vmem:[#allocation7 + $0x168] sm:$0xff] %v1408_v46  ;;  %v1331_v6 = vsel %vm1330_vm8, %v1328_v16, %v1325_v26  ;;  %v2143_v56 = vpop.eup %2142  ;;  %v962_v27 = vmax.f32 %v2749_v62, 0.0  ;;  %vm1321_vm9 = vcmp.lt.f32.partialorder %v1320_v17, 0.0004427343  ;;  %v965_v3 = vmax.f32 %v2755_v57, 0.0 }
 0x34f   :  { %v1411_v13 = vadd.f32 %v1331_v6, %v963_v29  ;;  %v1316_v33 = vmul.f32 0.6931472, %v2143_v56  ;;  %v2145_v54 = vpop.eup %2144  ;;  %2156 = vlog2.f32 %v1359_v0  ;;  %vm2853_vm10 = vcmp.lt.f32.partialorder %v1347_v52, 0.0004427343 }
 0x350   :  { %937 = vst [vmem:[#allocation7 + $0x1f0] sm:$0xff] %v2145_v54  ;;  %v1094_v43 = vmul.f32 1.442695, %v1032_v8  ;;  %v1346_v34 = vmul.f32 %v2825_v38, %v1345_v37  ;;  %v1336_v55 = vadd.f32 1.0, %v1335_v32  ;;  %v1338_v62 = vand.u32 2147483647, %v2835_v15 }
 0x351   :  { %1443 = vst [vmem:[#allocation7 + $0x198] sm:$0xff] %v1411_v13  ;;  %v1322_v45 = vsel %vm1321_vm9, %v1319_v30, %v1316_v33  ;;  %v1362_v21 = vmul.f32 -0.5, %v2141_v5  ;;  %v964_v38 = vmax.f32 %v2773_v4, 0.0  ;;  %v1365_v39 = vand.u32 2147483647, %v2141_v5 }
 0x352   :  { %v2147_v40 = vpop.eup %2146  ;;  %v1410_v63 = vadd.f32 %v1322_v45, %v962_v27  ;;  %2158 = vpow2.f32 %v1094_v43  ;;  %v1337_v36 = vmul.f32 %v2835_v15, %v1336_v55  ;;  %vm1339_vm11 = vcmp.lt.f32.partialorder %v1338_v62, 0.0004427343 }
 0x353   :  { %v2149_v19 = vpop.eup %2148  ;;  %v1343_v23 = vmul.f32 0.6931472, %v2147_v40  ;;  %v1363_v48 = vadd.f32 1.0, %v1362_v21  ;;  %v967_v53 = vmax.f32 %v2777_v25, 0.0  ;;  %vm1366_vm12 = vcmp.lt.f32.partialorder %v1365_v39, 0.0004427343 }
 0x354   :  { %v1350_v31 = vadd.f32 1.0, %v2149_v19  ;;  %v2151_v49 = vpop.eup %2150  ;;  %1442 = vst [vmem:[#allocation7 + $0x188] sm:$0xff] %v1410_v63  ;;  %v1353_v12 = vmul.f32 -0.5, %v2149_v19  ;;  %v1356_v4 = vand.u32 2147483647, %v2149_v19  ;;  %v966_v46 = vmax.f32 %v2800_v20, 0.0 }
 0x355   :  { %v1349_v57 = vsel %vm2853_vm10, %v1346_v34, %v1343_v23  ;;  %936 = vst [vmem:[#allocation7 + $0x1e0] sm:$0xff] %v2151_v49  ;;  %v1364_v10 = vmul.f32 %v2141_v5, %v1363_v48  ;;  %v969_v52 = vmax.f32 %v2820_v47, 0.0  ;;  %v968_v30 = vmax.f32 %v2839_v11, 0.0 }
 0x356   :  { %v2153_v61 = vpop.eup %2152  ;;  %v1413_v24 = vadd.f32 %v1349_v57, %v965_v3  ;;  %2160 = vlog2.f32 %v1350_v31  ;;  %v1354_v42 = vadd.f32 1.0, %v1353_v12  ;;  %vm1357_vm13 = vcmp.lt.f32.partialorder %v1356_v4, 0.0004427343 }
 0x357   :  { %v2155_v18 = vpop.eup %2154  ;;  %v1334_v28 = vmul.f32 0.6931472, %v2153_v61 }
 0x358   :  { %1445 = vst [vmem:[#allocation7 + $0x1b8] sm:$0xff] %v1413_v24  ;;  %v1377_v50 = vadd.f32 1.0, %v2155_v18  ;;  %v1380_v15 = vmul.f32 -0.5, %v2155_v18  ;;  %v1355_v58 = vmul.f32 %v2149_v19, %v1354_v42  ;;  %v1383_v26 = vand.u32 2147483647, %v2155_v18 }
 0x359   :  { %v1340_v35 = vsel %vm1339_vm11, %v1337_v36, %v1334_v28  ;;  %v2157_v51 = vpop.eup %2156 }
 0x35a   :  { %v1412_v1 = vadd.f32 %v1340_v35, %v964_v38  ;;  %2162 = vlog2.f32 %v1377_v50  ;;  %v1361_v7 = vmul.f32 0.6931472, %v2157_v51  ;;  %v1381_v44 = vadd.f32 1.0, %v1380_v15 }
 0x35b   :  { %vm1384_vm14 = vcmp.lt.f32.partialorder %v1383_v26, 0.0004427343 }
 0x35c   :  { %1444 = vst [vmem:[#allocation7 + $0x1a8] sm:$0xff] %v1412_v1  ;;  %v2159_v41 = vpop.eup %2158  ;;  %v1367_v29 = vsel %vm1366_vm12, %v1364_v10, %v1361_v7  ;;  %v1382_v6 = vmul.f32 %v2155_v18, %v1381_v44 }
 0x35d   :  { %v1415_v16 = vadd.f32 %v1367_v29, %v967_v53  ;;  %v1368_v2 = vadd.f32 1.0, %v2159_v41  ;;  %v1371_v59 = vmul.f32 -0.5, %v2159_v41  ;;  %v1374_v32 = vand.u32 2147483647, %v2159_v41 }
 0x35f   :  { %1447 = vst [vmem:[#allocation7 + $0x1d8] sm:$0xff] %v1415_v16  ;;  %2164 = vlog2.f32 %v1368_v2  ;;  %v1372_v37 = vadd.f32 1.0, %v1371_v59  ;;  %vm1375_vm15 = vcmp.lt.f32.partialorder %v1374_v32, 0.0004427343 }
 0x360   :  { %v2161_v9 = vpop.eup %2160 }
 0x361   :  { %v1352_v14 = vmul.f32 0.6931472, %v2161_v9  ;;  %v1373_v33 = vmul.f32 %v2159_v41, %v1372_v37 }
 0x363   :  { %v1358_v22 = vsel %vm1357_vm13, %v1355_v58, %v1352_v14 }
 0x364   :  { %v2163_v25 = vpop.eup %2162  ;;  %v1414_v17 = vadd.f32 %v1358_v22, %v966_v46 }
 0x365   :  { %v1379_v5 = vmul.f32 0.6931472, %v2163_v25 }
 0x366   :  { %1446 = vst [vmem:[#allocation7 + $0x1c8] sm:$0xff] %v1414_v17 }
 0x367   :  { %v1385_v56 = vsel %vm1384_vm14, %v1382_v6, %v1379_v5 }
 0x368   :  { %v1417_v13 = vadd.f32 %v1385_v56, %v969_v52 }
 0x369   :  { %v2165_v0 = vpop.eup %2164 }
 0x36a   :  { %1449 = vst [vmem:[#allocation7 + $0x1f8] sm:$0xff] %v1417_v13  ;;  %v1370_v20 = vmul.f32 0.6931472, %v2165_v0 }
 0x36c   :  { %v1376_v8 = vsel %vm1375_vm15, %v1373_v33, %v1370_v20 }
 0x36d   :  { %v1416_v54 = vadd.f32 %v1376_v8, %v968_v30 }
 0x36f   :  { %1448 = vst [vmem:[#allocation7 + $0x1e8] sm:$0xff] %v1416_v54 }
 0x370   :  { %2222 = shalt.err (!%p2219_p6)
}
 0x371   :  { %s2223_s10 = scalar_lea.hbm %s2881_s2, 8192 }
 0x372   :  { %p2224_p7 = scmp.ne.s32.totalorder %s2881_s2, %s2223_s10  ;;  %p2227_p8 = scmp.lt.u32.totalorder %s2223_s10, %s2881_s2 }
 0x374   :  { %p2229_p9 = pnand %p2227_p8, %p2224_p7 }
 0x376   :  { %2232 = shalt.err (!%p2229_p9)
}
 0x377   :  { %s2244_s15 = smov 256   ;;  %s2245_s16 = smov 16  }
 0x378   :  { %1461 = dma.vmem_to_hbm [thread:$0]  %s1456_s6, 8192, %s2881_s2, [#allocation4], %s2244_s15, %s2244_s15, %s2245_s16  }
 0x379   :  { %2237 = dma.done.wait [#allocation4], 8192  }
 0x37a   :  { %2238 = vsyncadd [#allocation4], 4294959104 }
 0x37b   :  { %1465 = vsyncpa [#allocation3], 1 }
 0x37c   :  { %1466 = vsyncpa [#allocation6], 1 }
 0x37d   :  { %1467 = vsyncpa [#allocation4], 1 }

// kernel: tpu_custom_call.1
= control target key start
LH: loop header
LB: loop body
LE: loop exit
PB: predicated region body
PF: predicated region fallthrough
CT: control target
= control target key end

     0   :  { %7 = vsyncpa [#allocation3], 0  ;;  %s2879_s0 = inlined_call_operand.hbm [shape: f32[256,128], index: 0, kind: input, shape index: {}]   ;;  %s2880_s1 = inlined_call_operand.hbm [shape: f32[408,128], index: 1, kind: input, shape index: {}]   ;;  %s2881_s2 = inlined_call_operand.hbm [shape: f32[256,256], index: 2, kind: output, shape index: {}]  }
   0x1   :  { %8 = vsyncpa [#allocation6], 0 }
   0x2   :  { %9 = vsyncpa [#allocation4], 0  ;;  %s2239_s9 = smov [#allocation2]   ;;  %s2167_s13 = scalar_lea.hbm %s2879_s0, 4096 }
   0x3   :  { %s15_s10 = sshll.u32 %s2239_s9, 4  ;;  %p2168_p0 = scmp.ne.s32.totalorder %s2879_s0, %s2167_s13  ;;  %s16_s10 = int_to_ptr.vmem [resolvable:$true] %s15_s10 }
   0x4   :  { %p2171_p1 = scmp.lt.u32.totalorder %s2167_s13, %s2879_s0 }
   0x6   :  { %p2173_p2 = pnand %p2171_p1, %p2168_p0 }
   0x8   :  { %2176 = shalt.err (!%p2173_p2)
}
   0x9   :  { %s2177_s18 = scalar_lea.vmem %s16_s10, 4096  ;;  %p2182_p4 = scmp.lt.s32.totalorder %s16_s10, %s16_s10 }
   0xa   :  { %p2178_p3 = scmp.ne.s32.totalorder %s16_s10, %s2177_s18  ;;  %p2183_p5 = scmp.lt.s32.totalorder %s2177_s18, %s2177_s18 }
   0xc   :  { %p2184_p6 = por %p2183_p5, %p2182_p4 }
   0xe   :  { %p2185_p7 = pnand %p2184_p6, %p2178_p3 }
  0x10   :  { %2188 = shalt.err (!%p2185_p7)
}
  0x11   :  { %s2240_s19 = smov 128   ;;  %s2241_s20 = smov 8  }
  0x12   :  { %21 = dma.hbm_to_vmem [thread:$0]  %s2879_s0, 4096, %s16_s10, [#allocation3], %s2240_s19, %s2240_s19, %s2241_s20  }
  0x13   :  { %s2242_s23 = smov [#allocation5]   ;;  %s2189_s27 = scalar_lea.hbm %s2880_s1, 6528 }
  0x14   :  { %s27_s24 = sshll.u32 %s2242_s23, 4  ;;  %p2190_p8 = scmp.ne.s32.totalorder %s2880_s1, %s2189_s27  ;;  %s28_s24 = int_to_ptr.vmem [resolvable:$true] %s27_s24 }
  0x15   :  { %p2193_p9 = scmp.lt.u32.totalorder %s2189_s27, %s2880_s1 }
  0x17   :  { %p2195_p10 = pnand %p2193_p9, %p2190_p8 }
  0x19   :  { %2198 = shalt.err (!%p2195_p10)
}
  0x1a   :  { %s2199_s4 = scalar_lea.vmem %s28_s24, 6528  ;;  %p2204_p12 = scmp.lt.s32.totalorder %s28_s24, %s28_s24 }
  0x1b   :  { %p2200_p11 = scmp.ne.s32.totalorder %s28_s24, %s2199_s4  ;;  %p2205_p13 = scmp.lt.s32.totalorder %s2199_s4, %s2199_s4 }
  0x1d   :  { %p2206_p0 = por %p2205_p13, %p2204_p12 }
  0x1f   :  { %p2207_p1 = pnand %p2206_p0, %p2200_p11 }
  0x21   :  { %2210 = shalt.err (!%p2207_p1)
}
  0x22   :  { %33 = dma.hbm_to_vmem [thread:$0]  %s2880_s1, 6528, %s28_s24, [#allocation6], %s2240_s19, %s2240_s19, %s2241_s20  }
  0x23   :  { %2233 = dma.done.wait [#allocation3], 4096  }
  0x24   :  { %2234 = vsyncadd [#allocation3], 4294963200 }
  0x25   :  { %2235 = dma.done.wait [#allocation6], 6528  }
  0x26   :  { %2236 = vsyncadd [#allocation6], 4294960768  ;;  %v72_v0 = vld [vmem:[#allocation5] sm:$0xff]  ;;  %v73_v1 = vld [vmem:[#allocation5 + $0x8] sm:$0xff]  ;;  %s2243_s1 = smov [#allocation7]  }
  0x27   :  { %v74_v2 = vld [vmem:[#allocation5 + $0x10] sm:$0xff]  ;;  %v1855_v3 = vpack.c.bf16 %v73_v1, %v72_v0  ;;  %v75_v4 = vld [vmem:[#allocation5 + $0x18] sm:$0xff]  ;;  %v76_v6 = vld [vmem:[#allocation5 + $0x20] sm:$0xff]  ;;  %s1455_s6 = sshll.u32 %s2243_s1, 4  ;;  %s1456_s6 = int_to_ptr.vmem [resolvable:$true] %s1455_s6 }
  0x28   :  { %v1859_v5 = vpack.c.bf16 %v75_v4, %v74_v2  ;;  %v77_v7 = vld [vmem:[#allocation5 + $0x28] sm:$0xff]  ;;  %v40_v9 = vld [vmem:[#allocation2] sm:$0xff]  ;;  %v78_v10 = vld [vmem:[#allocation5 + $0x30] sm:$0xff]  ;;  %s2211_s7 = scalar_lea.vmem %s1456_s6, 8192  ;;  %p2216_p3 = scmp.lt.s32.totalorder %s1456_s6, %s1456_s6 }
  0x29   :  { %1856 = vmatprep.subr.bf16.mxu0 %v1855_v3  ;;  %1951 = vmatprep.subr.bf16.mxu1 %v1855_v3  ;;  %v1863_v8 = vpack.c.bf16 %v77_v7, %v76_v6  ;;  %v79_v11 = vld [vmem:[#allocation5 + $0x38] sm:$0xff]  ;;  %v80_v13 = vld [vmem:[#allocation5 + $0x40] sm:$0xff]  ;;  %v81_v14 = vld [vmem:[#allocation5 + $0x48] sm:$0xff]  ;;  %p2212_p2 = scmp.ne.s32.totalorder %s1456_s6, %s2211_s7  ;;  %p2217_p4 = scmp.lt.s32.totalorder %s2211_s7, %s2211_s7 }
  0x2a   :  { %1858 = vmatpush3.bf16.msra.mxu0 %v1855_v3  ;;  %1959 = vmatpush3.bf16.msra.mxu1 %v1855_v3  ;;  %v1867_v12 = vpack.c.bf16 %v79_v11, %v78_v10  ;;  %v56_v15 = vld [vmem:[#allocation2 + $0x80] sm:$0xff]  ;;  %v1871_v16 = vpack.c.bf16 %v81_v14, %v80_v13  ;;  %v82_v17 = vld [vmem:[#allocation5 + $0x50] sm:$0xff]  ;;  %v83_v18 = vld [vmem:[#allocation5 + $0x58] sm:$0xff] }
  0x2b   :  { %1860 = vmatprep.subr.bf16.mxu0 %v1859_v5  ;;  %1952 = vmatprep.subr.bf16.mxu1 %v1859_v5  ;;  %v1875_v19 = vpack.c.bf16 %v83_v18, %v82_v17  ;;  %v84_v20 = vld [vmem:[#allocation5 + $0x60] sm:$0xff]  ;;  %v85_v21 = vld [vmem:[#allocation5 + $0x68] sm:$0xff]  ;;  %v86_v23 = vld [vmem:[#allocation5 + $0x70] sm:$0xff]  ;;  %p2218_p5 = por %p2217_p4, %p2216_p3 }
  0x2c   :  { %1647 = vmatprep.mubr.f32.mxu0 %v40_v9  ;;  %1671 = vmatprep.mubr.f32.mxu1 %v56_v15  ;;  %v1879_v22 = vpack.c.bf16 %v85_v21, %v84_v20  ;;  %v87_v24 = vld [vmem:[#allocation5 + $0x78] sm:$0xff]  ;;  %v350_v26 = vld [vmem:[#allocation5 + $0x88] sm:$0xff]  ;;  %v351_v27 = vld [vmem:[#allocation5 + $0x90] sm:$0xff] }
  0x2d   :  { %v1883_v25 = vpack.c.bf16 %v87_v24, %v86_v23  ;;  %v1887_v28 = vpack.c.bf16 %v351_v27, %v350_v26  ;;  %v352_v29 = vld [vmem:[#allocation5 + $0x98] sm:$0xff]  ;;  %v353_v30 = vld [vmem:[#allocation5 + $0xa0] sm:$0xff]  ;;  %v41_v31 = vld [vmem:[#allocation2 + $0x8] sm:$0xff]  ;;  %p2219_p6 = pnand %p2218_p5, %p2212_p2 }
  0x2e   :  { %1862 = vmatpush3.bf16.msra.mxu0 %v1859_v5  ;;  %1960 = vmatpush3.bf16.msra.mxu1 %v1859_v5  ;;  %v57_v32 = vld [vmem:[#allocation2 + $0x88] sm:$0xff]  ;;  %v42_v33 = vld [vmem:[#allocation2 + $0x10] sm:$0xff]  ;;  %v1891_v35 = vpack.c.bf16 %v353_v30, %v352_v29  ;;  %v43_v38 = vld [vmem:[#allocation2 + $0x18] sm:$0xff] }
  0x2f   :  { %1864 = vmatprep.subr.bf16.mxu0 %v1863_v8  ;;  %1953 = vmatprep.subr.bf16.mxu1 %v1863_v8  ;;  %v58_v34 = vld [vmem:[#allocation2 + $0x90] sm:$0xff]  ;;  %v354_v36 = vld [vmem:[#allocation5 + $0xa8] sm:$0xff]  ;;  %v59_v39 = vld [vmem:[#allocation2 + $0x98] sm:$0xff] }
  0x30   :  { %v355_v37 = vld [vmem:[#allocation5 + $0xb0] sm:$0xff]  ;;  %v44_v40 = vld [vmem:[#allocation2 + $0x20] sm:$0xff]  ;;  %v356_v43 = vld [vmem:[#allocation5 + $0xb8] sm:$0xff] }
  0x31   :  { %v60_v41 = vld [vmem:[#allocation2 + $0xa0] sm:$0xff]  ;;  %v1895_v42 = vpack.c.bf16 %v355_v37, %v354_v36  ;;  %v45_v45 = vld [vmem:[#allocation2 + $0x28] sm:$0xff]  ;;  %v46_v47 = vld [vmem:[#allocation2 + $0x30] sm:$0xff] }
  0x32   :  { %1866 = vmatpush3.bf16.msra.mxu0 %v1863_v8  ;;  %1961 = vmatpush3.bf16.msra.mxu1 %v1863_v8  ;;  %v357_v44 = vld [vmem:[#allocation5 + $0xc0] sm:$0xff]  ;;  %v61_v46 = vld [vmem:[#allocation2 + $0xa8] sm:$0xff]  ;;  %v62_v48 = vld [vmem:[#allocation2 + $0xb0] sm:$0xff] }
  0x33   :  { %1868 = vmatprep.subr.bf16.mxu0 %v1867_v12  ;;  %1954 = vmatprep.subr.bf16.mxu1 %v1867_v12  ;;  %v1899_v49 = vpack.c.bf16 %v357_v44, %v356_v43  ;;  %v358_v50 = vld [vmem:[#allocation5 + $0xc8] sm:$0xff]  ;;  %v359_v51 = vld [vmem:[#allocation5 + $0xd0] sm:$0xff]  ;;  %v47_v52 = vld [vmem:[#allocation2 + $0x38] sm:$0xff] }
  0x34   :  { %v63_v53 = vld [vmem:[#allocation2 + $0xb8] sm:$0xff]  ;;  %v48_v54 = vld [vmem:[#allocation2 + $0x40] sm:$0xff]  ;;  %v1903_v56 = vpack.c.bf16 %v359_v51, %v358_v50  ;;  %v49_v59 = vld [vmem:[#allocation2 + $0x48] sm:$0xff] }
  0x35   :  { %v64_v55 = vld [vmem:[#allocation2 + $0xc0] sm:$0xff]  ;;  %v360_v57 = vld [vmem:[#allocation5 + $0xd8] sm:$0xff]  ;;  %v65_v60 = vld [vmem:[#allocation2 + $0xc8] sm:$0xff] }
  0x36   :  { %1870 = vmatpush3.bf16.msra.mxu0 %v1867_v12  ;;  %1962 = vmatpush3.bf16.msra.mxu1 %v1867_v12  ;;  %v361_v58 = vld [vmem:[#allocation5 + $0xe0] sm:$0xff]  ;;  %v50_v61 = vld [vmem:[#allocation2 + $0x50] sm:$0xff]  ;;  %v362_v0 = vld [vmem:[#allocation5 + $0xe8] sm:$0xff] }
  0x37   :  { %1872 = vmatprep.subr.bf16.mxu0 %v1871_v16  ;;  %1955 = vmatprep.subr.bf16.mxu1 %v1871_v16  ;;  %v66_v62 = vld [vmem:[#allocation2 + $0xd0] sm:$0xff]  ;;  %v1907_v63 = vpack.c.bf16 %v361_v58, %v360_v57  ;;  %v51_v2 = vld [vmem:[#allocation2 + $0x58] sm:$0xff]  ;;  %v52_v4 = vld [vmem:[#allocation2 + $0x60] sm:$0xff] }
  0x38   :  { %v363_v1 = vld [vmem:[#allocation5 + $0xf0] sm:$0xff]  ;;  %v67_v3 = vld [vmem:[#allocation2 + $0xd8] sm:$0xff]  ;;  %v68_v5 = vld [vmem:[#allocation2 + $0xe0] sm:$0xff] }
  0x39   :  { %v1911_v6 = vpack.c.bf16 %v363_v1, %v362_v0  ;;  %v53_v7 = vld [vmem:[#allocation2 + $0x68] sm:$0xff]  ;;  %v54_v9 = vld [vmem:[#allocation2 + $0x70] sm:$0xff]  ;;  %v55_v11 = vld [vmem:[#allocation2 + $0x78] sm:$0xff] }
  0x3a   :  { %1874 = vmatpush3.bf16.msra.mxu0 %v1871_v16  ;;  %1963 = vmatpush3.bf16.msra.mxu1 %v1871_v16  ;;  %v69_v8 = vld [vmem:[#allocation2 + $0xe8] sm:$0xff]  ;;  %v70_v10 = vld [vmem:[#allocation2 + $0xf0] sm:$0xff]  ;;  %v71_v12 = vld [vmem:[#allocation2 + $0xf8] sm:$0xff] }
  0x3b   :  { %1876 = vmatprep.subr.bf16.mxu0 %v1875_v19  ;;  %1956 = vmatprep.subr.bf16.mxu1 %v1875_v19  ;;  %v364_v13 = vld [vmem:[#allocation5 + $0xf8] sm:$0xff]  ;;  %v365_v14 = vld [vmem:[#allocation5 + $0x100] sm:$0xff]  ;;  %v628_v16 = vld [vmem:[#allocation5 + $0x110] sm:$0xff] }
  0x3c   :  { %v1915_v15 = vpack.c.bf16 %v365_v14, %v364_v13  ;;  %v629_v17 = vld [vmem:[#allocation5 + $0x118] sm:$0xff]  ;;  %v630_v18 = vld [vmem:[#allocation5 + $0x120] sm:$0xff]  ;;  %v631_v20 = vld [vmem:[#allocation5 + $0x128] sm:$0xff] }
  0x3d   :  { %v1923_v21 = vpack.c.bf16 %v631_v20, %v630_v18  ;;  %v633_v23 = vld [vmem:[#allocation5 + $0x138] sm:$0xff]  ;;  %v635_v26 = vld [vmem:[#allocation5 + $0x148] sm:$0xff]  ;;  %v2285_v37 = vld [vmem:[#allocation5 + $0x80] ss:$0 sm:$0xff] }
  0x3e   :  { %1878 = vmatpush3.bf16.msra.mxu0 %v1875_v19  ;;  %1964 = vmatpush3.bf16.msra.mxu1 %v1875_v19  ;;  %v1919_v19 = vpack.c.bf16 %v629_v17, %v628_v16  ;;  %v637_v29 = vld [vmem:[#allocation5 + $0x158] sm:$0xff] }
  0x3f   :  { %1880 = vmatprep.subr.bf16.mxu0 %v1879_v22  ;;  %1957 = vmatprep.subr.bf16.mxu1 %v1879_v22 }
  0x42   :  { %1882 = vmatpush3.bf16.msra.mxu0 %v1879_v22  ;;  %1965 = vmatpush3.bf16.msra.mxu1 %v1879_v22  ;;  %v632_v22 = vld [vmem:[#allocation5 + $0x130] sm:$0xff] }
  0x43   :  { %1884 = vmatprep.subr.bf16.mxu0 %v1883_v25  ;;  %1958 = vmatprep.subr.bf16.mxu1 %v1883_v25  ;;  %v1927_v24 = vpack.c.bf16 %v633_v23, %v632_v22 }
  0x46   :  { %1886 = vmatpush3.bf16.msra.mxu0 %v1883_v25  ;;  %1966 = vmatpush3.bf16.msra.mxu1 %v1883_v25  ;;  %v634_v25 = vld [vmem:[#allocation5 + $0x140] sm:$0xff] }
  0x47   :  { %1888 = vmatprep.subr.bf16.mxu1 %v1887_v28  ;;  %1920 = vmatprep.subr.bf16.mxu0 %v1919_v19  ;;  %v1931_v27 = vpack.c.bf16 %v635_v26, %v634_v25 }
  0x49   :  { %1648 = vmatmul.mubr.f32.vlgmr.msra.gmra.mrb[0].mxu0 %v41_v31  ;;  %1672 = vmatmul.mubr.f32.vlgmr.msra.gmra.mrb[0].mxu1 %v57_v32  ;;  %v638_v31 = vld [vmem:[#allocation5 + $0x160] sm:$0xff]  ;;  %v639_v32 = vld [vmem:[#allocation5 + $0x168] sm:$0xff] }
  0x4a   :  { %1650 = vmatprep.mubr.f32.mxu0 %v42_v33  ;;  %1674 = vmatprep.mubr.f32.mxu1 %v58_v34  ;;  %v1939_v33 = vpack.c.bf16 %v639_v32, %v638_v31  ;;  %v640_v34 = vld [vmem:[#allocation5 + $0x170] sm:$0xff] }
  0x4b   :  { %1890 = vmatpush3.bf16.msra.mxu1 %v1887_v28  ;;  %1922 = vmatpush3.bf16.msra.mxu0 %v1919_v19  ;;  %v636_v28 = vld [vmem:[#allocation5 + $0x150] sm:$0xff] }
  0x4c   :  { %1892 = vmatprep.subr.bf16.mxu1 %v1891_v35  ;;  %1924 = vmatprep.subr.bf16.mxu0 %v1923_v21  ;;  %v1935_v30 = vpack.c.bf16 %v637_v29, %v636_v28 }
  0x4d   :  { %1651 = vmatmul.mubr.f32.gmra.mrb[2].mxu0 %v43_v38  ;;  %1675 = vmatmul.mubr.f32.gmra.mrb[2].mxu1 %v59_v39 }
  0x4e   :  { %1653 = vmatprep.mubr.f32.mxu0 %v44_v40  ;;  %1677 = vmatprep.mubr.f32.mxu1 %v60_v41 }
  0x4f   :  { %1894 = vmatpush3.bf16.msra.mxu1 %v1891_v35  ;;  %1926 = vmatpush3.bf16.msra.mxu0 %v1923_v21  ;;  %v641_v35 = vld [vmem:[#allocation5 + $0x178] sm:$0xff] }
  0x50   :  { %1896 = vmatprep.subr.bf16.mxu1 %v1895_v42  ;;  %1928 = vmatprep.subr.bf16.mxu0 %v1927_v24  ;;  %v1943_v36 = vpack.c.bf16 %v641_v35, %v640_v34 }
  0x51   :  { %1654 = vmatmul.mubr.f32.gmra.mrb[4].mxu0 %v45_v45  ;;  %1678 = vmatmul.mubr.f32.gmra.mrb[4].mxu1 %v61_v46 }
  0x52   :  { %1656 = vmatprep.mubr.f32.mxu0 %v46_v47  ;;  %1680 = vmatprep.mubr.f32.mxu1 %v62_v48 }
  0x53   :  { %1898 = vmatpush3.bf16.msra.mxu1 %v1895_v42  ;;  %1930 = vmatpush3.bf16.msra.mxu0 %v1927_v24 }
  0x54   :  { %1900 = vmatprep.subr.bf16.mxu1 %v1899_v49  ;;  %1932 = vmatprep.subr.bf16.mxu0 %v1931_v27 }
  0x55   :  { %1657 = vmatmul.mubr.f32.gmra.mrb[6].mxu0 %v47_v52  ;;  %1681 = vmatmul.mubr.f32.gmra.mrb[6].mxu1 %v63_v53 }
  0x56   :  { %1659 = vmatprep.mubr.f32.mxu0 %v48_v54  ;;  %1683 = vmatprep.mubr.f32.mxu1 %v64_v55 }
  0x57   :  { %1902 = vmatpush3.bf16.msra.mxu1 %v1899_v49  ;;  %1934 = vmatpush3.bf16.msra.mxu0 %v1931_v27 }
  0x58   :  { %1904 = vmatprep.subr.bf16.mxu1 %v1903_v56  ;;  %1936 = vmatprep.subr.bf16.mxu0 %v1935_v30 }
  0x59   :  { %1660 = vmatmul.mubr.f32.gmra.mrb[8].mxu0 %v49_v59  ;;  %1684 = vmatmul.mubr.f32.gmra.mrb[8].mxu1 %v65_v60 }
  0x5a   :  { %1662 = vmatprep.mubr.f32.mxu0 %v50_v61  ;;  %1686 = vmatprep.mubr.f32.mxu1 %v66_v62 }
  0x5b   :  { %1906 = vmatpush3.bf16.msra.mxu1 %v1903_v56  ;;  %1938 = vmatpush3.bf16.msra.mxu0 %v1935_v30 }
  0x5c   :  { %1908 = vmatprep.subr.bf16.mxu1 %v1907_v63  ;;  %1940 = vmatprep.subr.bf16.mxu0 %v1939_v33 }
  0x5d   :  { %1663 = vmatmul.mubr.f32.gmra.mrb[10].mxu0 %v51_v2  ;;  %1687 = vmatmul.mubr.f32.gmra.mrb[10].mxu1 %v67_v3 }
  0x5e   :  { %1665 = vmatprep.mubr.f32.mxu0 %v52_v4  ;;  %1689 = vmatprep.mubr.f32.mxu1 %v68_v5 }
  0x5f   :  { %1910 = vmatpush3.bf16.msra.mxu1 %v1907_v63  ;;  %1942 = vmatpush3.bf16.msra.mxu0 %v1939_v33 }
  0x60   :  { %1912 = vmatprep.subr.bf16.mxu1 %v1911_v6  ;;  %1944 = vmatprep.subr.bf16.mxu0 %v1943_v36 }
  0x61   :  { %1666 = vmatmul.mubr.f32.gmra.mrb[12].mxu0 %v53_v7  ;;  %1690 = vmatmul.mubr.f32.gmra.mrb[12].mxu1 %v69_v8 }
  0x62   :  { %1668 = vmatprep.mubr.f32.mxu0 %v54_v9  ;;  %1692 = vmatprep.mubr.f32.mxu1 %v70_v10 }
  0x63   :  { %1914 = vmatpush3.bf16.msra.mxu1 %v1911_v6  ;;  %1946 = vmatpush3.bf16.msra.mxu0 %v1943_v36 }
  0x64   :  { %1916 = vmatprep.subr.bf16.mxu1 %v1915_v15 }
  0x65   :  { %1669 = vmatmul.mubr.f32.gmra.mrb[14].mxu0 %v55_v11  ;;  %1693 = vmatmul.mubr.f32.gmra.mrb[14].mxu1 %v71_v12 }
  0x67   :  { %1918 = vmatpush3.bf16.msra.mxu1 %v1915_v15 }
 0x11c   :  { %v1649_v38 = vpop.f32.mrb[0].mxu0  ;;  %v2287_v39 = vpop.f32.mrb[0].mxu1 }
 0x11d   :  { %v165_v40 = vadd.f32 %v1649_v38, %v2285_v37  ;;  %v159_v41 = vpop.f32.mrb[1].mxu0  ;;  %v2290_v42 = vpop.f32.mrb[1].mxu1 }
 0x11e   :  { %v160_v43 = vadd.f32 %v2285_v37, %v159_v41  ;;  %v240_v30 = vadd.f32 %v2285_v37, %v2290_v42 }
 0x11f   :  { %v319_v47 = vmax.f32 %v165_v40, 0.0 }
 0x120   :  { %v318_v44 = vmax.f32 %v160_v43, 0.0  ;;  %v1652_v45 = vpop.f32.mrb[2].mxu0  ;;  %v2293_v46 = vpop.f32.mrb[2].mxu1  ;;  %v334_v40 = vmax.f32 %v240_v30, 0.0 }
 0x121   :  { %v175_v48 = vadd.f32 %v1652_v45, %v2285_v37  ;;  %v169_v49 = vpop.f32.mrb[3].mxu0  ;;  %v2296_v50 = vpop.f32.mrb[3].mxu1 }
 0x122   :  { %v170_v51 = vadd.f32 %v2285_v37, %v169_v49  ;;  %1727 = vmatprep.mubr.f32.mxu1 %v318_v44  ;;  %v250_v41 = vadd.f32 %v2285_v37, %v2296_v50  ;;  %v245_v44 = vadd.f32 %v2287_v39, %v2285_v37 }
 0x123   :  { %1728 = vmatmul.mubr.f32.vlgmr.msra.gmra.mrb[16].mxu1 %v319_v47  ;;  %v321_v55 = vmax.f32 %v175_v48, 0.0  ;;  %v255_v48 = vadd.f32 %v2293_v46, %v2285_v37 }
 0x124   :  { %v320_v52 = vmax.f32 %v170_v51, 0.0  ;;  %v1655_v53 = vpop.f32.mrb[4].mxu0  ;;  %v2299_v54 = vpop.f32.mrb[4].mxu1  ;;  %v336_v42 = vmax.f32 %v250_v41, 0.0  ;;  %v335_v47 = vmax.f32 %v245_v44, 0.0 }
 0x125   :  { %v185_v56 = vadd.f32 %v1655_v53, %v2285_v37  ;;  %v179_v57 = vpop.f32.mrb[5].mxu0  ;;  %v2302_v58 = vpop.f32.mrb[5].mxu1  ;;  %v337_v51 = vmax.f32 %v255_v48, 0.0  ;;  %v265_v39 = vadd.f32 %v2299_v54, %v2285_v37 }
 0x126   :  { %v180_v59 = vadd.f32 %v2285_v37, %v179_v57  ;;  %1730 = vmatprep.mubr.f32.mxu1 %v320_v52  ;;  %v260_v45 = vadd.f32 %v2285_v37, %v2302_v58 }
 0x127   :  { %1731 = vmatmul.mubr.f32.gmra.mrb[18].mxu1 %v321_v55  ;;  %v323_v63 = vmax.f32 %v185_v56, 0.0  ;;  %v339_v55 = vmax.f32 %v265_v39, 0.0 }
 0x128   :  { %v322_v60 = vmax.f32 %v180_v59, 0.0  ;;  %v1658_v61 = vpop.f32.mrb[6].mxu0  ;;  %v2305_v62 = vpop.f32.mrb[6].mxu1  ;;  %v338_v49 = vmax.f32 %v260_v45, 0.0 }
 0x129   :  { %v195_v0 = vadd.f32 %v1658_v61, %v2285_v37  ;;  %v189_v1 = vpop.f32.mrb[7].mxu0  ;;  %v269_v2 = vpop.f32.mrb[7].mxu1  ;;  %v275_v56 = vadd.f32 %v2305_v62, %v2285_v37 }
 0x12a   :  { %v190_v3 = vadd.f32 %v2285_v37, %v189_v1  ;;  %1733 = vmatprep.mubr.f32.mxu1 %v322_v60  ;;  %v270_v50 = vadd.f32 %v2285_v37, %v269_v2 }
 0x12b   :  { %1734 = vmatmul.mubr.f32.gmra.mrb[20].mxu1 %v323_v63  ;;  %v325_v7 = vmax.f32 %v195_v0, 0.0  ;;  %v341_v58 = vmax.f32 %v275_v56, 0.0 }
 0x12c   :  { %v324_v4 = vmax.f32 %v190_v3, 0.0  ;;  %v1661_v5 = vpop.f32.mrb[8].mxu0  ;;  %v2309_v6 = vpop.f32.mrb[8].mxu1  ;;  %v340_v52 = vmax.f32 %v270_v50, 0.0 }
 0x12d   :  { %v205_v8 = vadd.f32 %v1661_v5, %v2285_v37  ;;  %v199_v9 = vpop.f32.mrb[9].mxu0  ;;  %v279_v10 = vpop.f32.mrb[9].mxu1  ;;  %v285_v59 = vadd.f32 %v2309_v6, %v2285_v37 }
 0x12e   :  { %v200_v11 = vadd.f32 %v2285_v37, %v199_v9  ;;  %1736 = vmatprep.mubr.f32.mxu1 %v324_v4  ;;  %v280_v53 = vadd.f32 %v2285_v37, %v279_v10  ;;  %v2346_v10 = vld [vmem:[#allocation5 + $0x108] ss:$0 sm:$0xff] }
 0x12f   :  { %1737 = vmatmul.mubr.f32.gmra.mrb[22].mxu1 %v325_v7  ;;  %v327_v15 = vmax.f32 %v205_v8, 0.0  ;;  %v343_v61 = vmax.f32 %v285_v59, 0.0  ;;  %v642_v7 = vld [vmem:[#allocation5 + $0x180] sm:$0xff]  ;;  %v643_v8 = vld [vmem:[#allocation5 + $0x188] sm:$0xff] }
 0x130   :  { %v326_v12 = vmax.f32 %v200_v11, 0.0  ;;  %v1664_v13 = vpop.f32.mrb[10].mxu0  ;;  %v2313_v14 = vpop.f32.mrb[10].mxu1  ;;  %v342_v46 = vmax.f32 %v280_v53, 0.0  ;;  %v1947_v9 = vpack.c.bf16 %v643_v8, %v642_v7 }
 0x131   :  { %v215_v16 = vadd.f32 %v1664_v13, %v2285_v37  ;;  %v209_v17 = vpop.f32.mrb[11].mxu0  ;;  %v289_v18 = vpop.f32.mrb[11].mxu1  ;;  %v295_v63 = vadd.f32 %v2313_v14, %v2285_v37 }
 0x132   :  { %v210_v19 = vadd.f32 %v2285_v37, %v209_v17  ;;  %1739 = vmatprep.mubr.f32.mxu1 %v326_v12  ;;  %v290_v57 = vadd.f32 %v2285_v37, %v289_v18  ;;  %1948 = vmatprep.subr.bf16.mxu0 %v1947_v9 }
 0x133   :  { %1740 = vmatmul.mubr.f32.gmra.mrb[24].mxu1 %v327_v15  ;;  %v329_v23 = vmax.f32 %v215_v16, 0.0  ;;  %v345_v1 = vmax.f32 %v295_v63, 0.0  ;;  %1950 = vmatpush3.bf16.msra.mxu0 %v1947_v9 }
 0x134   :  { %v328_v20 = vmax.f32 %v210_v19, 0.0  ;;  %v1667_v21 = vpop.f32.mrb[12].mxu0  ;;  %v1691_v22 = vpop.f32.mrb[12].mxu1  ;;  %v344_v54 = vmax.f32 %v290_v57, 0.0 }
 0x135   :  { %v225_v24 = vadd.f32 %v1667_v21, %v2285_v37  ;;  %v219_v25 = vpop.f32.mrb[13].mxu0  ;;  %v299_v26 = vpop.f32.mrb[13].mxu1  ;;  %v305_v2 = vadd.f32 %v1691_v22, %v2285_v37 }
 0x136   :  { %v220_v27 = vadd.f32 %v2285_v37, %v219_v25  ;;  %1742 = vmatprep.mubr.f32.mxu1 %v328_v20  ;;  %v300_v60 = vadd.f32 %v2285_v37, %v299_v26 }
 0x137   :  { %1743 = vmatmul.mubr.f32.gmra.mrb[26].mxu1 %v329_v23  ;;  %v331_v32 = vmax.f32 %v225_v24, 0.0  ;;  %v347_v4 = vmax.f32 %v305_v2, 0.0 }
 0x138   :  { %v330_v28 = vmax.f32 %v220_v27, 0.0  ;;  %v1670_v29 = vpop.f32.mrb[14].mxu0  ;;  %v1694_v31 = vpop.f32.mrb[14].mxu1  ;;  %v346_v62 = vmax.f32 %v300_v60, 0.0 }
 0x139   :  { %v235_v33 = vadd.f32 %v1670_v29, %v2285_v37  ;;  %v229_v34 = vpop.f32.mrb[15].mxu0  ;;  %v309_v35 = vpop.f32.mrb[15].mxu1  ;;  %v315_v5 = vadd.f32 %v1694_v31, %v2285_v37 }
 0x13a   :  { %v230_v36 = vadd.f32 %v2285_v37, %v229_v34  ;;  %1745 = vmatprep.mubr.f32.mxu1 %v330_v28  ;;  %v310_v0 = vadd.f32 %v2285_v37, %v309_v35 }
 0x13b   :  { %1746 = vmatmul.mubr.f32.gmra.mrb[28].mxu1 %v331_v32  ;;  %v333_v43 = vmax.f32 %v235_v33, 0.0  ;;  %v349_v6 = vmax.f32 %v315_v5, 0.0 }
 0x13c   :  { %v332_v38 = vmax.f32 %v230_v36, 0.0  ;;  %v348_v3 = vmax.f32 %v310_v0, 0.0 }
 0x13e   :  { %1748 = vmatprep.mubr.f32.mxu1 %v332_v38 }
 0x13f   :  { %1749 = vmatmul.mubr.f32.gmra.mrb[30].mxu1 %v333_v43 }
 0x140   :  { %1751 = vmatprep.mubr.f32.mxu1 %v334_v40 }
 0x143   :  { %1752 = vmatmul.mubr.f32.gmra.mrb[32].mxu1 %v335_v47 }
 0x144   :  { %1754 = vmatprep.mubr.f32.mxu1 %v336_v42 }
 0x147   :  { %1755 = vmatmul.mubr.f32.gmra.mrb[34].mxu1 %v337_v51 }
 0x148   :  { %1757 = vmatprep.mubr.f32.mxu1 %v338_v49 }
 0x14b   :  { %1758 = vmatmul.mubr.f32.gmra.mrb[36].mxu1 %v339_v55 }
 0x14c   :  { %1760 = vmatprep.mubr.f32.mxu1 %v340_v52 }
 0x14f   :  { %1761 = vmatmul.mubr.f32.gmra.mrb[38].mxu1 %v341_v58 }
 0x150   :  { %1763 = vmatprep.mubr.f32.mxu1 %v342_v46 }
 0x153   :  { %1764 = vmatmul.mubr.f32.gmra.mrb[40].mxu1 %v343_v61 }
 0x154   :  { %1766 = vmatprep.mubr.f32.mxu1 %v344_v54 }
 0x157   :  { %1767 = vmatmul.mubr.f32.gmra.mrb[42].mxu1 %v345_v1 }
 0x158   :  { %1769 = vmatprep.mubr.f32.mxu1 %v346_v62 }
 0x15b   :  { %1770 = vmatmul.mubr.f32.gmra.mrb[44].mxu1 %v347_v4 }
 0x15c   :  { %1772 = vmatprep.mubr.f32.mxu1 %v348_v3 }
 0x15f   :  { %1773 = vmatmul.mubr.f32.gmra.mrb[46].mxu1 %v349_v6 }
 0x1f6   :  { %v1729_v11 = vpop.f32.mrb[16].mxu1 }
 0x1f7   :  { %v443_v12 = vadd.f32 %v1729_v11, %v2346_v10  ;;  %v437_v13 = vpop.f32.mrb[17].mxu1 }
 0x1f8   :  { %v438_v14 = vadd.f32 %v2346_v10, %v437_v13 }
 0x1f9   :  { %v597_v37 = vmax.f32 %v443_v12, 0.0 }
 0x1fa   :  { %v596_v15 = vmax.f32 %v438_v14, 0.0  ;;  %v1732_v16 = vpop.f32.mrb[18].mxu1 }
 0x1fb   :  { %v453_v17 = vadd.f32 %v1732_v16, %v2346_v10  ;;  %v447_v18 = vpop.f32.mrb[19].mxu1 }
 0x1fc   :  { %v448_v19 = vadd.f32 %v2346_v10, %v447_v18  ;;  %1807 = vmatprep.mubr.f32.mxu0 %v596_v15 }
 0x1fd   :  { %1808 = vmatmul.mubr.f32.vlgmr.msra.gmra.mrb[16].mxu0 %v597_v37  ;;  %v599_v22 = vmax.f32 %v453_v17, 0.0 }
 0x1fe   :  { %v598_v20 = vmax.f32 %v448_v19, 0.0  ;;  %v1735_v21 = vpop.f32.mrb[20].mxu1 }
 0x1ff   :  { %v463_v23 = vadd.f32 %v1735_v21, %v2346_v10  ;;  %v457_v24 = vpop.f32.mrb[21].mxu1 }
 0x200   :  { %v458_v25 = vadd.f32 %v2346_v10, %v457_v24  ;;  %1810 = vmatprep.mubr.f32.mxu0 %v598_v20 }
 0x201   :  { %1811 = vmatmul.mubr.f32.gmra.mrb[18].mxu0 %v599_v22  ;;  %v601_v28 = vmax.f32 %v463_v23, 0.0 }
 0x202   :  { %v600_v26 = vmax.f32 %v458_v25, 0.0  ;;  %v1738_v27 = vpop.f32.mrb[22].mxu1 }
 0x203   :  { %v473_v29 = vadd.f32 %v1738_v27, %v2346_v10  ;;  %v467_v30 = vpop.f32.mrb[23].mxu1 }
 0x204   :  { %v468_v31 = vadd.f32 %v2346_v10, %v467_v30  ;;  %1813 = vmatprep.mubr.f32.mxu0 %v600_v26 }
 0x205   :  { %1814 = vmatmul.mubr.f32.gmra.mrb[20].mxu0 %v601_v28  ;;  %v603_v34 = vmax.f32 %v473_v29, 0.0 }
 0x206   :  { %v602_v32 = vmax.f32 %v468_v31, 0.0  ;;  %v1741_v33 = vpop.f32.mrb[24].mxu1 }
 0x207   :  { %v483_v35 = vadd.f32 %v1741_v33, %v2346_v10  ;;  %v477_v36 = vpop.f32.mrb[25].mxu1 }
 0x208   :  { %v478_v38 = vadd.f32 %v2346_v10, %v477_v36  ;;  %1816 = vmatprep.mubr.f32.mxu0 %v602_v32 }
 0x209   :  { %1817 = vmatmul.mubr.f32.gmra.mrb[22].mxu0 %v603_v34  ;;  %v605_v43 = vmax.f32 %v483_v35, 0.0 }
 0x20a   :  { %v604_v40 = vmax.f32 %v478_v38, 0.0  ;;  %v1744_v41 = vpop.f32.mrb[26].mxu1 }
 0x20b   :  { %v493_v44 = vadd.f32 %v1744_v41, %v2346_v10  ;;  %v487_v42 = vpop.f32.mrb[27].mxu1 }
 0x20c   :  { %v488_v45 = vadd.f32 %v2346_v10, %v487_v42  ;;  %1819 = vmatprep.mubr.f32.mxu0 %v604_v40 }
 0x20d   :  { %1820 = vmatmul.mubr.f32.gmra.mrb[24].mxu0 %v605_v43  ;;  %v607_v49 = vmax.f32 %v493_v44, 0.0 }
 0x20e   :  { %v606_v47 = vmax.f32 %v488_v45, 0.0  ;;  %v1747_v48 = vpop.f32.mrb[28].mxu1  ;;  %v2380_v45 = vld [vmem:[#allocation5 + $0x190] ss:$0 sm:$0xff] }
 0x20f   :  { %v503_v50 = vadd.f32 %v1747_v48, %v2346_v10  ;;  %v497_v51 = vpop.f32.mrb[29].mxu1 }
 0x210   :  { %v498_v39 = vadd.f32 %v2346_v10, %v497_v51  ;;  %1822 = vmatprep.mubr.f32.mxu0 %v606_v47 }
 0x211   :  { %1823 = vmatmul.mubr.f32.gmra.mrb[26].mxu0 %v607_v49  ;;  %v609_v55 = vmax.f32 %v503_v50, 0.0 }
 0x212   :  { %v608_v52 = vmax.f32 %v498_v39, 0.0  ;;  %v1750_v53 = vpop.f32.mrb[30].mxu1 }
 0x213   :  { %v513_v56 = vadd.f32 %v1750_v53, %v2346_v10  ;;  %v507_v46 = vpop.f32.mrb[31].mxu1 }
 0x214   :  { %v508_v57 = vadd.f32 %v2346_v10, %v507_v46  ;;  %1825 = vmatprep.mubr.f32.mxu0 %v608_v52 }
 0x215   :  { %1826 = vmatmul.mubr.f32.gmra.mrb[28].mxu0 %v609_v55  ;;  %v611_v54 = vmax.f32 %v513_v56, 0.0 }
 0x216   :  { %v610_v58 = vmax.f32 %v508_v57, 0.0  ;;  %v1753_v59 = vpop.f32.mrb[32].mxu1 }
 0x217   :  { %v523_v60 = vadd.f32 %v1753_v59, %v2346_v10  ;;  %v517_v61 = vpop.f32.mrb[33].mxu1 }
 0x218   :  { %v518_v63 = vadd.f32 %v2346_v10, %v517_v61  ;;  %1828 = vmatprep.mubr.f32.mxu0 %v610_v58 }
 0x219   :  { %1829 = vmatmul.mubr.f32.gmra.mrb[30].mxu0 %v611_v54  ;;  %v613_v1 = vmax.f32 %v523_v60, 0.0 }
 0x21a   :  { %v612_v62 = vmax.f32 %v518_v63, 0.0  ;;  %v1756_v0 = vpop.f32.mrb[34].mxu1 }
 0x21b   :  { %v533_v2 = vadd.f32 %v1756_v0, %v2346_v10  ;;  %v527_v3 = vpop.f32.mrb[35].mxu1 }
 0x21c   :  { %v528_v4 = vadd.f32 %v2346_v10, %v527_v3  ;;  %1831 = vmatprep.mubr.f32.mxu0 %v612_v62 }
 0x21d   :  { %1832 = vmatmul.mubr.f32.gmra.mrb[32].mxu0 %v613_v1  ;;  %v615_v7 = vmax.f32 %v533_v2, 0.0 }
 0x21e   :  { %v614_v5 = vmax.f32 %v528_v4, 0.0  ;;  %v1759_v6 = vpop.f32.mrb[36].mxu1 }
 0x21f   :  { %v543_v8 = vadd.f32 %v1759_v6, %v2346_v10  ;;  %v537_v9 = vpop.f32.mrb[37].mxu1 }
 0x220   :  { %v538_v11 = vadd.f32 %v2346_v10, %v537_v9  ;;  %1834 = vmatprep.mubr.f32.mxu0 %v614_v5 }
 0x221   :  { %1835 = vmatmul.mubr.f32.gmra.mrb[34].mxu0 %v615_v7  ;;  %v617_v14 = vmax.f32 %v543_v8, 0.0 }
 0x222   :  { %v616_v12 = vmax.f32 %v538_v11, 0.0  ;;  %v1762_v13 = vpop.f32.mrb[38].mxu1 }
 0x223   :  { %v553_v15 = vadd.f32 %v1762_v13, %v2346_v10  ;;  %v547_v16 = vpop.f32.mrb[39].mxu1 }
 0x224   :  { %v548_v37 = vadd.f32 %v2346_v10, %v547_v16  ;;  %1837 = vmatprep.mubr.f32.mxu0 %v616_v12 }
 0x225   :  { %1838 = vmatmul.mubr.f32.gmra.mrb[36].mxu0 %v617_v14  ;;  %v619_v19 = vmax.f32 %v553_v15, 0.0 }
 0x226   :  { %v618_v17 = vmax.f32 %v548_v37, 0.0  ;;  %v1765_v18 = vpop.f32.mrb[40].mxu1 }
 0x227   :  { %v563_v20 = vadd.f32 %v1765_v18, %v2346_v10  ;;  %v557_v21 = vpop.f32.mrb[41].mxu1 }
 0x228   :  { %v558_v22 = vadd.f32 %v2346_v10, %v557_v21  ;;  %1840 = vmatprep.mubr.f32.mxu0 %v618_v17 }
 0x229   :  { %1841 = vmatmul.mubr.f32.gmra.mrb[38].mxu0 %v619_v19  ;;  %v621_v25 = vmax.f32 %v563_v20, 0.0 }
 0x22a   :  { %v620_v23 = vmax.f32 %v558_v22, 0.0  ;;  %v1768_v24 = vpop.f32.mrb[42].mxu1 }
 0x22b   :  { %v573_v26 = vadd.f32 %v1768_v24, %v2346_v10  ;;  %v567_v27 = vpop.f32.mrb[43].mxu1 }
 0x22c   :  { %v568_v28 = vadd.f32 %v2346_v10, %v567_v27  ;;  %1843 = vmatprep.mubr.f32.mxu0 %v620_v23 }
 0x22d   :  { %1844 = vmatmul.mubr.f32.gmra.mrb[40].mxu0 %v621_v25  ;;  %v623_v31 = vmax.f32 %v573_v26, 0.0 }
 0x22e   :  { %v622_v29 = vmax.f32 %v568_v28, 0.0  ;;  %v1771_v30 = vpop.f32.mrb[44].mxu1 }
 0x22f   :  { %v583_v32 = vadd.f32 %v1771_v30, %v2346_v10  ;;  %v577_v33 = vpop.f32.mrb[45].mxu1 }
 0x230   :  { %v578_v34 = vadd.f32 %v2346_v10, %v577_v33  ;;  %1846 = vmatprep.mubr.f32.mxu0 %v622_v29 }
 0x231   :  { %1847 = vmatmul.mubr.f32.gmra.mrb[42].mxu0 %v623_v31  ;;  %v625_v38 = vmax.f32 %v583_v32, 0.0 }
 0x232   :  { %v624_v35 = vmax.f32 %v578_v34, 0.0  ;;  %v1774_v36 = vpop.f32.mrb[46].mxu1 }
 0x233   :  { %v593_v40 = vadd.f32 %v1774_v36, %v2346_v10  ;;  %v587_v41 = vpop.f32.mrb[47].mxu1 }
 0x234   :  { %v588_v43 = vadd.f32 %v2346_v10, %v587_v41  ;;  %1849 = vmatprep.mubr.f32.mxu0 %v624_v35 }
 0x235   :  { %1850 = vmatmul.mubr.f32.gmra.mrb[44].mxu0 %v625_v38  ;;  %v627_v42 = vmax.f32 %v593_v40, 0.0 }
 0x236   :  { %v626_v44 = vmax.f32 %v588_v43, 0.0 }
 0x238   :  { %1852 = vmatprep.mubr.f32.mxu0 %v626_v44 }
 0x239   :  { %1853 = vmatmul.mubr.f32.gmra.mrb[46].mxu0 %v627_v42 }
 0x2d0   :  { %v1809_v47 = vpop.f32.mrb[16].mxu0 }
 0x2d1   :  { %v2383_v48 = vadd.f32 %v1809_v47, %v2380_v45  ;;  %v715_v49 = vpop.f32.mrb[17].mxu0 }
 0x2d2   :  { %v2386_v50 = vadd.f32 %v2380_v45, %v715_v49 }
 0x2d3   :  { %1974 = vtanh.f32 %v2383_v48  ;;  %v971_v10 = vand.u32 2147483647, %v2383_v48  ;;  %v939_v25 = vmax.f32 %v2383_v48, 0.0 }
 0x2d4   :  { %1976 = vtanh.f32 %v2386_v50  ;;  %v970_v51 = vand.u32 2147483647, %v2386_v50  ;;  %v1812_v39 = vpop.f32.mrb[18].mxu0  ;;  %v938_v29 = vmax.f32 %v2386_v50, 0.0 }
 0x2d5   :  { %v1003_v52 = vsub.f32 0.0, %v971_v10  ;;  %v2393_v53 = vadd.f32 %v1812_v39, %v2380_v45  ;;  %v725_v55 = vpop.f32.mrb[19].mxu0 }
 0x2d6   :  { %v1002_v56 = vsub.f32 0.0, %v970_v51  ;;  %v2396_v46 = vadd.f32 %v2380_v45, %v725_v55 }
 0x2d7   :  { %v1036_v57 = vmul.f32 1.442695, %v1003_v52  ;;  %1978 = vtanh.f32 %v2393_v53  ;;  %v973_v58 = vand.u32 2147483647, %v2393_v53  ;;  %v941_v30 = vmax.f32 %v2393_v53, 0.0 }
 0x2d8   :  { %v1034_v59 = vmul.f32 1.442695, %v1002_v56  ;;  %1980 = vtanh.f32 %v2396_v46  ;;  %v972_v54 = vand.u32 2147483647, %v2396_v46  ;;  %v1815_v60 = vpop.f32.mrb[20].mxu0  ;;  %v940_v31 = vmax.f32 %v2396_v46, 0.0 }
 0x2d9   :  { %1982 = vpow2.f32 %v1036_v57  ;;  %v1005_v61 = vsub.f32 0.0, %v973_v58  ;;  %v2403_v63 = vadd.f32 %v1815_v60, %v2380_v45  ;;  %v735_v62 = vpop.f32.mrb[21].mxu0 }
 0x2da   :  { %1984 = vpow2.f32 %v1034_v59  ;;  %v1004_v0 = vsub.f32 0.0, %v972_v54  ;;  %v2406_v1 = vadd.f32 %v2380_v45, %v735_v62 }
 0x2db   :  { %v1040_v2 = vmul.f32 1.442695, %v1005_v61  ;;  %1986 = vtanh.f32 %v2403_v63  ;;  %v975_v3 = vand.u32 2147483647, %v2403_v63  ;;  %v943_v41 = vmax.f32 %v2403_v63, 0.0 }
 0x2dc   :  { %v1038_v4 = vmul.f32 1.442695, %v1004_v0  ;;  %1988 = vtanh.f32 %v2406_v1  ;;  %v974_v5 = vand.u32 2147483647, %v2406_v1  ;;  %v1818_v6 = vpop.f32.mrb[22].mxu0  ;;  %v942_v55 = vmax.f32 %v2406_v1, 0.0 }
 0x2dd   :  { %v1975_v7 = vpop.eup %1974  ;;  %1990 = vpow2.f32 %v1040_v2  ;;  %v1007_v8 = vsub.f32 0.0, %v975_v3  ;;  %v2413_v9 = vadd.f32 %v1818_v6, %v2380_v45  ;;  %v745_v11 = vpop.f32.mrb[23].mxu0 }
 0x2de   :  { %v1977_v12 = vpop.eup %1976  ;;  %907 = vst [vmem:[#allocation7 + $0x10] sm:$0xff] %v1975_v7  ;;  %1992 = vpow2.f32 %v1038_v4  ;;  %v1006_v13 = vsub.f32 0.0, %v974_v5  ;;  %v2416_v14 = vadd.f32 %v2380_v45, %v745_v11 }
 0x2df   :  { %906 = vst [vmem:[#allocation7] sm:$0xff] %v1977_v12  ;;  %v1044_v15 = vmul.f32 1.442695, %v1007_v8  ;;  %1994 = vtanh.f32 %v2413_v9  ;;  %v977_v16 = vand.u32 2147483647, %v2413_v9  ;;  %v945_v56 = vmax.f32 %v2413_v9, 0.0 }
 0x2e0   :  { %v1042_v37 = vmul.f32 1.442695, %v1006_v13  ;;  %1996 = vtanh.f32 %v2416_v14  ;;  %v1821_v17 = vpop.f32.mrb[24].mxu0  ;;  %v976_v23 = vand.u32 2147483647, %v2416_v14 }
 0x2e1   :  { %v1979_v18 = vpop.eup %1978  ;;  %1998 = vpow2.f32 %v1044_v15  ;;  %v1009_v19 = vsub.f32 0.0, %v977_v16  ;;  %v2422_v20 = vadd.f32 %v1821_v17, %v2380_v45  ;;  %v755_v21 = vpop.f32.mrb[25].mxu0 }
 0x2e2   :  { %v1981_v22 = vpop.eup %1980  ;;  %909 = vst [vmem:[#allocation7 + $0x30] sm:$0xff] %v1979_v18  ;;  %2000 = vpow2.f32 %v1042_v37  ;;  %v1008_v43 = vsub.f32 0.0, %v976_v23  ;;  %v2435_v10 = vadd.f32 %v2380_v45, %v755_v21 }
 0x2e3   :  { %v1983_v24 = vpop.eup %1982  ;;  %908 = vst [vmem:[#allocation7 + $0x20] sm:$0xff] %v1981_v22  ;;  %v1048_v26 = vmul.f32 1.442695, %v1009_v19  ;;  %2002 = vtanh.f32 %v2422_v20  ;;  %v979_v49 = vand.u32 2147483647, %v2422_v20 }
 0x2e4   :  { %v1985_v27 = vpop.eup %1984  ;;  %v1107_v28 = vadd.f32 1.0, %v1983_v24  ;;  %v1110_v33 = vmul.f32 -0.5, %v1983_v24  ;;  %v1824_v36 = vpop.f32.mrb[26].mxu0  ;;  %v1113_v40 = vand.u32 2147483647, %v1983_v24 }
 0x2e5   :  { %v1987_v32 = vpop.eup %1986  ;;  %v1098_v34 = vadd.f32 1.0, %v1985_v27  ;;  %v1101_v35 = vmul.f32 -0.5, %v1985_v27  ;;  %2004 = vpow2.f32 %v1048_v26  ;;  %v2431_v44 = vpop.f32.mrb[27].mxu0  ;;  %v1104_v47 = vand.u32 2147483647, %v1985_v27 }
 0x2e6   :  { %v1989_v38 = vpop.eup %1988  ;;  %2006 = vlog2.f32 %v1107_v28  ;;  %911 = vst [vmem:[#allocation7 + $0x50] sm:$0xff] %v1987_v32  ;;  %v1111_v59 = vadd.f32 1.0, %v1110_v33  ;;  %vm2443_vm0 = vcmp.lt.f32.partialorder %v1113_v40, 0.0004427343  ;;  %v1046_v4 = vmul.f32 1.442695, %v1008_v43 }
 0x2e7   :  { %v1991_v42 = vpop.eup %1990  ;;  %2008 = vlog2.f32 %v1098_v34  ;;  %910 = vst [vmem:[#allocation7 + $0x40] sm:$0xff] %v1989_v38  ;;  %v1102_v54 = vadd.f32 1.0, %v1101_v35  ;;  %vm2447_vm1 = vcmp.lt.f32.partialorder %v1104_v47, 0.0004427343  ;;  %v1011_v7 = vsub.f32 0.0, %v979_v49 }
 0x2e8   :  { %v1993_v51 = vpop.eup %1992  ;;  %v1125_v39 = vadd.f32 1.0, %v1991_v42  ;;  %v1128_v52 = vmul.f32 -0.5, %v1991_v42  ;;  %v2439_v57 = vpop.f32.mrb[28].mxu0  ;;  %v1131_v3 = vand.u32 2147483647, %v1991_v42  ;;  %v1112_v18 = vmul.f32 %v1983_v24, %v1111_v59 }
 0x2e9   :  { %v1995_v58 = vpop.eup %1994  ;;  %v1116_v60 = vadd.f32 1.0, %v1993_v51  ;;  %v1119_v61 = vmul.f32 -0.5, %v1993_v51  ;;  %v2441_v62 = vpop.f32.mrb[29].mxu0  ;;  %v978_v8 = vand.u32 2147483647, %v2435_v10  ;;  %v1103_v19 = vmul.f32 %v1985_v27, %v1102_v54 }
 0x2ea   :  { %v1997_v0 = vpop.eup %1996  ;;  %2010 = vlog2.f32 %v1125_v39  ;;  %913 = vst [vmem:[#allocation7 + $0x70] sm:$0xff] %v1995_v58  ;;  %v1129_v12 = vadd.f32 1.0, %v1128_v52  ;;  %v1122_v13 = vand.u32 2147483647, %v1993_v51  ;;  %vm2459_vm2 = vcmp.lt.f32.partialorder %v1131_v3, 0.0004427343 }
 0x2eb   :  { %v1999_v5 = vpop.eup %1998  ;;  %2012 = vlog2.f32 %v1116_v60  ;;  %912 = vst [vmem:[#allocation7 + $0x60] sm:$0xff] %v1997_v0  ;;  %v1120_v21 = vadd.f32 1.0, %v1119_v61  ;;  %v1010_v33 = vsub.f32 0.0, %v978_v8  ;;  %v1052_v24 = vmul.f32 1.442695, %v1011_v7 }
 0x2ec   :  { %v2452_v11 = vpop.eup %2000  ;;  %v1143_v15 = vadd.f32 1.0, %v1999_v5  ;;  %v1146_v16 = vmul.f32 -0.5, %v1999_v5  ;;  %v2454_v37 = vpop.f32.mrb[30].mxu0  ;;  %v1149_v28 = vand.u32 2147483647, %v1999_v5  ;;  %v2467_v27 = vadd.f32 %v1824_v36, %v2380_v45 }
 0x2ed   :  { %v2003_v17 = vpop.eup %2002  ;;  %v1134_v22 = vadd.f32 1.0, %v2452_v11  ;;  %v2457_v23 = vpop.f32.mrb[31].mxu0  ;;  %v1137_v32 = vmul.f32 -0.5, %v2452_v11  ;;  %v1130_v40 = vmul.f32 %v1991_v42, %v1129_v12  ;;  %vm2469_vm3 = vcmp.lt.f32.partialorder %v1122_v13, 0.0004427343 }
 0x2ee   :  { %2014 = vlog2.f32 %v1143_v15  ;;  %915 = vst [vmem:[#allocation7 + $0x90] sm:$0xff] %v2003_v17  ;;  %v1147_v35 = vadd.f32 1.0, %v1146_v16  ;;  %v1140_v47 = vand.u32 2147483647, %v2452_v11  ;;  %v1121_v59 = vmul.f32 %v1993_v51, %v1120_v21 }
 0x2ef   :  { %v2464_v34 = vpop.eup %2004  ;;  %2016 = vlog2.f32 %v1134_v22  ;;  %v1050_v54 = vmul.f32 1.442695, %v1010_v33  ;;  %vm2479_vm4 = vcmp.lt.f32.partialorder %v1149_v28, 0.0004427343  ;;  %v1138_v61 = vadd.f32 1.0, %v1137_v32 }
 0x2f0   :  { %v2007_v38 = vpop.eup %2006  ;;  %v1161_v49 = vadd.f32 1.0, %v2464_v34  ;;  %v2475_v39 = vpop.f32.mrb[32].mxu0  ;;  %2018 = vpow2.f32 %v1046_v4  ;;  %v1148_v3 = vmul.f32 %v1999_v5, %v1147_v35  ;;  %v981_v7 = vand.u32 2147483647, %v2467_v27 }
 0x2f1   :  { %v2009_v52 = vpop.eup %2008  ;;  %v1109_v58 = vmul.f32 0.6931472, %v2007_v38  ;;  %v2477_v60 = vpop.f32.mrb[33].mxu0  ;;  %v1164_v12 = vmul.f32 -0.5, %v2464_v34  ;;  %v2505_v6 = vadd.f32 %v2439_v57, %v2380_v45  ;;  %vm1141_vm5 = vcmp.lt.f32.partialorder %v1140_v47, 0.0004427343 }
 0x2f2   :  { %v1100_v36 = vmul.f32 0.6931472, %v2009_v52  ;;  %2020 = vlog2.f32 %v1161_v49  ;;  %v1013_v16 = vsub.f32 0.0, %v981_v7 }
 0x2f3   :  { %v1115_v0 = vsel %vm2443_vm0, %v1112_v18, %v1109_v58  ;;  %2022 = vpow2.f32 %v1052_v24  ;;  %v1165_v57 = vadd.f32 1.0, %v1164_v12  ;;  %v947_v12 = vmax.f32 %v2422_v20, 0.0 }
 0x2f4   :  { %v2011_v8 = vpop.eup %2010  ;;  %v1387_v51 = vadd.f32 %v1115_v0, %v939_v25  ;;  %v1106_v4 = vsel %vm2447_vm1, %v1103_v19, %v1100_v36  ;;  %2024 = vtanh.f32 %v2435_v10  ;;  %v2492_v13 = vpop.f32.mrb[34].mxu0  ;;  %v2501_v25 = vadd.f32 %v2380_v45, %v2431_v44 }
 0x2f5   :  { %v2013_v15 = vpop.eup %2012  ;;  %v1386_v2 = vadd.f32 %v1106_v4, %v938_v29  ;;  %v1127_v5 = vmul.f32 0.6931472, %v2011_v8  ;;  %2026 = vpow2.f32 %v1050_v54  ;;  %v2496_v17 = vpop.f32.mrb[35].mxu0  ;;  %v1167_v29 = vand.u32 2147483647, %v2464_v34 }
 0x2f6   :  { %1419 = vst [vmem:[#allocation7 + $0x18] sm:$0xff] %v1387_v51  ;;  %v1118_v48 = vmul.f32 0.6931472, %v2013_v15  ;;  %2028 = vtanh.f32 %v2467_v27  ;;  %v1056_v18 = vmul.f32 1.442695, %v1013_v16  ;;  %v2512_v19 = vadd.f32 %v2380_v45, %v2441_v62 }
 0x2f7   :  { %1418 = vst [vmem:[#allocation7 + $0x8] sm:$0xff] %v1386_v2  ;;  %v1133_v50 = vsel %vm2459_vm2, %v1130_v40, %v1127_v5  ;;  %2030 = vtanh.f32 %v2501_v25  ;;  %v980_v62 = vand.u32 2147483647, %v2501_v25  ;;  %vm2530_vm6 = vcmp.lt.f32.partialorder %v1167_v29, 0.0004427343 }
 0x2f8   :  { %v2015_v21 = vpop.eup %2014  ;;  %v1389_v44 = vadd.f32 %v1133_v50, %v941_v30  ;;  %v1124_v22 = vsel %vm2469_vm3, %v1121_v59, %v1118_v48  ;;  %v2519_v28 = vpop.f32.mrb[36].mxu0  ;;  %2032 = vpow2.f32 %v1056_v18  ;;  %v1139_v30 = vmul.f32 %v2452_v11, %v1138_v61 }
 0x2f9   :  { %v2017_v26 = vpop.eup %2016  ;;  %v1388_v32 = vadd.f32 %v1124_v22, %v940_v31  ;;  %v1145_v33 = vmul.f32 0.6931472, %v2015_v21  ;;  %v2524_v35 = vpop.f32.mrb[37].mxu0  ;;  %2034 = vtanh.f32 %v2505_v6  ;;  %v1012_v31 = vsub.f32 0.0, %v980_v62 }
 0x2fa   :  { %1421 = vst [vmem:[#allocation7 + $0x38] sm:$0xff] %v1389_v44  ;;  %v1136_v53 = vmul.f32 0.6931472, %v2017_v26  ;;  %v2019_v24 = vpop.eup %2018  ;;  %2036 = vtanh.f32 %v2512_v19  ;;  %v1166_v47 = vmul.f32 %v2464_v34, %v1165_v57  ;;  %v2548_v34 = vadd.f32 %v2454_v37, %v2380_v45 }
 0x2fb   :  { %1420 = vst [vmem:[#allocation7 + $0x28] sm:$0xff] %v1388_v32  ;;  %v1151_v38 = vsel %vm2479_vm4, %v1148_v3, %v1145_v33  ;;  %v1152_v49 = vadd.f32 1.0, %v2019_v24  ;;  %v1155_v36 = vmul.f32 -0.5, %v2019_v24  ;;  %v1054_v42 = vmul.f32 1.442695, %v1012_v31 }
 0x2fc   :  { %v2021_v40 = vpop.eup %2020  ;;  %v1391_v43 = vadd.f32 %v1151_v38, %v943_v41  ;;  %v1142_v11 = vsel %vm1141_vm5, %v1139_v30, %v1136_v53  ;;  %v2538_v52 = vpop.f32.mrb[38].mxu0  ;;  %v983_v41 = vand.u32 2147483647, %v2505_v6  ;;  %v1158_v8 = vand.u32 2147483647, %v2019_v24 }
 0x2fd   :  { %v2540_v58 = vpop.eup %2022  ;;  %v1390_v59 = vadd.f32 %v1142_v11, %v942_v55  ;;  %v1163_v54 = vmul.f32 0.6931472, %v2021_v40  ;;  %2038 = vlog2.f32 %v1152_v49  ;;  %v2550_v0 = vpop.f32.mrb[39].mxu0  ;;  %v944_v37 = vmax.f32 %v2416_v14, 0.0 }
 0x2fe   :  { %v2025_v61 = vpop.eup %2024  ;;  %1423 = vst [vmem:[#allocation7 + $0x58] sm:$0xff] %v1391_v43  ;;  %v1179_v63 = vadd.f32 1.0, %v2540_v58  ;;  %2040 = vpow2.f32 %v1054_v42  ;;  %v1156_v4 = vadd.f32 1.0, %v1155_v36  ;;  %v1182_v5 = vmul.f32 -0.5, %v2540_v58 }
 0x2ff   :  { %v2552_v3 = vpop.eup %2026  ;;  %1422 = vst [vmem:[#allocation7 + $0x48] sm:$0xff] %v1390_v59  ;;  %v1169_v1 = vsel %vm2530_vm6, %v1166_v47, %v1163_v54  ;;  %914 = vst [vmem:[#allocation7 + $0x80] sm:$0xff] %v2025_v61  ;;  %v1015_v16 = vsub.f32 0.0, %v983_v41  ;;  %v982_v9 = vand.u32 2147483647, %v2512_v19  ;;  %v946_v50 = vmax.f32 %v2435_v10, 0.0 }
 0x300   :  { %v2029_v55 = vpop.eup %2028  ;;  %v1393_v7 = vadd.f32 %v1169_v1, %v945_v56  ;;  %2042 = vlog2.f32 %v1179_v63  ;;  %v2558_v51 = vpop.f32.mrb[40].mxu0  ;;  %v1170_v15 = vadd.f32 1.0, %v2552_v3  ;;  %v1185_v14 = vand.u32 2147483647, %v2540_v58 }
 0x301   :  { %917 = vst [vmem:[#allocation7 + $0xb0] sm:$0xff] %v2029_v55  ;;  %v2031_v2 = vpop.eup %2030  ;;  %2044 = vtanh.f32 %v2548_v34  ;;  %v2566_v56 = vpop.f32.mrb[41].mxu0  ;;  %v949_v29 = vmax.f32 %v2467_v27, 0.0  ;;  %vm2573_vm7 = vcmp.lt.f32.partialorder %v1158_v8, 0.0004427343  ;;  %v948_v22 = vmax.f32 %v2501_v25, 0.0 }
 0x302   :  { %1425 = vst [vmem:[#allocation7 + $0x78] sm:$0xff] %v1393_v7  ;;  %v2568_v48 = vpop.eup %2032  ;;  %2046 = vlog2.f32 %v1170_v15  ;;  %916 = vst [vmem:[#allocation7 + $0xa0] sm:$0xff] %v2031_v2  ;;  %v1060_v57 = vmul.f32 1.442695, %v1015_v16  ;;  %v1157_v32 = vmul.f32 %v2019_v24, %v1156_v4  ;;  %v1014_v33 = vsub.f32 0.0, %v982_v9 }
 0x303   :  { %v2035_v18 = vpop.eup %2034  ;;  %v1197_v44 = vadd.f32 1.0, %v2568_v48  ;;  %v985_v62 = vand.u32 2147483647, %v2548_v34  ;;  %v2582_v53 = vadd.f32 %v2380_v45, %v2457_v23  ;;  %v1183_v38 = vadd.f32 1.0, %v1182_v5 }
 0x304   :  { %v2037_v26 = vpop.eup %2036  ;;  %919 = vst [vmem:[#allocation7 + $0xd0] sm:$0xff] %v2035_v18  ;;  %v2584_v30 = vpop.f32.mrb[42].mxu0  ;;  %v1173_v46 = vmul.f32 -0.5, %v2552_v3  ;;  %v2589_v31 = vadd.f32 %v2475_v39, %v2380_v45  ;;  %vm2593_vm8 = vcmp.lt.f32.partialorder %v1185_v14, 0.0004427343  ;;  %v1200_v49 = vmul.f32 -0.5, %v2568_v48 }
 0x305   :  { %2048 = vlog2.f32 %v1197_v44  ;;  %918 = vst [vmem:[#allocation7 + $0xc0] sm:$0xff] %v2037_v26  ;;  %v2591_v24 = vpop.f32.mrb[43].mxu0  ;;  %v1058_v23 = vmul.f32 1.442695, %v1014_v33  ;;  %v1017_v43 = vsub.f32 0.0, %v985_v62  ;;  %v1184_v41 = vmul.f32 %v2540_v58, %v1183_v38 }
 0x306   :  { %2050 = vpow2.f32 %v1060_v57  ;;  %v1176_v47 = vand.u32 2147483647, %v2552_v3  ;;  %v984_v59 = vand.u32 2147483647, %v2582_v53  ;;  %v987_v61 = vand.u32 2147483647, %v2589_v31 }
 0x307   :  { %v2039_v11 = vpop.eup %2038  ;;  %2052 = vtanh.f32 %v2582_v53  ;;  %v1064_v42 = vmul.f32 1.442695, %v1017_v43  ;;  %v1174_v1 = vadd.f32 1.0, %v1173_v46  ;;  %v1201_v9 = vadd.f32 1.0, %v1200_v49 }
 0x308   :  { %v2601_v39 = vpop.f32.mrb[44].mxu0  ;;  %v2603_v54 = vpop.eup %2040  ;;  %v1154_v36 = vmul.f32 0.6931472, %v2039_v11  ;;  %2054 = vpow2.f32 %v1058_v23  ;;  %v1016_v7 = vsub.f32 0.0, %v984_v59  ;;  %v1019_v2 = vsub.f32 0.0, %v987_v61 }
 0x309   :  { %v1188_v55 = vadd.f32 1.0, %v2603_v54  ;;  %v2608_v8 = vpop.f32.mrb[45].mxu0  ;;  %2056 = vpow2.f32 %v1064_v42  ;;  %v1203_v14 = vand.u32 2147483647, %v2568_v48  ;;  %v1175_v33 = vmul.f32 %v2552_v3, %v1174_v1 }
 0x30a   :  { %v2043_v63 = vpop.eup %2042  ;;  %v1160_v4 = vsel %vm2573_vm7, %v1157_v32, %v1154_v36  ;;  %v1062_v57 = vmul.f32 1.442695, %v1016_v7  ;;  %v1068_v21 = vmul.f32 1.442695, %v1019_v2  ;;  %v2625_v62 = vadd.f32 %v2380_v45, %v2477_v60 }
 0x30b   :  { %v1181_v15 = vmul.f32 0.6931472, %v2043_v63  ;;  %v2045_v5 = vpop.eup %2044  ;;  %v1392_v16 = vadd.f32 %v1160_v4, %v944_v37  ;;  %2058 = vlog2.f32 %v1188_v55  ;;  %vm1177_vm9 = vcmp.lt.f32.partialorder %v1176_v47, 0.0004427343 }
 0x30c   :  { %v2613_v18 = vpop.f32.mrb[46].mxu0  ;;  %v2047_v58 = vpop.eup %2046  ;;  %921 = vst [vmem:[#allocation7 + $0xf0] sm:$0xff] %v2045_v5  ;;  %2060 = vtanh.f32 %v2589_v31  ;;  %v1191_v38 = vmul.f32 -0.5, %v2603_v54  ;;  %v2630_v46 = vadd.f32 %v2492_v13, %v2380_v45  ;;  %v951_v20 = vmax.f32 %v2505_v6, 0.0 }
 0x30d   :  { %v1187_v44 = vsel %vm2593_vm8, %v1184_v41, %v1181_v15  ;;  %v2618_v26 = vpop.f32.mrb[47].mxu0  ;;  %1424 = vst [vmem:[#allocation7 + $0x68] sm:$0xff] %v1392_v16  ;;  %v1172_v32 = vmul.f32 0.6931472, %v2047_v58  ;;  %2062 = vpow2.f32 %v1062_v57  ;;  %v986_v3 = vand.u32 2147483647, %v2625_v62 }
 0x30e   :  { %v1395_v37 = vadd.f32 %v1187_v44, %v947_v12  ;;  %2064 = vpow2.f32 %v1068_v21  ;;  %v1202_v11 = vmul.f32 %v2568_v48, %v1201_v9  ;;  %vm1204_vm10 = vcmp.lt.f32.partialorder %v1203_v14, 0.0004427343 }
 0x30f   :  { %v2049_v40 = vpop.eup %2048  ;;  %v1178_v23 = vsel %vm1177_vm9, %v1175_v33, %v1172_v32  ;;  %2066 = vtanh.f32 %v2625_v62  ;;  %v1194_v13 = vand.u32 2147483647, %v2603_v54  ;;  %v1018_v59 = vsub.f32 0.0, %v986_v3 }
 0x310   :  { %1427 = vst [vmem:[#allocation7 + $0x98] sm:$0xff] %v1395_v37  ;;  %v2051_v12 = vpop.eup %2050  ;;  %v1394_v60 = vadd.f32 %v1178_v23, %v946_v50  ;;  %v1199_v43 = vmul.f32 0.6931472, %v2049_v40  ;;  %v1192_v61 = vadd.f32 1.0, %v1191_v38  ;;  %v950_v63 = vmax.f32 %v2512_v19, 0.0 }
 0x311   :  { %v2053_v47 = vpop.eup %2052  ;;  %v1215_v49 = vadd.f32 1.0, %v2051_v12  ;;  %2068 = vtanh.f32 %v2630_v46  ;;  %v1218_v48 = vmul.f32 -0.5, %v2051_v12  ;;  %v989_v50 = vand.u32 2147483647, %v2630_v46 }
 0x312   :  { %v2055_v36 = vpop.eup %2054  ;;  %1426 = vst [vmem:[#allocation7 + $0x88] sm:$0xff] %v1394_v60  ;;  %v1205_v42 = vsel %vm1204_vm10, %v1202_v11, %v1199_v43  ;;  %920 = vst [vmem:[#allocation7 + $0xe0] sm:$0xff] %v2053_v47  ;;  %v953_v55 = vmax.f32 %v2548_v34, 0.0  ;;  %v1066_v7 = vmul.f32 1.442695, %v1018_v59  ;;  %v2647_v4 = vadd.f32 %v2380_v45, %v2496_v17 }
 0x313   :  { %v1397_v10 = vadd.f32 %v1205_v42, %v949_v29  ;;  %2070 = vlog2.f32 %v1215_v49  ;;  %v2057_v41 = vpop.eup %2056  ;;  %v1206_v1 = vadd.f32 1.0, %v2055_v36  ;;  %vm2649_vm11 = vcmp.lt.f32.partialorder %v1194_v13, 0.0004427343 }
 0x314   :  { %v1209_v27 = vmul.f32 -0.5, %v2055_v36  ;;  %v1233_v29 = vadd.f32 1.0, %v2057_v41  ;;  %v1236_v5 = vmul.f32 -0.5, %v2057_v41  ;;  %v1193_v14 = vmul.f32 %v2603_v54, %v1192_v61 }
 0x315   :  { %v2059_v15 = vpop.eup %2058  ;;  %1429 = vst [vmem:[#allocation7 + $0xb8] sm:$0xff] %v1397_v10  ;;  %v1221_v58 = vand.u32 2147483647, %v2051_v12  ;;  %2072 = vlog2.f32 %v1206_v1  ;;  %v1219_v44 = vadd.f32 1.0, %v1218_v48  ;;  %v1212_v57 = vand.u32 2147483647, %v2055_v36 }
 0x316   :  { %v2061_v16 = vpop.eup %2060  ;;  %v1190_v9 = vmul.f32 0.6931472, %v2059_v15  ;;  %2074 = vlog2.f32 %v1233_v29  ;;  %v1021_v17 = vsub.f32 0.0, %v989_v50  ;;  %v1239_v32 = vand.u32 2147483647, %v2057_v41 }
 0x317   :  { %923 = vst [vmem:[#allocation7 + $0x110] sm:$0xff] %v2061_v16  ;;  %v2654_v21 = vpop.eup %2062  ;;  %2076 = vpow2.f32 %v1066_v7  ;;  %v988_v33 = vand.u32 2147483647, %v2647_v4  ;;  %v1210_v40 = vadd.f32 1.0, %v1209_v27  ;;  %v1237_v23 = vadd.f32 1.0, %v1236_v5 }
 0x318   :  { %v1196_v37 = vsel %vm2649_vm11, %v1193_v14, %v1190_v9  ;;  %v2659_v38 = vpop.eup %2064  ;;  %v1224_v3 = vadd.f32 1.0, %v2654_v21  ;;  %vm2664_vm12 = vcmp.lt.f32.partialorder %v1221_v58, 0.0004427343  ;;  %v952_v11 = vmax.f32 %v2582_v53, 0.0 }
 0x319   :  { %v1396_v54 = vadd.f32 %v1196_v37, %v948_v22  ;;  %v2067_v60 = vpop.eup %2066  ;;  %v1251_v47 = vadd.f32 1.0, %v2659_v38  ;;  %v2672_v13 = vadd.f32 %v2519_v28, %v2380_v45  ;;  %v1220_v25 = vmul.f32 %v2051_v12, %v1219_v44 }
 0x31a   :  { %2078 = vlog2.f32 %v1224_v3  ;;  %922 = vst [vmem:[#allocation7 + $0x100] sm:$0xff] %v2067_v60  ;;  %v1072_v22 = vmul.f32 1.442695, %v1021_v17  ;;  %v1020_v49 = vsub.f32 0.0, %v988_v33  ;;  %vm2674_vm13 = vcmp.lt.f32.partialorder %v1212_v57, 0.0004427343 }
 0x31b   :  { %1428 = vst [vmem:[#allocation7 + $0xa8] sm:$0xff] %v1396_v54  ;;  %v2069_v59 = vpop.eup %2068  ;;  %vm2678_vm14 = vcmp.lt.f32.partialorder %v1239_v32, 0.0004427343  ;;  %v1227_v10 = vmul.f32 -0.5, %v2654_v21  ;;  %2080 = vlog2.f32 %v1251_v47  ;;  %v1211_v48 = vmul.f32 %v2055_v36, %v1210_v40 }
 0x31c   :  { %v1238_v50 = vmul.f32 %v2057_v41, %v1237_v23  ;;  %925 = vst [vmem:[#allocation7 + $0x130] sm:$0xff] %v2069_v59  ;;  %2082 = vpow2.f32 %v1072_v22  ;;  %v1070_v12 = vmul.f32 1.442695, %v1020_v49  ;;  %v1230_v7 = vand.u32 2147483647, %v2654_v21 }
 0x31d   :  { %v2071_v28 = vpop.eup %2070  ;;  %2084 = vtanh.f32 %v2647_v4  ;;  %v991_v15 = vand.u32 2147483647, %v2672_v13  ;;  %v1254_v2 = vmul.f32 -0.5, %v2659_v38  ;;  %v2689_v27 = vadd.f32 %v2380_v45, %v2524_v35 }
 0x31e   :  { %v1217_v1 = vmul.f32 0.6931472, %v2071_v28  ;;  %2086 = vpow2.f32 %v1070_v12  ;;  %v2693_v36 = vadd.f32 %v2538_v52, %v2380_v45  ;;  %v1228_v5 = vadd.f32 1.0, %v1227_v10 }
 0x31f   :  { %v2073_v41 = vpop.eup %2072  ;;  %2088 = vtanh.f32 %v2672_v13  ;;  %v1023_v16 = vsub.f32 0.0, %v991_v15  ;;  %v2703_v35 = vadd.f32 %v2380_v45, %v2550_v0  ;;  %v990_v17 = vand.u32 2147483647, %v2689_v27 }
 0x320   :  { %v1223_v29 = vsel %vm2664_vm12, %v1220_v25, %v1217_v1  ;;  %v2075_v9 = vpop.eup %2074  ;;  %v1208_v58 = vmul.f32 0.6931472, %v2073_v41  ;;  %2090 = vtanh.f32 %v2689_v27  ;;  %v1257_v37 = vand.u32 2147483647, %v2659_v38 }
 0x321   :  { %v1399_v14 = vadd.f32 %v1223_v29, %v951_v20  ;;  %v2705_v52 = vpop.eup %2076  ;;  %v1235_v44 = vmul.f32 0.6931472, %v2075_v9  ;;  %v1076_v57 = vmul.f32 1.442695, %v1023_v16  ;;  %2092 = vtanh.f32 %v2693_v36 }
 0x322   :  { %v1214_v6 = vsel %vm2674_vm13, %v1211_v48, %v1208_v58  ;;  %v1255_v20 = vadd.f32 1.0, %v1254_v2  ;;  %v1242_v32 = vadd.f32 1.0, %v2705_v52  ;;  %v1022_v54 = vsub.f32 0.0, %v990_v17 }
 0x323   :  { %1431 = vst [vmem:[#allocation7 + $0xd8] sm:$0xff] %v1399_v14  ;;  %v1398_v0 = vadd.f32 %v1214_v6, %v950_v63  ;;  %v1241_v33 = vsel %vm2678_vm14, %v1238_v50, %v1235_v44  ;;  %2094 = vpow2.f32 %v1076_v57  ;;  %v1229_v3 = vmul.f32 %v2654_v21, %v1228_v5 }
 0x324   :  { %v2079_v40 = vpop.eup %2078  ;;  %v1401_v23 = vadd.f32 %v1241_v33, %v953_v55  ;;  %v955_v60 = vmax.f32 %v2589_v31, 0.0  ;;  %2096 = vlog2.f32 %v1242_v32  ;;  %v1245_v19 = vmul.f32 -0.5, %v2705_v52 }
 0x325   :  { %v2081_v43 = vpop.eup %2080  ;;  %1430 = vst [vmem:[#allocation7 + $0xc8] sm:$0xff] %v1398_v0  ;;  %v1226_v47 = vmul.f32 0.6931472, %v2079_v40  ;;  %v1074_v63 = vmul.f32 1.442695, %v1022_v54  ;;  %2098 = vtanh.f32 %v2703_v35  ;;  %v1256_v34 = vmul.f32 %v2659_v38, %v1255_v20 }
 0x326   :  { %v2723_v25 = vpop.eup %2082  ;;  %1433 = vst [vmem:[#allocation7 + $0xf8] sm:$0xff] %v1401_v23  ;;  %vm1231_vm15 = vcmp.lt.f32.partialorder %v1230_v7, 0.0004427343  ;;  %v1253_v22 = vmul.f32 0.6931472, %v2081_v43  ;;  %v2730_v59 = vadd.f32 %v2558_v51, %v2380_v45  ;;  %v1246_v50 = vadd.f32 1.0, %v1245_v19 }
 0x327   :  { %v993_v55 = vand.u32 2147483647, %v2693_v36  ;;  %v2085_v21 = vpop.eup %2084  ;;  %v1232_v31 = vsel %vm1231_vm15, %v1229_v3, %v1226_v47  ;;  %vm1258_vm0 = vcmp.lt.f32.partialorder %v1257_v37, 0.0004427343  ;;  %v1269_v49 = vadd.f32 1.0, %v2723_v25 }
 0x328   :  { %v2732_v42 = vpop.eup %2086  ;;  %v1400_v61 = vadd.f32 %v1232_v31, %v952_v11  ;;  %v1259_v10 = vsel %vm1258_vm0, %v1256_v34, %v1253_v22  ;;  %924 = vst [vmem:[#allocation7 + $0x120] sm:$0xff] %v2085_v21  ;;  %2100 = vpow2.f32 %v1074_v63  ;;  %v1272_v1 = vmul.f32 -0.5, %v2723_v25  ;;  %v2769_v22 = vld [vmem:[#allocation5 + $0x190] ss:$0 sm:$0xff] }
 0x329   :  { %v1025_v38 = vsub.f32 0.0, %v993_v55  ;;  %v2089_v28 = vpop.eup %2088  ;;  %v1403_v48 = vadd.f32 %v1259_v10, %v955_v60  ;;  %2102 = vlog2.f32 %v1269_v49  ;;  %v1260_v51 = vadd.f32 1.0, %v2732_v42 }
 0x32a   :  { %v2091_v12 = vpop.eup %2090  ;;  %1432 = vst [vmem:[#allocation7 + $0xe8] sm:$0xff] %v1400_v61  ;;  %927 = vst [vmem:[#allocation7 + $0x150] sm:$0xff] %v2089_v28  ;;  %v954_v53 = vmax.f32 %v2625_v62, 0.0  ;;  %v992_v11 = vand.u32 2147483647, %v2703_v35  ;;  %2104 = vtanh.f32 %v2730_v59  ;;  %v957_v41 = vmax.f32 %v2630_v46, 0.0 }
 0x32b   :  { %v1080_v7 = vmul.f32 1.442695, %v1025_v38  ;;  %v2093_v15 = vpop.eup %2092  ;;  %1435 = vst [vmem:[#allocation7 + $0x118] sm:$0xff] %v1403_v48  ;;  %926 = vst [vmem:[#allocation7 + $0x140] sm:$0xff] %v2091_v12  ;;  %v1248_v2 = vand.u32 2147483647, %v2705_v52  ;;  %2106 = vlog2.f32 %v1260_v51  ;;  %v1247_v16 = vmul.f32 %v2705_v52, %v1246_v50 }
 0x32c   :  { %929 = vst [vmem:[#allocation7 + $0x170] sm:$0xff] %v2093_v15  ;;  %v995_v29 = vand.u32 2147483647, %v2730_v59  ;;  %v1024_v9 = vsub.f32 0.0, %v992_v11  ;;  %v2749_v62 = vadd.f32 %v2380_v45, %v2566_v56  ;;  %v1273_v58 = vadd.f32 1.0, %v1272_v1 }
 0x32d   :  { %v2744_v5 = vpop.eup %2094  ;;  %2108 = vpow2.f32 %v1080_v7  ;;  %v1263_v44 = vmul.f32 -0.5, %v2732_v42  ;;  %v2755_v57 = vadd.f32 %v2584_v30, %v2380_v45  ;;  %vm1249_vm1 = vcmp.lt.f32.partialorder %v1248_v2, 0.0004427343 }
 0x32e   :  { %v2097_v14 = vpop.eup %2096  ;;  %v1287_v46 = vadd.f32 1.0, %v2744_v5  ;;  %v1078_v20 = vmul.f32 1.442695, %v1024_v9  ;;  %v1027_v52 = vsub.f32 0.0, %v995_v29  ;;  %2110 = vtanh.f32 %v2749_v62 }
 0x32f   :  { %v2099_v17 = vpop.eup %2098  ;;  %v1244_v6 = vmul.f32 0.6931472, %v2097_v14  ;;  %v1275_v56 = vand.u32 2147483647, %v2723_v25  ;;  %v1290_v37 = vmul.f32 -0.5, %v2744_v5  ;;  %v956_v54 = vmax.f32 %v2647_v4, 0.0 }
 0x330   :  { %2112 = vlog2.f32 %v1287_v46  ;;  %928 = vst [vmem:[#allocation7 + $0x160] sm:$0xff] %v2099_v17  ;;  %v1084_v0 = vmul.f32 1.442695, %v1027_v52  ;;  %v994_v33 = vand.u32 2147483647, %v2749_v62  ;;  %v1274_v3 = vmul.f32 %v2723_v25, %v1273_v58 }
 0x331   :  { %v1250_v32 = vsel %vm1249_vm1, %v1247_v16, %v1244_v6  ;;  %2114 = vpow2.f32 %v1078_v20  ;;  %v1266_v40 = vand.u32 2147483647, %v2732_v42  ;;  %v1264_v60 = vadd.f32 1.0, %v1263_v44 }
 0x332   :  { %v2761_v45 = vpop.eup %2100  ;;  %v1402_v30 = vadd.f32 %v1250_v32, %v954_v53  ;;  %2116 = vtanh.f32 %v2755_v57  ;;  %v1026_v19 = vsub.f32 0.0, %v994_v33  ;;  %v997_v63 = vand.u32 2147483647, %v2755_v57 }
 0x333   :  { %v2103_v23 = vpop.eup %2102  ;;  %v1278_v43 = vadd.f32 1.0, %v2761_v45  ;;  %2118 = vpow2.f32 %v1084_v0  ;;  %v2773_v4 = vadd.f32 %v2769_v22, %v2591_v24  ;;  %vm1276_vm2 = vcmp.lt.f32.partialorder %v1275_v56, 0.0004427343 }
 0x334   :  { %1434 = vst [vmem:[#allocation7 + $0x108] sm:$0xff] %v1402_v30  ;;  %v1271_v47 = vmul.f32 0.6931472, %v2103_v23  ;;  %v2105_v34 = vpop.eup %2104  ;;  %v1291_v55 = vadd.f32 1.0, %v1290_v37  ;;  %v2777_v25 = vadd.f32 %v2769_v22, %v2601_v39  ;;  %v1082_v49 = vmul.f32 1.442695, %v1026_v19 }
 0x335   :  { %2120 = vlog2.f32 %v1278_v43  ;;  %v2107_v21 = vpop.eup %2106  ;;  %931 = vst [vmem:[#allocation7 + $0x190] sm:$0xff] %v2105_v34  ;;  %v1029_v61 = vsub.f32 0.0, %v997_v63  ;;  %v1265_v28 = vmul.f32 %v2732_v42, %v1264_v60  ;;  %v1281_v48 = vmul.f32 -0.5, %v2761_v45 }
 0x336   :  { %v1277_v31 = vsel %vm1276_vm2, %v1274_v3, %v1271_v47  ;;  %2122 = vtanh.f32 %v2773_v4  ;;  %v1262_v24 = vmul.f32 0.6931472, %v2107_v21  ;;  %vm1267_vm3 = vcmp.lt.f32.partialorder %v1266_v40, 0.0004427343 }
 0x337   :  { %v2780_v10 = vpop.eup %2108  ;;  %v1405_v38 = vadd.f32 %v1277_v31, %v957_v41  ;;  %v1293_v50 = vand.u32 2147483647, %v2744_v5  ;;  %2124 = vpow2.f32 %v1082_v49  ;;  %v1088_v51 = vmul.f32 1.442695, %v1029_v61 }
 0x338   :  { %v1305_v39 = vadd.f32 1.0, %v2780_v10  ;;  %v2111_v12 = vpop.eup %2110  ;;  %v1268_v1 = vsel %vm1267_vm3, %v1265_v28, %v1262_v24  ;;  %v996_v7 = vand.u32 2147483647, %v2773_v4  ;;  %2126 = vtanh.f32 %v2777_v25 }
 0x339   :  { %1437 = vst [vmem:[#allocation7 + $0x138] sm:$0xff] %v1405_v38  ;;  %v1404_v53 = vadd.f32 %v1268_v1, %v956_v54  ;;  %v1292_v42 = vmul.f32 %v2744_v5, %v1291_v55  ;;  %v1284_v11 = vand.u32 2147483647, %v2761_v45  ;;  %930 = vst [vmem:[#allocation7 + $0x180] sm:$0xff] %v2111_v12  ;;  %v1282_v29 = vadd.f32 1.0, %v1281_v48 }
 0x33a   :  { %v2113_v15 = vpop.eup %2112  ;;  %2128 = vlog2.f32 %v1305_v39  ;;  %v1028_v16 = vsub.f32 0.0, %v996_v7  ;;  %v959_v14 = vmax.f32 %v2672_v13, 0.0  ;;  %vm1294_vm4 = vcmp.lt.f32.partialorder %v1293_v50, 0.0004427343 }
 0x33b   :  { %v2790_v2 = vpop.eup %2114  ;;  %v1289_v41 = vmul.f32 0.6931472, %v2113_v15  ;;  %2130 = vpow2.f32 %v1088_v51  ;;  %1436 = vst [vmem:[#allocation7 + $0x128] sm:$0xff] %v1404_v53  ;;  %v1308_v58 = vmul.f32 -0.5, %v2780_v10  ;;  %v999_v6 = vand.u32 2147483647, %v2777_v25 }
 0x33c   :  { %v2117_v9 = vpop.eup %2116  ;;  %v1296_v44 = vadd.f32 1.0, %v2790_v2  ;;  %v1086_v17 = vmul.f32 1.442695, %v1028_v16  ;;  %v2800_v20 = vadd.f32 %v2769_v22, %v2608_v8  ;;  %v958_v56 = vmax.f32 %v2689_v27, 0.0 }
 0x33d   :  { %v2795_v5 = vpop.eup %2118  ;;  %v1295_v46 = vsel %vm1294_vm4, %v1292_v42, %v1289_v41  ;;  %933 = vst [vmem:[#allocation7 + $0x1b0] sm:$0xff] %v2117_v9  ;;  %v1283_v37 = vmul.f32 %v2761_v45, %v1282_v29  ;;  %vm2804_vm5 = vcmp.lt.f32.partialorder %v1284_v11, 0.0004427343  ;;  %v1299_v8 = vmul.f32 -0.5, %v2790_v2 }
 0x33e   :  { %v1407_v52 = vadd.f32 %v1295_v46, %v959_v14  ;;  %2132 = vlog2.f32 %v1296_v44  ;;  %v1323_v0 = vadd.f32 1.0, %v2795_v5  ;;  %v1031_v54 = vsub.f32 0.0, %v999_v6 }
 0x33f   :  { %v2121_v13 = vpop.eup %2120  ;;  %2134 = vpow2.f32 %v1086_v17  ;;  %v1309_v27 = vadd.f32 1.0, %v1308_v58  ;;  %v1311_v40 = vand.u32 2147483647, %v2780_v10  ;;  %v1326_v45 = vmul.f32 -0.5, %v2795_v5 }
 0x340   :  { %v2123_v33 = vpop.eup %2122  ;;  %1439 = vst [vmem:[#allocation7 + $0x158] sm:$0xff] %v1407_v52  ;;  %v1280_v30 = vmul.f32 0.6931472, %v2121_v13  ;;  %2136 = vtanh.f32 %v2800_v20  ;;  %v1092_v60 = vmul.f32 1.442695, %v1031_v54  ;;  %v2820_v47 = vadd.f32 %v2769_v22, %v2613_v18 }
 0x341   :  { %2138 = vlog2.f32 %v1323_v0  ;;  %932 = vst [vmem:[#allocation7 + $0x1a0] sm:$0xff] %v2123_v33  ;;  %v2813_v23 = vpop.eup %2124  ;;  %v998_v43 = vand.u32 2147483647, %v2800_v20  ;;  %v961_v34 = vmax.f32 %v2693_v36, 0.0  ;;  %v960_v31 = vmax.f32 %v2703_v35, 0.0 }
 0x342   :  { %v1286_v3 = vsel %vm2804_vm5, %v1283_v37, %v1280_v30  ;;  %v2127_v19 = vpop.eup %2126  ;;  %v1314_v55 = vadd.f32 1.0, %v2813_v23  ;;  %v1300_v49 = vadd.f32 1.0, %v1299_v8  ;;  %2140 = vpow2.f32 %v1092_v60 }
 0x343   :  { %v1406_v63 = vadd.f32 %v1286_v3, %v958_v56  ;;  %935 = vst [vmem:[#allocation7 + $0x1d0] sm:$0xff] %v2127_v19  ;;  %v1030_v61 = vsub.f32 0.0, %v998_v43  ;;  %v1310_v18 = vmul.f32 %v2780_v10, %v1309_v27  ;;  %v1001_v28 = vand.u32 2147483647, %v2820_v47 }
 0x344   :  { %v2129_v21 = vpop.eup %2128  ;;  %2142 = vlog2.f32 %v1314_v55  ;;  %vm1312_vm6 = vcmp.lt.f32.partialorder %v1311_v40, 0.0004427343  ;;  %v1302_v36 = vand.u32 2147483647, %v2790_v2  ;;  %v1327_v48 = vadd.f32 1.0, %v1326_v45 }
 0x345   :  { %v2825_v38 = vpop.eup %2130  ;;  %1438 = vst [vmem:[#allocation7 + $0x148] sm:$0xff] %v1406_v63  ;;  %v1307_v24 = vmul.f32 0.6931472, %v2129_v21  ;;  %v1329_v39 = vand.u32 2147483647, %v2795_v5  ;;  %2144 = vtanh.f32 %v2820_v47  ;;  %v1301_v7 = vmul.f32 %v2790_v2, %v1300_v49 }
 0x346   :  { %v1341_v50 = vadd.f32 1.0, %v2825_v38  ;;  %v1090_v12 = vmul.f32 1.442695, %v1030_v61  ;;  %v1317_v10 = vmul.f32 -0.5, %v2813_v23  ;;  %v1033_v42 = vsub.f32 0.0, %v1001_v28 }
 0x347   :  { %v1313_v35 = vsel %vm1312_vm6, %v1310_v18, %v1307_v24  ;;  %v2839_v11 = vadd.f32 %v2769_v22, %v2618_v26  ;;  %vm1303_vm7 = vcmp.lt.f32.partialorder %v1302_v36, 0.0004427343  ;;  %v963_v29 = vmax.f32 %v2730_v59, 0.0 }
 0x348   :  { %v2133_v1 = vpop.eup %2132  ;;  %v1409_v51 = vadd.f32 %v1313_v35, %v961_v34  ;;  %2146 = vlog2.f32 %v1341_v50  ;;  %v1328_v16 = vmul.f32 %v2795_v5, %v1327_v48  ;;  %v1344_v58 = vmul.f32 -0.5, %v2825_v38 }
 0x349   :  { %v2835_v15 = vpop.eup %2134  ;;  %v1298_v53 = vmul.f32 0.6931472, %v2133_v1  ;;  %2148 = vpow2.f32 %v1090_v12  ;;  %v1096_v44 = vmul.f32 1.442695, %v1033_v42  ;;  %v1318_v22 = vadd.f32 1.0, %v1317_v10 }
 0x34a   :  { %v2137_v41 = vpop.eup %2136  ;;  %1441 = vst [vmem:[#allocation7 + $0x178] sm:$0xff] %v1409_v51  ;;  %v1332_v2 = vadd.f32 1.0, %v2835_v15  ;;  %2150 = vtanh.f32 %v2839_v11  ;;  %vm1330_vm8 = vcmp.lt.f32.partialorder %v1329_v39, 0.0004427343  ;;  %v1320_v17 = vand.u32 2147483647, %v2813_v23 }
 0x34b   :  { %v2139_v9 = vpop.eup %2138  ;;  %v1304_v14 = vsel %vm1303_vm7, %v1301_v7, %v1298_v53  ;;  %934 = vst [vmem:[#allocation7 + $0x1c0] sm:$0xff] %v2137_v41  ;;  %v1000_v59 = vand.u32 2147483647, %v2839_v11  ;;  %v1347_v52 = vand.u32 2147483647, %v2825_v38  ;;  %v1345_v37 = vadd.f32 1.0, %v1344_v58 }
 0x34c   :  { %v1408_v46 = vadd.f32 %v1304_v14, %v960_v31  ;;  %v1325_v26 = vmul.f32 0.6931472, %v2139_v9  ;;  %2152 = vlog2.f32 %v1332_v2  ;;  %v2141_v5 = vpop.eup %2140  ;;  %v1335_v32 = vmul.f32 -0.5, %v2835_v15 }
 0x34d   :  { %2154 = vpow2.f32 %v1096_v44  ;;  %v1359_v0 = vadd.f32 1.0, %v2141_v5  ;;  %v1319_v30 = vmul.f32 %v2813_v23, %v1318_v22  ;;  %v1032_v8 = vsub.f32 0.0, %v1000_v59 }
 0x34e   :  { %1440 = vst [vmem:[#allocation7 + $0x168] sm:$0xff] %v1408_v46  ;;  %v1331_v6 = vsel %vm1330_vm8, %v1328_v16, %v1325_v26  ;;  %v2143_v56 = vpop.eup %2142  ;;  %v962_v27 = vmax.f32 %v2749_v62, 0.0  ;;  %vm1321_vm9 = vcmp.lt.f32.partialorder %v1320_v17, 0.0004427343  ;;  %v965_v3 = vmax.f32 %v2755_v57, 0.0 }
 0x34f   :  { %v1411_v13 = vadd.f32 %v1331_v6, %v963_v29  ;;  %v1316_v33 = vmul.f32 0.6931472, %v2143_v56  ;;  %v2145_v54 = vpop.eup %2144  ;;  %2156 = vlog2.f32 %v1359_v0  ;;  %vm2853_vm10 = vcmp.lt.f32.partialorder %v1347_v52, 0.0004427343 }
 0x350   :  { %937 = vst [vmem:[#allocation7 + $0x1f0] sm:$0xff] %v2145_v54  ;;  %v1094_v43 = vmul.f32 1.442695, %v1032_v8  ;;  %v1346_v34 = vmul.f32 %v2825_v38, %v1345_v37  ;;  %v1336_v55 = vadd.f32 1.0, %v1335_v32  ;;  %v1338_v62 = vand.u32 2147483647, %v2835_v15 }
 0x351   :  { %1443 = vst [vmem:[#allocation7 + $0x198] sm:$0xff] %v1411_v13  ;;  %v1322_v45 = vsel %vm1321_vm9, %v1319_v30, %v1316_v33  ;;  %v1362_v21 = vmul.f32 -0.5, %v2141_v5  ;;  %v964_v38 = vmax.f32 %v2773_v4, 0.0  ;;  %v1365_v39 = vand.u32 2147483647, %v2141_v5 }
 0x352   :  { %v2147_v40 = vpop.eup %2146  ;;  %v1410_v63 = vadd.f32 %v1322_v45, %v962_v27  ;;  %2158 = vpow2.f32 %v1094_v43  ;;  %v1337_v36 = vmul.f32 %v2835_v15, %v1336_v55  ;;  %vm1339_vm11 = vcmp.lt.f32.partialorder %v1338_v62, 0.0004427343 }
 0x353   :  { %v2149_v19 = vpop.eup %2148  ;;  %v1343_v23 = vmul.f32 0.6931472, %v2147_v40  ;;  %v1363_v48 = vadd.f32 1.0, %v1362_v21  ;;  %v967_v53 = vmax.f32 %v2777_v25, 0.0  ;;  %vm1366_vm12 = vcmp.lt.f32.partialorder %v1365_v39, 0.0004427343 }
 0x354   :  { %v1350_v31 = vadd.f32 1.0, %v2149_v19  ;;  %v2151_v49 = vpop.eup %2150  ;;  %1442 = vst [vmem:[#allocation7 + $0x188] sm:$0xff] %v1410_v63  ;;  %v1353_v12 = vmul.f32 -0.5, %v2149_v19  ;;  %v1356_v4 = vand.u32 2147483647, %v2149_v19  ;;  %v966_v46 = vmax.f32 %v2800_v20, 0.0 }
 0x355   :  { %v1349_v57 = vsel %vm2853_vm10, %v1346_v34, %v1343_v23  ;;  %936 = vst [vmem:[#allocation7 + $0x1e0] sm:$0xff] %v2151_v49  ;;  %v1364_v10 = vmul.f32 %v2141_v5, %v1363_v48  ;;  %v969_v52 = vmax.f32 %v2820_v47, 0.0  ;;  %v968_v30 = vmax.f32 %v2839_v11, 0.0 }
 0x356   :  { %v2153_v61 = vpop.eup %2152  ;;  %v1413_v24 = vadd.f32 %v1349_v57, %v965_v3  ;;  %2160 = vlog2.f32 %v1350_v31  ;;  %v1354_v42 = vadd.f32 1.0, %v1353_v12  ;;  %vm1357_vm13 = vcmp.lt.f32.partialorder %v1356_v4, 0.0004427343 }
 0x357   :  { %v2155_v18 = vpop.eup %2154  ;;  %v1334_v28 = vmul.f32 0.6931472, %v2153_v61 }
 0x358   :  { %1445 = vst [vmem:[#allocation7 + $0x1b8] sm:$0xff] %v1413_v24  ;;  %v1377_v50 = vadd.f32 1.0, %v2155_v18  ;;  %v1380_v15 = vmul.f32 -0.5, %v2155_v18  ;;  %v1355_v58 = vmul.f32 %v2149_v19, %v1354_v42  ;;  %v1383_v26 = vand.u32 2147483647, %v2155_v18 }
 0x359   :  { %v1340_v35 = vsel %vm1339_vm11, %v1337_v36, %v1334_v28  ;;  %v2157_v51 = vpop.eup %2156 }
 0x35a   :  { %v1412_v1 = vadd.f32 %v1340_v35, %v964_v38  ;;  %2162 = vlog2.f32 %v1377_v50  ;;  %v1361_v7 = vmul.f32 0.6931472, %v2157_v51  ;;  %v1381_v44 = vadd.f32 1.0, %v1380_v15 }
 0x35b   :  { %vm1384_vm14 = vcmp.lt.f32.partialorder %v1383_v26, 0.0004427343 }
 0x35c   :  { %1444 = vst [vmem:[#allocation7 + $0x1a8] sm:$0xff] %v1412_v1  ;;  %v2159_v41 = vpop.eup %2158  ;;  %v1367_v29 = vsel %vm1366_vm12, %v1364_v10, %v1361_v7  ;;  %v1382_v6 = vmul.f32 %v2155_v18, %v1381_v44 }
 0x35d   :  { %v1415_v16 = vadd.f32 %v1367_v29, %v967_v53  ;;  %v1368_v2 = vadd.f32 1.0, %v2159_v41  ;;  %v1371_v59 = vmul.f32 -0.5, %v2159_v41  ;;  %v1374_v32 = vand.u32 2147483647, %v2159_v41 }
 0x35f   :  { %1447 = vst [vmem:[#allocation7 + $0x1d8] sm:$0xff] %v1415_v16  ;;  %2164 = vlog2.f32 %v1368_v2  ;;  %v1372_v37 = vadd.f32 1.0, %v1371_v59  ;;  %vm1375_vm15 = vcmp.lt.f32.partialorder %v1374_v32, 0.0004427343 }
 0x360   :  { %v2161_v9 = vpop.eup %2160 }
 0x361   :  { %v1352_v14 = vmul.f32 0.6931472, %v2161_v9  ;;  %v1373_v33 = vmul.f32 %v2159_v41, %v1372_v37 }
 0x363   :  { %v1358_v22 = vsel %vm1357_vm13, %v1355_v58, %v1352_v14 }
 0x364   :  { %v2163_v25 = vpop.eup %2162  ;;  %v1414_v17 = vadd.f32 %v1358_v22, %v966_v46 }
 0x365   :  { %v1379_v5 = vmul.f32 0.6931472, %v2163_v25 }
 0x366   :  { %1446 = vst [vmem:[#allocation7 + $0x1c8] sm:$0xff] %v1414_v17 }
 0x367   :  { %v1385_v56 = vsel %vm1384_vm14, %v1382_v6, %v1379_v5 }
 0x368   :  { %v1417_v13 = vadd.f32 %v1385_v56, %v969_v52 }
 0x369   :  { %v2165_v0 = vpop.eup %2164 }
 0x36a   :  { %1449 = vst [vmem:[#allocation7 + $0x1f8] sm:$0xff] %v1417_v13  ;;  %v1370_v20 = vmul.f32 0.6931472, %v2165_v0 }
 0x36c   :  { %v1376_v8 = vsel %vm1375_vm15, %v1373_v33, %v1370_v20 }
 0x36d   :  { %v1416_v54 = vadd.f32 %v1376_v8, %v968_v30 }
 0x36f   :  { %1448 = vst [vmem:[#allocation7 + $0x1e8] sm:$0xff] %v1416_v54 }
 0x370   :  { %2222 = shalt.err (!%p2219_p6)
}
 0x371   :  { %s2223_s10 = scalar_lea.hbm %s2881_s2, 8192 }
 0x372   :  { %p2224_p7 = scmp.ne.s32.totalorder %s2881_s2, %s2223_s10  ;;  %p2227_p8 = scmp.lt.u32.totalorder %s2223_s10, %s2881_s2 }
 0x374   :  { %p2229_p9 = pnand %p2227_p8, %p2224_p7 }
 0x376   :  { %2232 = shalt.err (!%p2229_p9)
}
 0x377   :  { %s2244_s15 = smov 256   ;;  %s2245_s16 = smov 16  }
 0x378   :  { %1461 = dma.vmem_to_hbm [thread:$0]  %s1456_s6, 8192, %s2881_s2, [#allocation4], %s2244_s15, %s2244_s15, %s2245_s16  }
 0x379   :  { %2237 = dma.done.wait [#allocation4], 8192  }
 0x37a   :  { %2238 = vsyncadd [#allocation4], 4294959104 }
 0x37b   :  { %1465 = vsyncpa [#allocation3], 1 }
 0x37c   :  { %1466 = vsyncpa [#allocation6], 1 }
 0x37d   :  { %1467 = vsyncpa [#allocation4], 1 }

</bundles_post_ra>
